<compile_context>
chip_gen: v6e
topology: v6e:2x2x1
jax: 0.10.0
libtpu: 0.0.40
codegen_flags: <defaults>
</compile_context>

<pallas_src>
import functools
import math

import jax
import jax.numpy as jnp
from jax.experimental import pallas as pl
from jax.experimental.pallas import tpu as pltpu

_SQRT1_2 = 1.0 / math.sqrt(2.0)


def _gelu(v):
    # exact (erf) GELU, matching torch.nn.GELU() default
    return 0.5 * v * (1.0 + jax.lax.erf(v * _SQRT1_2))


# ----------------------------------------------------------------------------
# Fused whole-model kernel (all stages, enc + dec + head + residual + sum)
# ----------------------------------------------------------------------------
def _make_model_kernel(stage_statics, b_tile, out_chn, out_len, max_pad):
    """Kernel operating on one batch tile laid out as (b_tile*chn, L)."""

    def mlp_r(a, w1, b1, w2, b2):            # contraction over the LAST axis
        h = _gelu(jnp.dot(a, w1, preferred_element_type=jnp.float32) + b1)
        return jnp.dot(h, w2, preferred_element_type=jnp.float32) + b2

    def mlp_l(a, w1, b1, w2, b2):            # contraction over the FIRST axis
        # w1/w2 are block-diagonal over the batch tile: kron(I_B, W^T)
        h = _gelu(jnp.dot(w1, a, preferred_element_type=jnp.float32) + b1)
        return jnp.dot(w2, h, preferred_element_type=jnp.float32) + b2

    def kernel(*refs):
        x_ref = refs[0]
        y_ref = refs[-2]
        x_scr = refs[-1]
        it = iter(refs[1:-2])

        def nxt(n=1):
            if n == 1:
                return next(it)[...]
            return tuple(next(it)[...] for _ in range(n))

        # running residual state; the left `max_pad` columns stay zero and act
        # as the per-stage left padding (never written below).
        x_scr[...] = x_ref[...]
        y = jnp.zeros((b_tile * out_chn, out_len), jnp.float32)

        for st in stage_statics:                      # statically unrolled
            pad = st['pad']
            xp = x_scr[:, (max_pad - pad):]           # (B*C, lp), left pad cols = 0

            # ----------------------- PatchEncoder -----------------------
            a = xp + mlp_l(xp, *nxt(4))               # channel MLP ('trunc')
            a = a + mlp_r(a, *nxt(4))                 # inter-patch MLP (W (x) I_P)
            a = a + mlp_r(a, *nxt(4))                 # intra-patch MLP (I_L1 (x) W)
            rw, rb = nxt(), nxt()
            emb = jnp.dot(a, rw, preferred_element_type=jnp.float32) + rb   # (B*C, l1)

            # ----------------------- PatchDecoder -----------------------
            ew, eb = nxt(), nxt()
            z = jnp.dot(emb, ew, preferred_element_type=jnp.float32) + eb   # (B*C, lp)
            z = z + mlp_r(z, *nxt(4))                 # intra-patch MLP
            z = z + mlp_r(z, *nxt(4))                 # inter-patch MLP
            comp = z + mlp_l(z, *nxt(4))              # channel MLP ('trunc')

            # fused residual update (x = x - comp[:, pad:]); the zero left
            # padding for the next stage is preserved automatically.
            x_scr[:, max_pad:] = x_scr[:, max_pad:] - comp[:, pad:]

            # ---------------------- PredictionHead ----------------------
            h = mlp_l(emb, *nxt(4))                   # channel MLP
            if st['head_proj']:
                jw, jb = nxt(), nxt()
                h = h + (jnp.dot(jw, emb, preferred_element_type=jnp.float32) + jb)
            else:
                h = h + emb                           # 'trunc' jump (out_chn == in_chn)
            lw1, lb1, lw2, lb2, ljw, ljb = nxt(6)
            pred = mlp_r(h, lw1, lb1, lw2, lb2) + (
                jnp.dot(h, ljw, preferred_element_type=jnp.float32) + ljb)  # length MLP ('proj')
            y = y + pred                              # reduction = 'sum'

        y_ref[...] = y

    return kernel


# ----------------------------------------------------------------------------
# Parameter init (PyTorch nn.Linear-style shapes / init range)
# ----------------------------------------------------------------------------
def _init_linear(key, fin, fout):
    k1, k2 = jax.random.split(key)
    bound = 1.0 / math.sqrt(fin)
    w = jax.random.uniform(k1, (fin, fout), jnp.float32, -bound, bound)
    b = jax.random.uniform(k2, (fout,), jnp.float32, -bound, bound)
    return w, b


def _init_mlp(key, fin, fhid, fout, jump):
    k1, k2, k3 = jax.random.split(key, 3)
    w1, b1 = _init_linear(k1, fin, fhid)
    w2, b2 = _init_linear(k2, fhid, fout)
    p = dict(w1=w1, b1=b1, w2=w2, b2=b2)
    if jump == 'proj':
        p['jw'], p['jb'] = _init_linear(k3, fin, fout)
    else:
        assert fout <= fin, "'trunc' jump requires out_features <= in_features"
    return p


def init_msd_mixer(key, cfg):
    in_len, out_len = cfg['in_len'], cfg['out_len']
    in_chn, ex_chn, out_chn = cfg['in_chn'], cfg['ex_chn'], cfg['out_chn']
    hid_len, hid_chn, hid_pch, hid_pred = (cfg['hid_len'], cfg['hid_chn'],
                                           cfg['hid_pch'], cfg['hid_pred'])
    all_chn = in_chn + ex_chn
    stages = []
    for patch in cfg['patch_sizes']:
        pad = (patch - in_len % patch) % patch
        l1 = (in_len + pad) // patch
        key, *ks = jax.random.split(key, 11)
        enc = dict(ch=_init_mlp(ks[0], all_chn, hid_chn, in_chn, 'trunc'),
                   inter=_init_mlp(ks[1], l1, hid_len, l1, 'trunc'),
                   intra=_init_mlp(ks[2], patch, hid_pch, patch, 'trunc'))
        enc['red_w'], enc['red_b'] = _init_linear(ks[3], patch, 1)   # nn.Linear(patch, 1)
        dec = dict(intra=_init_mlp(ks[4], patch, hid_pch, patch, 'trunc'),
                   inter=_init_mlp(ks[5], l1, hid_len, l1, 'trunc'),
                   ch=_init_mlp(ks[6], in_chn, hid_chn, in_chn, 'trunc'))
        dec['exp_w'], dec['exp_b'] = _init_linear(ks[7], 1, patch)   # nn.Linear(1, patch)
        head_proj = (in_chn != out_chn)
        head = dict(ch=_init_mlp(ks[8], in_chn, hid_chn, out_chn,
                                 'proj' if head_proj else 'trunc'),
                    len=_init_mlp(ks[9], l1, hid_pred, out_len, 'proj'))
        stages.append(dict(
            raw=dict(enc=enc, dec=dec, head=head),
            static=dict(pad=pad, patch=patch, l1=l1, in_chn=in_chn,
                        out_chn=out_chn, out_len=out_len, head_proj=head_proj),
        ))
    return stages


# ----------------------------------------------------------------------------
# Weight packing (done once on the host)
# ----------------------------------------------------------------------------
def _row(b):
    return b[None, :]


def _pack_channel_mlp(p, b_tile):
    # contraction over the channel axis with batch folded into rows:
    # W -> kron(I_B, W^T), bias -> tiled column vector
    eye_b = jnp.eye(b_tile, dtype=jnp.float32)
    out = [jnp.kron(eye_b, p['w1'].T), jnp.tile(p['b1'], b_tile)[:, None],
           jnp.kron(eye_b, p['w2'].T), jnp.tile(p['b2'], b_tile)[:, None]]
    if 'jw' in p:
        out += [jnp.kron(eye_b, p['jw'].T), jnp.tile(p['jb'], b_tile)[:, None]]
    return out


def _pack_inter_mlp(p, patch):
    # MLP over L1 (MAJOR half of the merged (L1, patch) axis): W -> W (x) I_P
    eye_p = jnp.eye(patch, dtype=jnp.float32)
    return [jnp.kron(p['w1'], eye_p), _row(jnp.repeat(p['b1'], patch)),
            jnp.kron(p['w2'], eye_p), _row(jnp.repeat(p['b2'], patch))]


def _pack_intra_mlp(p, l1):
    # MLP over patch (MINOR half of the merged (L1, patch) axis): W -> I_L1 (x) W
    eye_l = jnp.eye(l1, dtype=jnp.float32)
    return [jnp.kron(eye_l, p['w1']), _row(jnp.tile(p['b1'], l1)),
            jnp.kron(eye_l, p['w2']), _row(jnp.tile(p['b2'], l1))]


def _pack_stage(raw, l1, patch, b_tile):
    eye_l = jnp.eye(l1, dtype=jnp.float32)
    enc, dec, head = raw['enc'], raw['dec'], raw['head']
    packed = []
    # encoder
    packed += _pack_channel_mlp(enc['ch'], b_tile)
    packed += _pack_inter_mlp(enc['inter'], patch)
    packed += _pack_intra_mlp(enc['intra'], l1)
    packed += [jnp.kron(eye_l, enc['red_w']), _row(jnp.tile(enc['red_b'], l1))]
    # decoder
    packed += [jnp.kron(eye_l, dec['exp_w']), _row(jnp.tile(dec['exp_b'], l1))]
    packed += _pack_intra_mlp(dec['intra'], l1)
    packed += _pack_inter_mlp(dec['inter'], patch)
    packed += _pack_channel_mlp(dec['ch'], b_tile)
    # prediction head
    packed += _pack_channel_mlp(head['ch'], b_tile)
    packed += [head['len']['w1'], _row(head['len']['b1']),
               head['len']['w2'], _row(head['len']['b2']),
               head['len']['jw'], _row(head['len']['jb'])]
    return packed


def _choose_batch_tile(batch, all_chn, out_chn, target=8):
    # batch tile such that the (sublane) block dims are multiples of 8
    bt = max(1, min(target, batch))
    while (bt * all_chn) % 8 != 0 or (bt * out_chn) % 8 != 0:
        bt += 1
    padded_batch = ((batch + bt - 1) // bt) * bt
    return bt, padded_batch


# ----------------------------------------------------------------------------
# Model forward (host glue: transpose / last-norm / batch fold; math in kernel)
# ----------------------------------------------------------------------------
def msd_mixer_forward(x, packed_weights, stage_statics, cfg, b_tile,
                      padded_batch, max_pad):
    batch = x.shape[0]
    in_chn, out_chn = cfg['in_chn'], cfg['out_chn']
    in_len, out_len = cfg['in_len'], cfg['out_len']
    all_chn = in_chn + cfg['ex_chn']

    xc = jnp.transpose(x, (0, 2, 1))                        # (b, c, in_len)
    x_last = None
    if cfg['last_norm']:
        x_last = xc[:, :, -1:]
        xc = xc - x_last
    if padded_batch != batch:
        xc = jnp.pad(xc, ((0, padded_batch - batch), (0, 0), (0, 0)))
    x2 = xc.reshape(padded_batch * all_chn, in_len)         # batch folded into rows
    if max_pad:
        x2 = jnp.pad(x2, ((0, 0), (max_pad, 0)))            # one left pad for ALL stages
    lp_full = in_len + max_pad

    kernel = _make_model_kernel(stage_statics, b_tile, out_chn, out_len, max_pad)
    grid = (padded_batch // b_tile,)
    in_specs = [pl.BlockSpec((b_tile * all_chn, lp_full), lambda i: (i, 0))]
    in_specs += [pl.BlockSpec(w.shape, lambda i: (0, 0)) for w in packed_weights]
    out_specs = pl.BlockSpec((b_tile * out_chn, out_len), lambda i: (i, 0))

    y = pl.pallas_call(
        kernel,
        out_shape=jax.ShapeDtypeStruct((padded_batch * out_chn, out_len),
                                       jnp.float32),
        grid=grid,
        in_specs=in_specs,
        out_specs=out_specs,
        scratch_shapes=[pltpu.VMEM((b_tile * all_chn, lp_full), jnp.float32)],
        compiler_params=pltpu.CompilerParams(
            dimension_semantics=("parallel",),
            vmem_limit_bytes=32 * 1024 * 1024),
    )(x2, *packed_weights)

    y = y.reshape(padded_batch, out_chn, out_len)[:batch]
    if cfg['last_norm'] and out_chn == in_chn:
        y = y + x_last
    return jnp.transpose(y, (0, 2, 1))                      # (b, out_len, out_chn)


# ----------------------------------------------------------------------------
# Pure-JAX reference (torch-equivalent op order) for correctness checking
# ----------------------------------------------------------------------------
_HI = jax.lax.Precision.HIGHEST


def _ref_mlp(x, p, dim, out_f):
    x = jnp.swapaxes(x, dim, -1)
    h = _gelu(jnp.dot(x, p['w1'], precision=_HI) + p['b1'])
    net = jnp.dot(h, p['w2'], precision=_HI) + p['b2']
    jump = (jnp.dot(x, p['jw'], precision=_HI) + p['jb']) if 'jw' in p else x
    y = jump[..., :out_f] + net
    return jnp.swapaxes(y, dim, -1)


def msd_mixer_reference(x, stages, cfg):
    x = jnp.transpose(x, (0, 2, 1))
    x_last = None
    if cfg['last_norm']:
        x_last = x[:, :, -1:]
        x = x - x_last
    preds = []
    for stage in stages:
        st, raw = stage['static'], stage['raw']
        pad, patch, l1 = st['pad'], st['patch'], st['l1']
        x_in = jnp.pad(x, ((0, 0), (0, 0), (pad, 0)))
        b, c, lp = x_in.shape
        x4 = x_in.reshape(b, c, l1, patch)
        x4 = _ref_mlp(x4, raw['enc']['ch'], 1, cfg['in_chn'])
        x4 = _ref_mlp(x4, raw['enc']['inter'], 2, l1)
        x4 = _ref_mlp(x4, raw['enc']['intra'], 3, patch)
        emb = (jnp.dot(x4, raw['enc']['red_w'], precision=_HI)
               + raw['enc']['red_b'])[..., 0]
        z = (jnp.dot(emb[..., None], raw['dec']['exp_w'], precision=_HI)
             + raw['dec']['exp_b'])
        z = _ref_mlp(z, raw['dec']['intra'], 3, patch)
        z = _ref_mlp(z, raw['dec']['inter'], 2, l1)
        z = _ref_mlp(z, raw['dec']['ch'], 1, cfg['in_chn'])
        comp = z.reshape(b, cfg['in_chn'], lp)[:, :, pad:]
        h = _ref_mlp(emb, raw['head']['ch'], 1, cfg['out_chn'])
        pred = _ref_mlp(h, raw['head']['len'], 2, cfg['out_len'])
        x = x - comp
        preds.append(pred)
    y = preds[0]
    for p in preds[1:]:
        y = y + p
    if cfg['last_norm'] and cfg['out_chn'] == cfg['in_chn']:
        y = y + x_last
    return jnp.transpose(y, (0, 2, 1))


# ----------------------------------------------------------------------------
if __name__ == "__main__":
    cfg = dict(
        in_len=16, out_len=8, in_chn=4, ex_chn=0, out_chn=4,
        patch_sizes=[4, 6],
        hid_len=32, hid_chn=32, hid_pch=32, hid_pred=32,
        norm=None, last_norm=True, drop=0.0, reduction='sum',
    )
    # TODO(synk): norm='bn'/'in' (BatchNorm2d / InstanceNorm2d), the
    # x_mark / x_mask / x_dec auxiliary inputs (ex_chn > 0) and the
    # out_len==0 early-return path are not exercised (matches the norm=None /
    # marks=None / ex_chn=0 config); DropPath with drop=0.0 in eval is a no-op.
    assert cfg['ex_chn'] == 0 and cfg['reduction'] == 'sum'
    assert cfg['norm'] is None and cfg['out_len'] > 0 and cfg['out_chn'] > 0

    key = jax.random.PRNGKey(0)
    k_x, k_p = jax.random.split(key)
    stages = init_msd_mixer(k_p, cfg)

    batch = 2
    x = jax.random.normal(k_x, (batch, cfg['in_len'], cfg['in_chn']), jnp.float32)

    all_chn = cfg['in_chn'] + cfg['ex_chn']
    b_tile, padded_batch = _choose_batch_tile(batch, all_chn, cfg['out_chn'])
    max_pad = max(st['static']['pad'] for st in stages)
    packed = []
    for st in stages:
        packed += _pack_stage(st['raw'], st['static']['l1'],
                              st['static']['patch'], b_tile)
    stage_statics = [st['static'] for st in stages]

    fwd = jax.jit(functools.partial(
        msd_mixer_forward, packed_weights=packed, stage_statics=stage_statics,
        cfg=cfg, b_tile=b_tile, padded_batch=padded_batch, max_pad=max_pad))
    y = jax.block_until_ready(fwd(x))
    assert y.shape == (batch, cfg['out_len'], cfg['out_chn']), y.shape
    assert bool(jnp.all(jnp.isfinite(y)))

    # cross-check the fused Pallas path against a pure-JAX torch-equivalent ref
    # (all-f32 path; weight packing only adds exact zeros to the sums).
    y_ref = msd_mixer_reference(x, stages, cfg)
    err = float(jnp.max(jnp.abs(y - y_ref)))
    assert err < 1e-4, f"kernel mismatch vs reference: max abs err = {err}"

    print("KERNEL_OK")
</pallas_src>

<mosaic_0001>
module attributes {stable_mosaic.version = 11 : i64} {
  func.func @kernel(%arg0: i32, %arg1: memref<8x18xf32, #tpu.memory_space<vmem>>, %arg2: memref<64x8xf32, #tpu.memory_space<vmem>>, %arg3: memref<64x1xf32, #tpu.memory_space<vmem>>, %arg4: memref<8x64xf32, #tpu.memory_space<vmem>>, %arg5: memref<8x1xf32, #tpu.memory_space<vmem>>, %arg6: memref<16x128xf32, #tpu.memory_space<vmem>>, %arg7: memref<1x128xf32, #tpu.memory_space<vmem>>, %arg8: memref<128x16xf32, #tpu.memory_space<vmem>>, %arg9: memref<1x16xf32, #tpu.memory_space<vmem>>, %arg10: memref<16x128xf32, #tpu.memory_space<vmem>>, %arg11: memref<1x128xf32, #tpu.memory_space<vmem>>, %arg12: memref<128x16xf32, #tpu.memory_space<vmem>>, %arg13: memref<1x16xf32, #tpu.memory_space<vmem>>, %arg14: memref<16x4xf32, #tpu.memory_space<vmem>>, %arg15: memref<1x4xf32, #tpu.memory_space<vmem>>, %arg16: memref<4x16xf32, #tpu.memory_space<vmem>>, %arg17: memref<1x16xf32, #tpu.memory_space<vmem>>, %arg18: memref<16x128xf32, #tpu.memory_space<vmem>>, %arg19: memref<1x128xf32, #tpu.memory_space<vmem>>, %arg20: memref<128x16xf32, #tpu.memory_space<vmem>>, %arg21: memref<1x16xf32, #tpu.memory_space<vmem>>, %arg22: memref<16x128xf32, #tpu.memory_space<vmem>>, %arg23: memref<1x128xf32, #tpu.memory_space<vmem>>, %arg24: memref<128x16xf32, #tpu.memory_space<vmem>>, %arg25: memref<1x16xf32, #tpu.memory_space<vmem>>, %arg26: memref<64x8xf32, #tpu.memory_space<vmem>>, %arg27: memref<64x1xf32, #tpu.memory_space<vmem>>, %arg28: memref<8x64xf32, #tpu.memory_space<vmem>>, %arg29: memref<8x1xf32, #tpu.memory_space<vmem>>, %arg30: memref<64x8xf32, #tpu.memory_space<vmem>>, %arg31: memref<64x1xf32, #tpu.memory_space<vmem>>, %arg32: memref<8x64xf32, #tpu.memory_space<vmem>>, %arg33: memref<8x1xf32, #tpu.memory_space<vmem>>, %arg34: memref<4x32xf32, #tpu.memory_space<vmem>>, %arg35: memref<1x32xf32, #tpu.memory_space<vmem>>, %arg36: memref<32x8xf32, #tpu.memory_space<vmem>>, %arg37: memref<1x8xf32, #tpu.memory_space<vmem>>, %arg38: memref<4x8xf32, #tpu.memory_space<vmem>>, %arg39: memref<1x8xf32, #tpu.memory_space<vmem>>, %arg40: memref<64x8xf32, #tpu.memory_space<vmem>>, %arg41: memref<64x1xf32, #tpu.memory_space<vmem>>, %arg42: memref<8x64xf32, #tpu.memory_space<vmem>>, %arg43: memref<8x1xf32, #tpu.memory_space<vmem>>, %arg44: memref<18x192xf32, #tpu.memory_space<vmem>>, %arg45: memref<1x192xf32, #tpu.memory_space<vmem>>, %arg46: memref<192x18xf32, #tpu.memory_space<vmem>>, %arg47: memref<1x18xf32, #tpu.memory_space<vmem>>, %arg48: memref<18x96xf32, #tpu.memory_space<vmem>>, %arg49: memref<1x96xf32, #tpu.memory_space<vmem>>, %arg50: memref<96x18xf32, #tpu.memory_space<vmem>>, %arg51: memref<1x18xf32, #tpu.memory_space<vmem>>, %arg52: memref<18x3xf32, #tpu.memory_space<vmem>>, %arg53: memref<1x3xf32, #tpu.memory_space<vmem>>, %arg54: memref<3x18xf32, #tpu.memory_space<vmem>>, %arg55: memref<1x18xf32, #tpu.memory_space<vmem>>, %arg56: memref<18x96xf32, #tpu.memory_space<vmem>>, %arg57: memref<1x96xf32, #tpu.memory_space<vmem>>, %arg58: memref<96x18xf32, #tpu.memory_space<vmem>>, %arg59: memref<1x18xf32, #tpu.memory_space<vmem>>, %arg60: memref<18x192xf32, #tpu.memory_space<vmem>>, %arg61: memref<1x192xf32, #tpu.memory_space<vmem>>, %arg62: memref<192x18xf32, #tpu.memory_space<vmem>>, %arg63: memref<1x18xf32, #tpu.memory_space<vmem>>, %arg64: memref<64x8xf32, #tpu.memory_space<vmem>>, %arg65: memref<64x1xf32, #tpu.memory_space<vmem>>, %arg66: memref<8x64xf32, #tpu.memory_space<vmem>>, %arg67: memref<8x1xf32, #tpu.memory_space<vmem>>, %arg68: memref<64x8xf32, #tpu.memory_space<vmem>>, %arg69: memref<64x1xf32, #tpu.memory_space<vmem>>, %arg70: memref<8x64xf32, #tpu.memory_space<vmem>>, %arg71: memref<8x1xf32, #tpu.memory_space<vmem>>, %arg72: memref<3x32xf32, #tpu.memory_space<vmem>>, %arg73: memref<1x32xf32, #tpu.memory_space<vmem>>, %arg74: memref<32x8xf32, #tpu.memory_space<vmem>>, %arg75: memref<1x8xf32, #tpu.memory_space<vmem>>, %arg76: memref<3x8xf32, #tpu.memory_space<vmem>>, %arg77: memref<1x8xf32, #tpu.memory_space<vmem>>, %arg78: memref<8x8xf32, #tpu.memory_space<vmem>>, %arg79: memref<8x18xf32, #tpu.memory_space<vmem>>) attributes {dimension_semantics = [#tpu.dimension_semantics<parallel>], iteration_bounds = array<i64: 1>, scalar_prefetch = 0 : i64, scratch_operands = 1 : i64, tpu.core_type = #tpu.core_type<tc>, window_params = [{transform_indices = @transform_0, window_bounds = array<i64: 8, 18>}, {pipeline_mode = #tpu.pipeline_mode<synchronous>, transform_indices = @transform_1, window_bounds = array<i64: 64, 8>}, {pipeline_mode = #tpu.pipeline_mode<synchronous>, transform_indices = @transform_2, window_bounds = array<i64: 64, 1>}, {pipeline_mode = #tpu.pipeline_mode<synchronous>, transform_indices = @transform_3, window_bounds = array<i64: 8, 64>}, {pipeline_mode = #tpu.pipeline_mode<synchronous>, transform_indices = @transform_4, window_bounds = array<i64: 8, 1>}, {pipeline_mode = #tpu.pipeline_mode<synchronous>, transform_indices = @transform_5, window_bounds = array<i64: 16, 128>}, {pipeline_mode = #tpu.pipeline_mode<synchronous>, transform_indices = @transform_6, window_bounds = array<i64: 1, 128>}, {pipeline_mode = #tpu.pipeline_mode<synchronous>, transform_indices = @transform_7, window_bounds = array<i64: 128, 16>}, {pipeline_mode = #tpu.pipeline_mode<synchronous>, transform_indices = @transform_8, window_bounds = array<i64: 1, 16>}, {pipeline_mode = #tpu.pipeline_mode<synchronous>, transform_indices = @transform_9, window_bounds = array<i64: 16, 128>}, {pipeline_mode = #tpu.pipeline_mode<synchronous>, transform_indices = @transform_10, window_bounds = array<i64: 1, 128>}, {pipeline_mode = #tpu.pipeline_mode<synchronous>, transform_indices = @transform_11, window_bounds = array<i64: 128, 16>}, {pipeline_mode = #tpu.pipeline_mode<synchronous>, transform_indices = @transform_12, window_bounds = array<i64: 1, 16>}, {pipeline_mode = #tpu.pipeline_mode<synchronous>, transform_indices = @transform_13, window_bounds = array<i64: 16, 4>}, {pipeline_mode = #tpu.pipeline_mode<synchronous>, transform_indices = @transform_14, window_bounds = array<i64: 1, 4>}, {pipeline_mode = #tpu.pipeline_mode<synchronous>, transform_indices = @transform_15, window_bounds = array<i64: 4, 16>}, {pipeline_mode = #tpu.pipeline_mode<synchronous>, transform_indices = @transform_16, window_bounds = array<i64: 1, 16>}, {pipeline_mode = #tpu.pipeline_mode<synchronous>, transform_indices = @transform_17, window_bounds = array<i64: 16, 128>}, {pipeline_mode = #tpu.pipeline_mode<synchronous>, transform_indices = @transform_18, window_bounds = array<i64: 1, 128>}, {pipeline_mode = #tpu.pipeline_mode<synchronous>, transform_indices = @transform_19, window_bounds = array<i64: 128, 16>}, {pipeline_mode = #tpu.pipeline_mode<synchronous>, transform_indices = @transform_20, window_bounds = array<i64: 1, 16>}, {pipeline_mode = #tpu.pipeline_mode<synchronous>, transform_indices = @transform_21, window_bounds = array<i64: 16, 128>}, {pipeline_mode = #tpu.pipeline_mode<synchronous>, transform_indices = @transform_22, window_bounds = array<i64: 1, 128>}, {pipeline_mode = #tpu.pipeline_mode<synchronous>, transform_indices = @transform_23, window_bounds = array<i64: 128, 16>}, {pipeline_mode = #tpu.pipeline_mode<synchronous>, transform_indices = @transform_24, window_bounds = array<i64: 1, 16>}, {pipeline_mode = #tpu.pipeline_mode<synchronous>, transform_indices = @transform_25, window_bounds = array<i64: 64, 8>}, {pipeline_mode = #tpu.pipeline_mode<synchronous>, transform_indices = @transform_26, window_bounds = array<i64: 64, 1>}, {pipeline_mode = #tpu.pipeline_mode<synchronous>, transform_indices = @transform_27, window_bounds = array<i64: 8, 64>}, {pipeline_mode = #tpu.pipeline_mode<synchronous>, transform_indices = @transform_28, window_bounds = array<i64: 8, 1>}, {pipeline_mode = #tpu.pipeline_mode<synchronous>, transform_indices = @transform_29, window_bounds = array<i64: 64, 8>}, {pipeline_mode = #tpu.pipeline_mode<synchronous>, transform_indices = @transform_30, window_bounds = array<i64: 64, 1>}, {pipeline_mode = #tpu.pipeline_mode<synchronous>, transform_indices = @transform_31, window_bounds = array<i64: 8, 64>}, {pipeline_mode = #tpu.pipeline_mode<synchronous>, transform_indices = @transform_32, window_bounds = array<i64: 8, 1>}, {pipeline_mode = #tpu.pipeline_mode<synchronous>, transform_indices = @transform_33, window_bounds = array<i64: 4, 32>}, {pipeline_mode = #tpu.pipeline_mode<synchronous>, transform_indices = @transform_34, window_bounds = array<i64: 1, 32>}, {pipeline_mode = #tpu.pipeline_mode<synchronous>, transform_indices = @transform_35, window_bounds = array<i64: 32, 8>}, {pipeline_mode = #tpu.pipeline_mode<synchronous>, transform_indices = @transform_36, window_bounds = array<i64: 1, 8>}, {pipeline_mode = #tpu.pipeline_mode<synchronous>, transform_indices = @transform_37, window_bounds = array<i64: 4, 8>}, {pipeline_mode = #tpu.pipeline_mode<synchronous>, transform_indices = @transform_38, window_bounds = array<i64: 1, 8>}, {pipeline_mode = #tpu.pipeline_mode<synchronous>, transform_indices = @transform_39, window_bounds = array<i64: 64, 8>}, {pipeline_mode = #tpu.pipeline_mode<synchronous>, transform_indices = @transform_40, window_bounds = array<i64: 64, 1>}, {pipeline_mode = #tpu.pipeline_mode<synchronous>, transform_indices = @transform_41, window_bounds = array<i64: 8, 64>}, {pipeline_mode = #tpu.pipeline_mode<synchronous>, transform_indices = @transform_42, window_bounds = array<i64: 8, 1>}, {pipeline_mode = #tpu.pipeline_mode<synchronous>, transform_indices = @transform_43, window_bounds = array<i64: 18, 192>}, {pipeline_mode = #tpu.pipeline_mode<synchronous>, transform_indices = @transform_44, window_bounds = array<i64: 1, 192>}, {pipeline_mode = #tpu.pipeline_mode<synchronous>, transform_indices = @transform_45, window_bounds = array<i64: 192, 18>}, {pipeline_mode = #tpu.pipeline_mode<synchronous>, transform_indices = @transform_46, window_bounds = array<i64: 1, 18>}, {pipeline_mode = #tpu.pipeline_mode<synchronous>, transform_indices = @transform_47, window_bounds = array<i64: 18, 96>}, {pipeline_mode = #tpu.pipeline_mode<synchronous>, transform_indices = @transform_48, window_bounds = array<i64: 1, 96>}, {pipeline_mode = #tpu.pipeline_mode<synchronous>, transform_indices = @transform_49, window_bounds = array<i64: 96, 18>}, {pipeline_mode = #tpu.pipeline_mode<synchronous>, transform_indices = @transform_50, window_bounds = array<i64: 1, 18>}, {pipeline_mode = #tpu.pipeline_mode<synchronous>, transform_indices = @transform_51, window_bounds = array<i64: 18, 3>}, {pipeline_mode = #tpu.pipeline_mode<synchronous>, transform_indices = @transform_52, window_bounds = array<i64: 1, 3>}, {pipeline_mode = #tpu.pipeline_mode<synchronous>, transform_indices = @transform_53, window_bounds = array<i64: 3, 18>}, {pipeline_mode = #tpu.pipeline_mode<synchronous>, transform_indices = @transform_54, window_bounds = array<i64: 1, 18>}, {pipeline_mode = #tpu.pipeline_mode<synchronous>, transform_indices = @transform_55, window_bounds = array<i64: 18, 96>}, {pipeline_mode = #tpu.pipeline_mode<synchronous>, transform_indices = @transform_56, window_bounds = array<i64: 1, 96>}, {pipeline_mode = #tpu.pipeline_mode<synchronous>, transform_indices = @transform_57, window_bounds = array<i64: 96, 18>}, {pipeline_mode = #tpu.pipeline_mode<synchronous>, transform_indices = @transform_58, window_bounds = array<i64: 1, 18>}, {pipeline_mode = #tpu.pipeline_mode<synchronous>, transform_indices = @transform_59, window_bounds = array<i64: 18, 192>}, {pipeline_mode = #tpu.pipeline_mode<synchronous>, transform_indices = @transform_60, window_bounds = array<i64: 1, 192>}, {pipeline_mode = #tpu.pipeline_mode<synchronous>, transform_indices = @transform_61, window_bounds = array<i64: 192, 18>}, {pipeline_mode = #tpu.pipeline_mode<synchronous>, transform_indices = @transform_62, window_bounds = array<i64: 1, 18>}, {pipeline_mode = #tpu.pipeline_mode<synchronous>, transform_indices = @transform_63, window_bounds = array<i64: 64, 8>}, {pipeline_mode = #tpu.pipeline_mode<synchronous>, transform_indices = @transform_64, window_bounds = array<i64: 64, 1>}, {pipeline_mode = #tpu.pipeline_mode<synchronous>, transform_indices = @transform_65, window_bounds = array<i64: 8, 64>}, {pipeline_mode = #tpu.pipeline_mode<synchronous>, transform_indices = @transform_66, window_bounds = array<i64: 8, 1>}, {pipeline_mode = #tpu.pipeline_mode<synchronous>, transform_indices = @transform_67, window_bounds = array<i64: 64, 8>}, {pipeline_mode = #tpu.pipeline_mode<synchronous>, transform_indices = @transform_68, window_bounds = array<i64: 64, 1>}, {pipeline_mode = #tpu.pipeline_mode<synchronous>, transform_indices = @transform_69, window_bounds = array<i64: 8, 64>}, {pipeline_mode = #tpu.pipeline_mode<synchronous>, transform_indices = @transform_70, window_bounds = array<i64: 8, 1>}, {pipeline_mode = #tpu.pipeline_mode<synchronous>, transform_indices = @transform_71, window_bounds = array<i64: 3, 32>}, {pipeline_mode = #tpu.pipeline_mode<synchronous>, transform_indices = @transform_72, window_bounds = array<i64: 1, 32>}, {pipeline_mode = #tpu.pipeline_mode<synchronous>, transform_indices = @transform_73, window_bounds = array<i64: 32, 8>}, {pipeline_mode = #tpu.pipeline_mode<synchronous>, transform_indices = @transform_74, window_bounds = array<i64: 1, 8>}, {pipeline_mode = #tpu.pipeline_mode<synchronous>, transform_indices = @transform_75, window_bounds = array<i64: 3, 8>}, {pipeline_mode = #tpu.pipeline_mode<synchronous>, transform_indices = @transform_76, window_bounds = array<i64: 1, 8>}, {transform_indices = @transform_77, window_bounds = array<i64: 8, 8>}]} {
    %c0 = arith.constant 0 : index
    %c0_0 = arith.constant 0 : index
    %0 = vector.load %arg1[%c0, %c0_0] : memref<8x18xf32, #tpu.memory_space<vmem>>, vector<8x18xf32>
    %c0_1 = arith.constant 0 : index
    %c0_2 = arith.constant 0 : index
    %1 = vector.load %arg79[%c0_1, %c0_2] : memref<8x18xf32, #tpu.memory_space<vmem>>, vector<8x18xf32>
    tpu.vector_store %arg79[%c0_1, %c0_2], %0 {strides = array<i32>} : memref<8x18xf32, #tpu.memory_space<vmem>>, vector<8x18xf32>,
    %cst = arith.constant 0.000000e+00 : f32
    %2 = vector.broadcast %cst : f32 to vector<8x8xf32>
    %c0_3 = arith.constant 0 : index
    %c2 = arith.constant 2 : index
    %3 = vector.load %arg79[%c0_3, %c2] : memref<8x18xf32, #tpu.memory_space<vmem>>, vector<8x16xf32>
    %c0_4 = arith.constant 0 : index
    %c0_5 = arith.constant 0 : index
    %4 = vector.load %arg2[%c0_4, %c0_5] : memref<64x8xf32, #tpu.memory_space<vmem>>, vector<64x8xf32>
    %c0_6 = arith.constant 0 : index
    %c0_7 = arith.constant 0 : index
    %5 = vector.load %arg3[%c0_6, %c0_7] : memref<64x1xf32, #tpu.memory_space<vmem>>, vector<64x1xf32>
    %c0_8 = arith.constant 0 : index
    %c0_9 = arith.constant 0 : index
    %6 = vector.load %arg4[%c0_8, %c0_9] : memref<8x64xf32, #tpu.memory_space<vmem>>, vector<8x64xf32>
    %c0_10 = arith.constant 0 : index
    %c0_11 = arith.constant 0 : index
    %7 = vector.load %arg5[%c0_10, %c0_11] : memref<8x1xf32, #tpu.memory_space<vmem>>, vector<8x1xf32>
    %cst_12 = arith.constant dense<0.000000e+00> : vector<64x16xf32>
    %8 = tpu.matmul %4, %3, %cst_12 {dimension_numbers = #tpu.dot_dimension_numbers<[1], [0], [0], [1], [0, 0, 1, 1], [], []>} : vector<64x8xf32>, vector<8x16xf32>, vector<64x16xf32> -> vector<64x16xf32>
    %9 = vector.broadcast %5 : vector<64x1xf32> to vector<64x16xf32>
    %10 = arith.addf %8, %9 : vector<64x16xf32>
    %cst_13 = arith.constant 5.000000e-01 : f32
    %11 = vector.broadcast %cst_13 : f32 to vector<64x16xf32>
    %12 = arith.mulf %11, %10 : vector<64x16xf32>
    %cst_14 = arith.constant 0.707106769 : f32
    %13 = vector.broadcast %cst_14 : f32 to vector<64x16xf32>
    %14 = arith.mulf %10, %13 : vector<64x16xf32>
    %15 = math.erf %14 : vector<64x16xf32>
    %cst_15 = arith.constant 1.000000e+00 : f32
    %16 = vector.broadcast %cst_15 : f32 to vector<64x16xf32>
    %17 = arith.addf %16, %15 : vector<64x16xf32>
    %18 = arith.mulf %12, %17 : vector<64x16xf32>
    %cst_16 = arith.constant dense<0.000000e+00> : vector<8x16xf32>
    %19 = tpu.matmul %6, %18, %cst_16 {dimension_numbers = #tpu.dot_dimension_numbers<[1], [0], [0], [1], [0, 0, 1, 1], [], []>} : vector<8x64xf32>, vector<64x16xf32>, vector<8x16xf32> -> vector<8x16xf32>
    %20 = vector.broadcast %7 : vector<8x1xf32> to vector<8x16xf32>
    %21 = arith.addf %19, %20 : vector<8x16xf32>
    %22 = arith.addf %3, %21 : vector<8x16xf32>
    %c0_17 = arith.constant 0 : index
    %c0_18 = arith.constant 0 : index
    %23 = vector.load %arg6[%c0_17, %c0_18] : memref<16x128xf32, #tpu.memory_space<vmem>>, vector<16x128xf32>
    %c0_19 = arith.constant 0 : index
    %c0_20 = arith.constant 0 : index
    %24 = vector.load %arg7[%c0_19, %c0_20] : memref<1x128xf32, #tpu.memory_space<vmem>>, vector<1x128xf32>
    %c0_21 = arith.constant 0 : index
    %c0_22 = arith.constant 0 : index
    %25 = vector.load %arg8[%c0_21, %c0_22] : memref<128x16xf32, #tpu.memory_space<vmem>>, vector<128x16xf32>
    %c0_23 = arith.constant 0 : index
    %c0_24 = arith.constant 0 : index
    %26 = vector.load %arg9[%c0_23, %c0_24] : memref<1x16xf32, #tpu.memory_space<vmem>>, vector<1x16xf32>
    %cst_25 = arith.constant dense<0.000000e+00> : vector<8x128xf32>
    %27 = tpu.matmul %22, %23, %cst_25 {dimension_numbers = #tpu.dot_dimension_numbers<[1], [0], [0], [1], [0, 0, 1, 1], [], []>} : vector<8x16xf32>, vector<16x128xf32>, vector<8x128xf32> -> vector<8x128xf32>
    %28 = vector.broadcast %24 : vector<1x128xf32> to vector<8x128xf32>
    %29 = arith.addf %27, %28 : vector<8x128xf32>
    %cst_26 = arith.constant 5.000000e-01 : f32
    %30 = vector.broadcast %cst_26 : f32 to vector<8x128xf32>
    %31 = arith.mulf %30, %29 : vector<8x128xf32>
    %cst_27 = arith.constant 0.707106769 : f32
    %32 = vector.broadcast %cst_27 : f32 to vector<8x128xf32>
    %33 = arith.mulf %29, %32 : vector<8x128xf32>
    %34 = math.erf %33 : vector<8x128xf32>
    %cst_28 = arith.constant 1.000000e+00 : f32
    %35 = vector.broadcast %cst_28 : f32 to vector<8x128xf32>
    %36 = arith.addf %35, %34 : vector<8x128xf32>
    %37 = arith.mulf %31, %36 : vector<8x128xf32>
    %cst_29 = arith.constant dense<0.000000e+00> : vector<8x16xf32>
    %38 = tpu.matmul %37, %25, %cst_29 {dimension_numbers = #tpu.dot_dimension_numbers<[1], [0], [0], [1], [0, 0, 1, 1], [], []>} : vector<8x128xf32>, vector<128x16xf32>, vector<8x16xf32> -> vector<8x16xf32>
    %39 = vector.broadcast %26 : vector<1x16xf32> to vector<8x16xf32>
    %40 = arith.addf %38, %39 : vector<8x16xf32>
    %41 = arith.addf %22, %40 : vector<8x16xf32>
    %c0_30 = arith.constant 0 : index
    %c0_31 = arith.constant 0 : index
    %42 = vector.load %arg10[%c0_30, %c0_31] : memref<16x128xf32, #tpu.memory_space<vmem>>, vector<16x128xf32>
    %c0_32 = arith.constant 0 : index
    %c0_33 = arith.constant 0 : index
    %43 = vector.load %arg11[%c0_32, %c0_33] : memref<1x128xf32, #tpu.memory_space<vmem>>, vector<1x128xf32>
    %c0_34 = arith.constant 0 : index
    %c0_35 = arith.constant 0 : index
    %44 = vector.load %arg12[%c0_34, %c0_35] : memref<128x16xf32, #tpu.memory_space<vmem>>, vector<128x16xf32>
    %c0_36 = arith.constant 0 : index
    %c0_37 = arith.constant 0 : index
    %45 = vector.load %arg13[%c0_36, %c0_37] : memref<1x16xf32, #tpu.memory_space<vmem>>, vector<1x16xf32>
    %cst_38 = arith.constant dense<0.000000e+00> : vector<8x128xf32>
    %46 = tpu.matmul %41, %42, %cst_38 {dimension_numbers = #tpu.dot_dimension_numbers<[1], [0], [0], [1], [0, 0, 1, 1], [], []>} : vector<8x16xf32>, vector<16x128xf32>, vector<8x128xf32> -> vector<8x128xf32>
    %47 = vector.broadcast %43 : vector<1x128xf32> to vector<8x128xf32>
    %48 = arith.addf %46, %47 : vector<8x128xf32>
    %cst_39 = arith.constant 5.000000e-01 : f32
    %49 = vector.broadcast %cst_39 : f32 to vector<8x128xf32>
    %50 = arith.mulf %49, %48 : vector<8x128xf32>
    %cst_40 = arith.constant 0.707106769 : f32
    %51 = vector.broadcast %cst_40 : f32 to vector<8x128xf32>
    %52 = arith.mulf %48, %51 : vector<8x128xf32>
    %53 = math.erf %52 : vector<8x128xf32>
    %cst_41 = arith.constant 1.000000e+00 : f32
    %54 = vector.broadcast %cst_41 : f32 to vector<8x128xf32>
    %55 = arith.addf %54, %53 : vector<8x128xf32>
    %56 = arith.mulf %50, %55 : vector<8x128xf32>
    %cst_42 = arith.constant dense<0.000000e+00> : vector<8x16xf32>
    %57 = tpu.matmul %56, %44, %cst_42 {dimension_numbers = #tpu.dot_dimension_numbers<[1], [0], [0], [1], [0, 0, 1, 1], [], []>} : vector<8x128xf32>, vector<128x16xf32>, vector<8x16xf32> -> vector<8x16xf32>
    %58 = vector.broadcast %45 : vector<1x16xf32> to vector<8x16xf32>
    %59 = arith.addf %57, %58 : vector<8x16xf32>
    %60 = arith.addf %41, %59 : vector<8x16xf32>
    %c0_43 = arith.constant 0 : index
    %c0_44 = arith.constant 0 : index
    %61 = vector.load %arg14[%c0_43, %c0_44] : memref<16x4xf32, #tpu.memory_space<vmem>>, vector<16x4xf32>
    %c0_45 = arith.constant 0 : index
    %c0_46 = arith.constant 0 : index
    %62 = vector.load %arg15[%c0_45, %c0_46] : memref<1x4xf32, #tpu.memory_space<vmem>>, vector<1x4xf32>
    %cst_47 = arith.constant dense<0.000000e+00> : vector<8x4xf32>
    %63 = tpu.matmul %60, %61, %cst_47 {dimension_numbers = #tpu.dot_dimension_numbers<[1], [0], [0], [1], [0, 0, 1, 1], [], []>} : vector<8x16xf32>, vector<16x4xf32>, vector<8x4xf32> -> vector<8x4xf32>
    %64 = vector.broadcast %62 : vector<1x4xf32> to vector<8x4xf32>
    %65 = arith.addf %63, %64 : vector<8x4xf32>
    %c0_48 = arith.constant 0 : index
    %c0_49 = arith.constant 0 : index
    %66 = vector.load %arg16[%c0_48, %c0_49] : memref<4x16xf32, #tpu.memory_space<vmem>>, vector<4x16xf32>
    %c0_50 = arith.constant 0 : index
    %c0_51 = arith.constant 0 : index
    %67 = vector.load %arg17[%c0_50, %c0_51] : memref<1x16xf32, #tpu.memory_space<vmem>>, vector<1x16xf32>
    %cst_52 = arith.constant dense<0.000000e+00> : vector<8x16xf32>
    %68 = tpu.matmul %65, %66, %cst_52 {dimension_numbers = #tpu.dot_dimension_numbers<[1], [0], [0], [1], [0, 0, 1, 1], [], []>} : vector<8x4xf32>, vector<4x16xf32>, vector<8x16xf32> -> vector<8x16xf32>
    %69 = vector.broadcast %67 : vector<1x16xf32> to vector<8x16xf32>
    %70 = arith.addf %68, %69 : vector<8x16xf32>
    %c0_53 = arith.constant 0 : index
    %c0_54 = arith.constant 0 : index
    %71 = vector.load %arg18[%c0_53, %c0_54] : memref<16x128xf32, #tpu.memory_space<vmem>>, vector<16x128xf32>
    %c0_55 = arith.constant 0 : index
    %c0_56 = arith.constant 0 : index
    %72 = vector.load %arg19[%c0_55, %c0_56] : memref<1x128xf32, #tpu.memory_space<vmem>>, vector<1x128xf32>
    %c0_57 = arith.constant 0 : index
    %c0_58 = arith.constant 0 : index
    %73 = vector.load %arg20[%c0_57, %c0_58] : memref<128x16xf32, #tpu.memory_space<vmem>>, vector<128x16xf32>
    %c0_59 = arith.constant 0 : index
    %c0_60 = arith.constant 0 : index
    %74 = vector.load %arg21[%c0_59, %c0_60] : memref<1x16xf32, #tpu.memory_space<vmem>>, vector<1x16xf32>
    %cst_61 = arith.constant dense<0.000000e+00> : vector<8x128xf32>
    %75 = tpu.matmul %70, %71, %cst_61 {dimension_numbers = #tpu.dot_dimension_numbers<[1], [0], [0], [1], [0, 0, 1, 1], [], []>} : vector<8x16xf32>, vector<16x128xf32>, vector<8x128xf32> -> vector<8x128xf32>
    %76 = vector.broadcast %72 : vector<1x128xf32> to vector<8x128xf32>
    %77 = arith.addf %75, %76 : vector<8x128xf32>
    %cst_62 = arith.constant 5.000000e-01 : f32
    %78 = vector.broadcast %cst_62 : f32 to vector<8x128xf32>
    %79 = arith.mulf %78, %77 : vector<8x128xf32>
    %cst_63 = arith.constant 0.707106769 : f32
    %80 = vector.broadcast %cst_63 : f32 to vector<8x128xf32>
    %81 = arith.mulf %77, %80 : vector<8x128xf32>
    %82 = math.erf %81 : vector<8x128xf32>
    %cst_64 = arith.constant 1.000000e+00 : f32
    %83 = vector.broadcast %cst_64 : f32 to vector<8x128xf32>
    %84 = arith.addf %83, %82 : vector<8x128xf32>
    %85 = arith.mulf %79, %84 : vector<8x128xf32>
    %cst_65 = arith.constant dense<0.000000e+00> : vector<8x16xf32>
    %86 = tpu.matmul %85, %73, %cst_65 {dimension_numbers = #tpu.dot_dimension_numbers<[1], [0], [0], [1], [0, 0, 1, 1], [], []>} : vector<8x128xf32>, vector<128x16xf32>, vector<8x16xf32> -> vector<8x16xf32>
    %87 = vector.broadcast %74 : vector<1x16xf32> to vector<8x16xf32>
    %88 = arith.addf %86, %87 : vector<8x16xf32>
    %89 = arith.addf %70, %88 : vector<8x16xf32>
    %c0_66 = arith.constant 0 : index
    %c0_67 = arith.constant 0 : index
    %90 = vector.load %arg22[%c0_66, %c0_67] : memref<16x128xf32, #tpu.memory_space<vmem>>, vector<16x128xf32>
    %c0_68 = arith.constant 0 : index
    %c0_69 = arith.constant 0 : index
    %91 = vector.load %arg23[%c0_68, %c0_69] : memref<1x128xf32, #tpu.memory_space<vmem>>, vector<1x128xf32>
    %c0_70 = arith.constant 0 : index
    %c0_71 = arith.constant 0 : index
    %92 = vector.load %arg24[%c0_70, %c0_71] : memref<128x16xf32, #tpu.memory_space<vmem>>, vector<128x16xf32>
    %c0_72 = arith.constant 0 : index
    %c0_73 = arith.constant 0 : index
    %93 = vector.load %arg25[%c0_72, %c0_73] : memref<1x16xf32, #tpu.memory_space<vmem>>, vector<1x16xf32>
    %cst_74 = arith.constant dense<0.000000e+00> : vector<8x128xf32>
    %94 = tpu.matmul %89, %90, %cst_74 {dimension_numbers = #tpu.dot_dimension_numbers<[1], [0], [0], [1], [0, 0, 1, 1], [], []>} : vector<8x16xf32>, vector<16x128xf32>, vector<8x128xf32> -> vector<8x128xf32>
    %95 = vector.broadcast %91 : vector<1x128xf32> to vector<8x128xf32>
    %96 = arith.addf %94, %95 : vector<8x128xf32>
    %cst_75 = arith.constant 5.000000e-01 : f32
    %97 = vector.broadcast %cst_75 : f32 to vector<8x128xf32>
    %98 = arith.mulf %97, %96 : vector<8x128xf32>
    %cst_76 = arith.constant 0.707106769 : f32
    %99 = vector.broadcast %cst_76 : f32 to vector<8x128xf32>
    %100 = arith.mulf %96, %99 : vector<8x128xf32>
    %101 = math.erf %100 : vector<8x128xf32>
    %cst_77 = arith.constant 1.000000e+00 : f32
    %102 = vector.broadcast %cst_77 : f32 to vector<8x128xf32>
    %103 = arith.addf %102, %101 : vector<8x128xf32>
    %104 = arith.mulf %98, %103 : vector<8x128xf32>
    %cst_78 = arith.constant dense<0.000000e+00> : vector<8x16xf32>
    %105 = tpu.matmul %104, %92, %cst_78 {dimension_numbers = #tpu.dot_dimension_numbers<[1], [0], [0], [1], [0, 0, 1, 1], [], []>} : vector<8x128xf32>, vector<128x16xf32>, vector<8x16xf32> -> vector<8x16xf32>
    %106 = vector.broadcast %93 : vector<1x16xf32> to vector<8x16xf32>
    %107 = arith.addf %105, %106 : vector<8x16xf32>
    %108 = arith.addf %89, %107 : vector<8x16xf32>
    %c0_79 = arith.constant 0 : index
    %c0_80 = arith.constant 0 : index
    %109 = vector.load %arg26[%c0_79, %c0_80] : memref<64x8xf32, #tpu.memory_space<vmem>>, vector<64x8xf32>
    %c0_81 = arith.constant 0 : index
    %c0_82 = arith.constant 0 : index
    %110 = vector.load %arg27[%c0_81, %c0_82] : memref<64x1xf32, #tpu.memory_space<vmem>>, vector<64x1xf32>
    %c0_83 = arith.constant 0 : index
    %c0_84 = arith.constant 0 : index
    %111 = vector.load %arg28[%c0_83, %c0_84] : memref<8x64xf32, #tpu.memory_space<vmem>>, vector<8x64xf32>
    %c0_85 = arith.constant 0 : index
    %c0_86 = arith.constant 0 : index
    %112 = vector.load %arg29[%c0_85, %c0_86] : memref<8x1xf32, #tpu.memory_space<vmem>>, vector<8x1xf32>
    %cst_87 = arith.constant dense<0.000000e+00> : vector<64x16xf32>
    %113 = tpu.matmul %109, %108, %cst_87 {dimension_numbers = #tpu.dot_dimension_numbers<[1], [0], [0], [1], [0, 0, 1, 1], [], []>} : vector<64x8xf32>, vector<8x16xf32>, vector<64x16xf32> -> vector<64x16xf32>
    %114 = vector.broadcast %110 : vector<64x1xf32> to vector<64x16xf32>
    %115 = arith.addf %113, %114 : vector<64x16xf32>
    %cst_88 = arith.constant 5.000000e-01 : f32
    %116 = vector.broadcast %cst_88 : f32 to vector<64x16xf32>
    %117 = arith.mulf %116, %115 : vector<64x16xf32>
    %cst_89 = arith.constant 0.707106769 : f32
    %118 = vector.broadcast %cst_89 : f32 to vector<64x16xf32>
    %119 = arith.mulf %115, %118 : vector<64x16xf32>
    %120 = math.erf %119 : vector<64x16xf32>
    %cst_90 = arith.constant 1.000000e+00 : f32
    %121 = vector.broadcast %cst_90 : f32 to vector<64x16xf32>
    %122 = arith.addf %121, %120 : vector<64x16xf32>
    %123 = arith.mulf %117, %122 : vector<64x16xf32>
    %cst_91 = arith.constant dense<0.000000e+00> : vector<8x16xf32>
    %124 = tpu.matmul %111, %123, %cst_91 {dimension_numbers = #tpu.dot_dimension_numbers<[1], [0], [0], [1], [0, 0, 1, 1], [], []>} : vector<8x64xf32>, vector<64x16xf32>, vector<8x16xf32> -> vector<8x16xf32>
    %125 = vector.broadcast %112 : vector<8x1xf32> to vector<8x16xf32>
    %126 = arith.addf %124, %125 : vector<8x16xf32>
    %127 = arith.addf %108, %126 : vector<8x16xf32>
    %c0_92 = arith.constant 0 : index
    %c2_93 = arith.constant 2 : index
    %128 = vector.load %arg79[%c0_92, %c2_93] : memref<8x18xf32, #tpu.memory_space<vmem>>, vector<8x16xf32>
    %129 = arith.subf %128, %127 : vector<8x16xf32>
    %c0_94 = arith.constant 0 : index
    %c2_95 = arith.constant 2 : index
    %130 = vector.load %arg79[%c0_94, %c2_95] : memref<8x18xf32, #tpu.memory_space<vmem>>, vector<8x16xf32>
    tpu.vector_store %arg79[%c0_94, %c2_95], %129 {strides = array<i32>} : memref<8x18xf32, #tpu.memory_space<vmem>>, vector<8x16xf32>,
    %c0_96 = arith.constant 0 : index
    %c0_97 = arith.constant 0 : index
    %131 = vector.load %arg30[%c0_96, %c0_97] : memref<64x8xf32, #tpu.memory_space<vmem>>, vector<64x8xf32>
    %c0_98 = arith.constant 0 : index
    %c0_99 = arith.constant 0 : index
    %132 = vector.load %arg31[%c0_98, %c0_99] : memref<64x1xf32, #tpu.memory_space<vmem>>, vector<64x1xf32>
    %c0_100 = arith.constant 0 : index
    %c0_101 = arith.constant 0 : index
    %133 = vector.load %arg32[%c0_100, %c0_101] : memref<8x64xf32, #tpu.memory_space<vmem>>, vector<8x64xf32>
    %c0_102 = arith.constant 0 : index
    %c0_103 = arith.constant 0 : index
    %134 = vector.load %arg33[%c0_102, %c0_103] : memref<8x1xf32, #tpu.memory_space<vmem>>, vector<8x1xf32>
    %cst_104 = arith.constant dense<0.000000e+00> : vector<64x4xf32>
    %135 = tpu.matmul %131, %65, %cst_104 {dimension_numbers = #tpu.dot_dimension_numbers<[1], [0], [0], [1], [0, 0, 1, 1], [], []>} : vector<64x8xf32>, vector<8x4xf32>, vector<64x4xf32> -> vector<64x4xf32>
    %136 = vector.broadcast %132 : vector<64x1xf32> to vector<64x4xf32>
    %137 = arith.addf %135, %136 : vector<64x4xf32>
    %cst_105 = arith.constant 5.000000e-01 : f32
    %138 = vector.broadcast %cst_105 : f32 to vector<64x4xf32>
    %139 = arith.mulf %138, %137 : vector<64x4xf32>
    %cst_106 = arith.constant 0.707106769 : f32
    %140 = vector.broadcast %cst_106 : f32 to vector<64x4xf32>
    %141 = arith.mulf %137, %140 : vector<64x4xf32>
    %142 = math.erf %141 : vector<64x4xf32>
    %cst_107 = arith.constant 1.000000e+00 : f32
    %143 = vector.broadcast %cst_107 : f32 to vector<64x4xf32>
    %144 = arith.addf %143, %142 : vector<64x4xf32>
    %145 = arith.mulf %139, %144 : vector<64x4xf32>
    %cst_108 = arith.constant dense<0.000000e+00> : vector<8x4xf32>
    %146 = tpu.matmul %133, %145, %cst_108 {dimension_numbers = #tpu.dot_dimension_numbers<[1], [0], [0], [1], [0, 0, 1, 1], [], []>} : vector<8x64xf32>, vector<64x4xf32>, vector<8x4xf32> -> vector<8x4xf32>
    %147 = vector.broadcast %134 : vector<8x1xf32> to vector<8x4xf32>
    %148 = arith.addf %146, %147 : vector<8x4xf32>
    %149 = arith.addf %148, %65 : vector<8x4xf32>
    %c0_109 = arith.constant 0 : index
    %c0_110 = arith.constant 0 : index
    %150 = vector.load %arg34[%c0_109, %c0_110] : memref<4x32xf32, #tpu.memory_space<vmem>>, vector<4x32xf32>
    %c0_111 = arith.constant 0 : index
    %c0_112 = arith.constant 0 : index
    %151 = vector.load %arg35[%c0_111, %c0_112] : memref<1x32xf32, #tpu.memory_space<vmem>>, vector<1x32xf32>
    %c0_113 = arith.constant 0 : index
    %c0_114 = arith.constant 0 : index
    %152 = vector.load %arg36[%c0_113, %c0_114] : memref<32x8xf32, #tpu.memory_space<vmem>>, vector<32x8xf32>
    %c0_115 = arith.constant 0 : index
    %c0_116 = arith.constant 0 : index
    %153 = vector.load %arg37[%c0_115, %c0_116] : memref<1x8xf32, #tpu.memory_space<vmem>>, vector<1x8xf32>
    %c0_117 = arith.constant 0 : index
    %c0_118 = arith.constant 0 : index
    %154 = vector.load %arg38[%c0_117, %c0_118] : memref<4x8xf32, #tpu.memory_space<vmem>>, vector<4x8xf32>
    %c0_119 = arith.constant 0 : index
    %c0_120 = arith.constant 0 : index
    %155 = vector.load %arg39[%c0_119, %c0_120] : memref<1x8xf32, #tpu.memory_space<vmem>>, vector<1x8xf32>
    %cst_121 = arith.constant dense<0.000000e+00> : vector<8x32xf32>
    %156 = tpu.matmul %149, %150, %cst_121 {dimension_numbers = #tpu.dot_dimension_numbers<[1], [0], [0], [1], [0, 0, 1, 1], [], []>} : vector<8x4xf32>, vector<4x32xf32>, vector<8x32xf32> -> vector<8x32xf32>
    %157 = vector.broadcast %151 : vector<1x32xf32> to vector<8x32xf32>
    %158 = arith.addf %156, %157 : vector<8x32xf32>
    %cst_122 = arith.constant 5.000000e-01 : f32
    %159 = vector.broadcast %cst_122 : f32 to vector<8x32xf32>
    %160 = arith.mulf %159, %158 : vector<8x32xf32>
    %cst_123 = arith.constant 0.707106769 : f32
    %161 = vector.broadcast %cst_123 : f32 to vector<8x32xf32>
    %162 = arith.mulf %158, %161 : vector<8x32xf32>
    %163 = math.erf %162 : vector<8x32xf32>
    %cst_124 = arith.constant 1.000000e+00 : f32
    %164 = vector.broadcast %cst_124 : f32 to vector<8x32xf32>
    %165 = arith.addf %164, %163 : vector<8x32xf32>
    %166 = arith.mulf %160, %165 : vector<8x32xf32>
    %cst_125 = arith.constant dense<0.000000e+00> : vector<8x8xf32>
    %167 = tpu.matmul %166, %152, %cst_125 {dimension_numbers = #tpu.dot_dimension_numbers<[1], [0], [0], [1], [0, 0, 1, 1], [], []>} : vector<8x32xf32>, vector<32x8xf32>, vector<8x8xf32> -> vector<8x8xf32>
    %168 = vector.broadcast %153 : vector<1x8xf32> to vector<8x8xf32>
    %169 = arith.addf %167, %168 : vector<8x8xf32>
    %cst_126 = arith.constant dense<0.000000e+00> : vector<8x8xf32>
    %170 = tpu.matmul %149, %154, %cst_126 {dimension_numbers = #tpu.dot_dimension_numbers<[1], [0], [0], [1], [0, 0, 1, 1], [], []>} : vector<8x4xf32>, vector<4x8xf32>, vector<8x8xf32> -> vector<8x8xf32>
    %171 = vector.broadcast %155 : vector<1x8xf32> to vector<8x8xf32>
    %172 = arith.addf %170, %171 : vector<8x8xf32>
    %173 = arith.addf %169, %172 : vector<8x8xf32>
    %174 = arith.addf %2, %173 : vector<8x8xf32>
    %c0_127 = arith.constant 0 : index
    %c0_128 = arith.constant 0 : index
    %175 = vector.load %arg79[%c0_127, %c0_128] : memref<8x18xf32, #tpu.memory_space<vmem>>, vector<8x18xf32>
    %c0_129 = arith.constant 0 : index
    %c0_130 = arith.constant 0 : index
    %176 = vector.load %arg40[%c0_129, %c0_130] : memref<64x8xf32, #tpu.memory_space<vmem>>, vector<64x8xf32>
    %c0_131 = arith.constant 0 : index
    %c0_132 = arith.constant 0 : index
    %177 = vector.load %arg41[%c0_131, %c0_132] : memref<64x1xf32, #tpu.memory_space<vmem>>, vector<64x1xf32>
    %c0_133 = arith.constant 0 : index
    %c0_134 = arith.constant 0 : index
    %178 = vector.load %arg42[%c0_133, %c0_134] : memref<8x64xf32, #tpu.memory_space<vmem>>, vector<8x64xf32>
    %c0_135 = arith.constant 0 : index
    %c0_136 = arith.constant 0 : index
    %179 = vector.load %arg43[%c0_135, %c0_136] : memref<8x1xf32, #tpu.memory_space<vmem>>, vector<8x1xf32>
    %cst_137 = arith.constant dense<0.000000e+00> : vector<64x18xf32>
    %180 = tpu.matmul %176, %175, %cst_137 {dimension_numbers = #tpu.dot_dimension_numbers<[1], [0], [0], [1], [0, 0, 1, 1], [], []>} : vector<64x8xf32>, vector<8x18xf32>, vector<64x18xf32> -> vector<64x18xf32>
    %181 = vector.broadcast %177 : vector<64x1xf32> to vector<64x18xf32>
    %182 = arith.addf %180, %181 : vector<64x18xf32>
    %cst_138 = arith.constant 5.000000e-01 : f32
    %183 = vector.broadcast %cst_138 : f32 to vector<64x18xf32>
    %184 = arith.mulf %183, %182 : vector<64x18xf32>
    %cst_139 = arith.constant 0.707106769 : f32
    %185 = vector.broadcast %cst_139 : f32 to vector<64x18xf32>
    %186 = arith.mulf %182, %185 : vector<64x18xf32>
    %187 = math.erf %186 : vector<64x18xf32>
    %cst_140 = arith.constant 1.000000e+00 : f32
    %188 = vector.broadcast %cst_140 : f32 to vector<64x18xf32>
    %189 = arith.addf %188, %187 : vector<64x18xf32>
    %190 = arith.mulf %184, %189 : vector<64x18xf32>
    %cst_141 = arith.constant dense<0.000000e+00> : vector<8x18xf32>
    %191 = tpu.matmul %178, %190, %cst_141 {dimension_numbers = #tpu.dot_dimension_numbers<[1], [0], [0], [1], [0, 0, 1, 1], [], []>} : vector<8x64xf32>, vector<64x18xf32>, vector<8x18xf32> -> vector<8x18xf32>
    %192 = vector.broadcast %179 : vector<8x1xf32> to vector<8x18xf32>
    %193 = arith.addf %191, %192 : vector<8x18xf32>
    %194 = arith.addf %175, %193 : vector<8x18xf32>
    %c0_142 = arith.constant 0 : index
    %c0_143 = arith.constant 0 : index
    %195 = vector.load %arg44[%c0_142, %c0_143] : memref<18x192xf32, #tpu.memory_space<vmem>>, vector<18x192xf32>
    %c0_144 = arith.constant 0 : index
    %c0_145 = arith.constant 0 : index
    %196 = vector.load %arg45[%c0_144, %c0_145] : memref<1x192xf32, #tpu.memory_space<vmem>>, vector<1x192xf32>
    %c0_146 = arith.constant 0 : index
    %c0_147 = arith.constant 0 : index
    %197 = vector.load %arg46[%c0_146, %c0_147] : memref<192x18xf32, #tpu.memory_space<vmem>>, vector<192x18xf32>
    %c0_148 = arith.constant 0 : index
    %c0_149 = arith.constant 0 : index
    %198 = vector.load %arg47[%c0_148, %c0_149] : memref<1x18xf32, #tpu.memory_space<vmem>>, vector<1x18xf32>
    %cst_150 = arith.constant dense<0.000000e+00> : vector<8x192xf32>
    %199 = tpu.matmul %194, %195, %cst_150 {dimension_numbers = #tpu.dot_dimension_numbers<[1], [0], [0], [1], [0, 0, 1, 1], [], []>} : vector<8x18xf32>, vector<18x192xf32>, vector<8x192xf32> -> vector<8x192xf32>
    %200 = vector.broadcast %196 : vector<1x192xf32> to vector<8x192xf32>
    %201 = arith.addf %199, %200 : vector<8x192xf32>
    %cst_151 = arith.constant 5.000000e-01 : f32
    %202 = vector.broadcast %cst_151 : f32 to vector<8x192xf32>
    %203 = arith.mulf %202, %201 : vector<8x192xf32>
    %cst_152 = arith.constant 0.707106769 : f32
    %204 = vector.broadcast %cst_152 : f32 to vector<8x192xf32>
    %205 = arith.mulf %201, %204 : vector<8x192xf32>
    %206 = math.erf %205 : vector<8x192xf32>
    %cst_153 = arith.constant 1.000000e+00 : f32
    %207 = vector.broadcast %cst_153 : f32 to vector<8x192xf32>
    %208 = arith.addf %207, %206 : vector<8x192xf32>
    %209 = arith.mulf %203, %208 : vector<8x192xf32>
    %cst_154 = arith.constant dense<0.000000e+00> : vector<8x18xf32>
    %210 = tpu.matmul %209, %197, %cst_154 {dimension_numbers = #tpu.dot_dimension_numbers<[1], [0], [0], [1], [0, 0, 1, 1], [], []>} : vector<8x192xf32>, vector<192x18xf32>, vector<8x18xf32> -> vector<8x18xf32>
    %211 = vector.broadcast %198 : vector<1x18xf32> to vector<8x18xf32>
    %212 = arith.addf %210, %211 : vector<8x18xf32>
    %213 = arith.addf %194, %212 : vector<8x18xf32>
    %c0_155 = arith.constant 0 : index
    %c0_156 = arith.constant 0 : index
    %214 = vector.load %arg48[%c0_155, %c0_156] : memref<18x96xf32, #tpu.memory_space<vmem>>, vector<18x96xf32>
    %c0_157 = arith.constant 0 : index
    %c0_158 = arith.constant 0 : index
    %215 = vector.load %arg49[%c0_157, %c0_158] : memref<1x96xf32, #tpu.memory_space<vmem>>, vector<1x96xf32>
    %c0_159 = arith.constant 0 : index
    %c0_160 = arith.constant 0 : index
    %216 = vector.load %arg50[%c0_159, %c0_160] : memref<96x18xf32, #tpu.memory_space<vmem>>, vector<96x18xf32>
    %c0_161 = arith.constant 0 : index
    %c0_162 = arith.constant 0 : index
    %217 = vector.load %arg51[%c0_161, %c0_162] : memref<1x18xf32, #tpu.memory_space<vmem>>, vector<1x18xf32>
    %cst_163 = arith.constant dense<0.000000e+00> : vector<8x96xf32>
    %218 = tpu.matmul %213, %214, %cst_163 {dimension_numbers = #tpu.dot_dimension_numbers<[1], [0], [0], [1], [0, 0, 1, 1], [], []>} : vector<8x18xf32>, vector<18x96xf32>, vector<8x96xf32> -> vector<8x96xf32>
    %219 = vector.broadcast %215 : vector<1x96xf32> to vector<8x96xf32>
    %220 = arith.addf %218, %219 : vector<8x96xf32>
    %cst_164 = arith.constant 5.000000e-01 : f32
    %221 = vector.broadcast %cst_164 : f32 to vector<8x96xf32>
    %222 = arith.mulf %221, %220 : vector<8x96xf32>
    %cst_165 = arith.constant 0.707106769 : f32
    %223 = vector.broadcast %cst_165 : f32 to vector<8x96xf32>
    %224 = arith.mulf %220, %223 : vector<8x96xf32>
    %225 = math.erf %224 : vector<8x96xf32>
    %cst_166 = arith.constant 1.000000e+00 : f32
    %226 = vector.broadcast %cst_166 : f32 to vector<8x96xf32>
    %227 = arith.addf %226, %225 : vector<8x96xf32>
    %228 = arith.mulf %222, %227 : vector<8x96xf32>
    %cst_167 = arith.constant dense<0.000000e+00> : vector<8x18xf32>
    %229 = tpu.matmul %228, %216, %cst_167 {dimension_numbers = #tpu.dot_dimension_numbers<[1], [0], [0], [1], [0, 0, 1, 1], [], []>} : vector<8x96xf32>, vector<96x18xf32>, vector<8x18xf32> -> vector<8x18xf32>
    %230 = vector.broadcast %217 : vector<1x18xf32> to vector<8x18xf32>
    %231 = arith.addf %229, %230 : vector<8x18xf32>
    %232 = arith.addf %213, %231 : vector<8x18xf32>
    %c0_168 = arith.constant 0 : index
    %c0_169 = arith.constant 0 : index
    %233 = vector.load %arg52[%c0_168, %c0_169] : memref<18x3xf32, #tpu.memory_space<vmem>>, vector<18x3xf32>
    %c0_170 = arith.constant 0 : index
    %c0_171 = arith.constant 0 : index
    %234 = vector.load %arg53[%c0_170, %c0_171] : memref<1x3xf32, #tpu.memory_space<vmem>>, vector<1x3xf32>
    %cst_172 = arith.constant dense<0.000000e+00> : vector<8x3xf32>
    %235 = tpu.matmul %232, %233, %cst_172 {dimension_numbers = #tpu.dot_dimension_numbers<[1], [0], [0], [1], [0, 0, 1, 1], [], []>} : vector<8x18xf32>, vector<18x3xf32>, vector<8x3xf32> -> vector<8x3xf32>
    %236 = vector.broadcast %234 : vector<1x3xf32> to vector<8x3xf32>
    %237 = arith.addf %235, %236 : vector<8x3xf32>
    %c0_173 = arith.constant 0 : index
    %c0_174 = arith.constant 0 : index
    %238 = vector.load %arg54[%c0_173, %c0_174] : memref<3x18xf32, #tpu.memory_space<vmem>>, vector<3x18xf32>
    %c0_175 = arith.constant 0 : index
    %c0_176 = arith.constant 0 : index
    %239 = vector.load %arg55[%c0_175, %c0_176] : memref<1x18xf32, #tpu.memory_space<vmem>>, vector<1x18xf32>
    %cst_177 = arith.constant dense<0.000000e+00> : vector<8x18xf32>
    %240 = tpu.matmul %237, %238, %cst_177 {dimension_numbers = #tpu.dot_dimension_numbers<[1], [0], [0], [1], [0, 0, 1, 1], [], []>} : vector<8x3xf32>, vector<3x18xf32>, vector<8x18xf32> -> vector<8x18xf32>
    %241 = vector.broadcast %239 : vector<1x18xf32> to vector<8x18xf32>
    %242 = arith.addf %240, %241 : vector<8x18xf32>
    %c0_178 = arith.constant 0 : index
    %c0_179 = arith.constant 0 : index
    %243 = vector.load %arg56[%c0_178, %c0_179] : memref<18x96xf32, #tpu.memory_space<vmem>>, vector<18x96xf32>
    %c0_180 = arith.constant 0 : index
    %c0_181 = arith.constant 0 : index
    %244 = vector.load %arg57[%c0_180, %c0_181] : memref<1x96xf32, #tpu.memory_space<vmem>>, vector<1x96xf32>
    %c0_182 = arith.constant 0 : index
    %c0_183 = arith.constant 0 : index
    %245 = vector.load %arg58[%c0_182, %c0_183] : memref<96x18xf32, #tpu.memory_space<vmem>>, vector<96x18xf32>
    %c0_184 = arith.constant 0 : index
    %c0_185 = arith.constant 0 : index
    %246 = vector.load %arg59[%c0_184, %c0_185] : memref<1x18xf32, #tpu.memory_space<vmem>>, vector<1x18xf32>
    %cst_186 = arith.constant dense<0.000000e+00> : vector<8x96xf32>
    %247 = tpu.matmul %242, %243, %cst_186 {dimension_numbers = #tpu.dot_dimension_numbers<[1], [0], [0], [1], [0, 0, 1, 1], [], []>} : vector<8x18xf32>, vector<18x96xf32>, vector<8x96xf32> -> vector<8x96xf32>
    %248 = vector.broadcast %244 : vector<1x96xf32> to vector<8x96xf32>
    %249 = arith.addf %247, %248 : vector<8x96xf32>
    %cst_187 = arith.constant 5.000000e-01 : f32
    %250 = vector.broadcast %cst_187 : f32 to vector<8x96xf32>
    %251 = arith.mulf %250, %249 : vector<8x96xf32>
    %cst_188 = arith.constant 0.707106769 : f32
    %252 = vector.broadcast %cst_188 : f32 to vector<8x96xf32>
    %253 = arith.mulf %249, %252 : vector<8x96xf32>
    %254 = math.erf %253 : vector<8x96xf32>
    %cst_189 = arith.constant 1.000000e+00 : f32
    %255 = vector.broadcast %cst_189 : f32 to vector<8x96xf32>
    %256 = arith.addf %255, %254 : vector<8x96xf32>
    %257 = arith.mulf %251, %256 : vector<8x96xf32>
    %cst_190 = arith.constant dense<0.000000e+00> : vector<8x18xf32>
    %258 = tpu.matmul %257, %245, %cst_190 {dimension_numbers = #tpu.dot_dimension_numbers<[1], [0], [0], [1], [0, 0, 1, 1], [], []>} : vector<8x96xf32>, vector<96x18xf32>, vector<8x18xf32> -> vector<8x18xf32>
    %259 = vector.broadcast %246 : vector<1x18xf32> to vector<8x18xf32>
    %260 = arith.addf %258, %259 : vector<8x18xf32>
    %261 = arith.addf %242, %260 : vector<8x18xf32>
    %c0_191 = arith.constant 0 : index
    %c0_192 = arith.constant 0 : index
    %262 = vector.load %arg60[%c0_191, %c0_192] : memref<18x192xf32, #tpu.memory_space<vmem>>, vector<18x192xf32>
    %c0_193 = arith.constant 0 : index
    %c0_194 = arith.constant 0 : index
    %263 = vector.load %arg61[%c0_193, %c0_194] : memref<1x192xf32, #tpu.memory_space<vmem>>, vector<1x192xf32>
    %c0_195 = arith.constant 0 : index
    %c0_196 = arith.constant 0 : index
    %264 = vector.load %arg62[%c0_195, %c0_196] : memref<192x18xf32, #tpu.memory_space<vmem>>, vector<192x18xf32>
    %c0_197 = arith.constant 0 : index
    %c0_198 = arith.constant 0 : index
    %265 = vector.load %arg63[%c0_197, %c0_198] : memref<1x18xf32, #tpu.memory_space<vmem>>, vector<1x18xf32>
    %cst_199 = arith.constant dense<0.000000e+00> : vector<8x192xf32>
    %266 = tpu.matmul %261, %262, %cst_199 {dimension_numbers = #tpu.dot_dimension_numbers<[1], [0], [0], [1], [0, 0, 1, 1], [], []>} : vector<8x18xf32>, vector<18x192xf32>, vector<8x192xf32> -> vector<8x192xf32>
    %267 = vector.broadcast %263 : vector<1x192xf32> to vector<8x192xf32>
    %268 = arith.addf %266, %267 : vector<8x192xf32>
    %cst_200 = arith.constant 5.000000e-01 : f32
    %269 = vector.broadcast %cst_200 : f32 to vector<8x192xf32>
    %270 = arith.mulf %269, %268 : vector<8x192xf32>
    %cst_201 = arith.constant 0.707106769 : f32
    %271 = vector.broadcast %cst_201 : f32 to vector<8x192xf32>
    %272 = arith.mulf %268, %271 : vector<8x192xf32>
    %273 = math.erf %272 : vector<8x192xf32>
    %cst_202 = arith.constant 1.000000e+00 : f32
    %274 = vector.broadcast %cst_202 : f32 to vector<8x192xf32>
    %275 = arith.addf %274, %273 : vector<8x192xf32>
    %276 = arith.mulf %270, %275 : vector<8x192xf32>
    %cst_203 = arith.constant dense<0.000000e+00> : vector<8x18xf32>
    %277 = tpu.matmul %276, %264, %cst_203 {dimension_numbers = #tpu.dot_dimension_numbers<[1], [0], [0], [1], [0, 0, 1, 1], [], []>} : vector<8x192xf32>, vector<192x18xf32>, vector<8x18xf32> -> vector<8x18xf32>
    %278 = vector.broadcast %265 : vector<1x18xf32> to vector<8x18xf32>
    %279 = arith.addf %277, %278 : vector<8x18xf32>
    %280 = arith.addf %261, %279 : vector<8x18xf32>
    %c0_204 = arith.constant 0 : index
    %c0_205 = arith.constant 0 : index
    %281 = vector.load %arg64[%c0_204, %c0_205] : memref<64x8xf32, #tpu.memory_space<vmem>>, vector<64x8xf32>
    %c0_206 = arith.constant 0 : index
    %c0_207 = arith.constant 0 : index
    %282 = vector.load %arg65[%c0_206, %c0_207] : memref<64x1xf32, #tpu.memory_space<vmem>>, vector<64x1xf32>
    %c0_208 = arith.constant 0 : index
    %c0_209 = arith.constant 0 : index
    %283 = vector.load %arg66[%c0_208, %c0_209] : memref<8x64xf32, #tpu.memory_space<vmem>>, vector<8x64xf32>
    %c0_210 = arith.constant 0 : index
    %c0_211 = arith.constant 0 : index
    %284 = vector.load %arg67[%c0_210, %c0_211] : memref<8x1xf32, #tpu.memory_space<vmem>>, vector<8x1xf32>
    %cst_212 = arith.constant dense<0.000000e+00> : vector<64x18xf32>
    %285 = tpu.matmul %281, %280, %cst_212 {dimension_numbers = #tpu.dot_dimension_numbers<[1], [0], [0], [1], [0, 0, 1, 1], [], []>} : vector<64x8xf32>, vector<8x18xf32>, vector<64x18xf32> -> vector<64x18xf32>
    %286 = vector.broadcast %282 : vector<64x1xf32> to vector<64x18xf32>
    %287 = arith.addf %285, %286 : vector<64x18xf32>
    %cst_213 = arith.constant 5.000000e-01 : f32
    %288 = vector.broadcast %cst_213 : f32 to vector<64x18xf32>
    %289 = arith.mulf %288, %287 : vector<64x18xf32>
    %cst_214 = arith.constant 0.707106769 : f32
    %290 = vector.broadcast %cst_214 : f32 to vector<64x18xf32>
    %291 = arith.mulf %287, %290 : vector<64x18xf32>
    %292 = math.erf %291 : vector<64x18xf32>
    %cst_215 = arith.constant 1.000000e+00 : f32
    %293 = vector.broadcast %cst_215 : f32 to vector<64x18xf32>
    %294 = arith.addf %293, %292 : vector<64x18xf32>
    %295 = arith.mulf %289, %294 : vector<64x18xf32>
    %cst_216 = arith.constant dense<0.000000e+00> : vector<8x18xf32>
    %296 = tpu.matmul %283, %295, %cst_216 {dimension_numbers = #tpu.dot_dimension_numbers<[1], [0], [0], [1], [0, 0, 1, 1], [], []>} : vector<8x64xf32>, vector<64x18xf32>, vector<8x18xf32> -> vector<8x18xf32>
    %297 = vector.broadcast %284 : vector<8x1xf32> to vector<8x18xf32>
    %298 = arith.addf %296, %297 : vector<8x18xf32>
    %299 = arith.addf %280, %298 : vector<8x18xf32>
    %c0_217 = arith.constant 0 : index
    %c2_218 = arith.constant 2 : index
    %300 = vector.load %arg79[%c0_217, %c2_218] : memref<8x18xf32, #tpu.memory_space<vmem>>, vector<8x16xf32>
    %301 = vector.extract_strided_slice %299 {offsets = [0, 2], sizes = [8, 16], strides = [1, 1]} : vector<8x18xf32> to vector<8x16xf32>
    %302 = arith.subf %300, %301 : vector<8x16xf32>
    %c0_219 = arith.constant 0 : index
    %c2_220 = arith.constant 2 : index
    %303 = vector.load %arg79[%c0_219, %c2_220] : memref<8x18xf32, #tpu.memory_space<vmem>>, vector<8x16xf32>
    tpu.vector_store %arg79[%c0_219, %c2_220], %302 {strides = array<i32>} : memref<8x18xf32, #tpu.memory_space<vmem>>, vector<8x16xf32>,
    %c0_221 = arith.constant 0 : index
    %c0_222 = arith.constant 0 : index
    %304 = vector.load %arg68[%c0_221, %c0_222] : memref<64x8xf32, #tpu.memory_space<vmem>>, vector<64x8xf32>
    %c0_223 = arith.constant 0 : index
    %c0_224 = arith.constant 0 : index
    %305 = vector.load %arg69[%c0_223, %c0_224] : memref<64x1xf32, #tpu.memory_space<vmem>>, vector<64x1xf32>
    %c0_225 = arith.constant 0 : index
    %c0_226 = arith.constant 0 : index
    %306 = vector.load %arg70[%c0_225, %c0_226] : memref<8x64xf32, #tpu.memory_space<vmem>>, vector<8x64xf32>
    %c0_227 = arith.constant 0 : index
    %c0_228 = arith.constant 0 : index
    %307 = vector.load %arg71[%c0_227, %c0_228] : memref<8x1xf32, #tpu.memory_space<vmem>>, vector<8x1xf32>
    %cst_229 = arith.constant dense<0.000000e+00> : vector<64x3xf32>
    %308 = tpu.matmul %304, %237, %cst_229 {dimension_numbers = #tpu.dot_dimension_numbers<[1], [0], [0], [1], [0, 0, 1, 1], [], []>} : vector<64x8xf32>, vector<8x3xf32>, vector<64x3xf32> -> vector<64x3xf32>
    %309 = vector.broadcast %305 : vector<64x1xf32> to vector<64x3xf32>
    %310 = arith.addf %308, %309 : vector<64x3xf32>
    %cst_230 = arith.constant 5.000000e-01 : f32
    %311 = vector.broadcast %cst_230 : f32 to vector<64x3xf32>
    %312 = arith.mulf %311, %310 : vector<64x3xf32>
    %cst_231 = arith.constant 0.707106769 : f32
    %313 = vector.broadcast %cst_231 : f32 to vector<64x3xf32>
    %314 = arith.mulf %310, %313 : vector<64x3xf32>
    %315 = math.erf %314 : vector<64x3xf32>
    %cst_232 = arith.constant 1.000000e+00 : f32
    %316 = vector.broadcast %cst_232 : f32 to vector<64x3xf32>
    %317 = arith.addf %316, %315 : vector<64x3xf32>
    %318 = arith.mulf %312, %317 : vector<64x3xf32>
    %cst_233 = arith.constant dense<0.000000e+00> : vector<8x3xf32>
    %319 = tpu.matmul %306, %318, %cst_233 {dimension_numbers = #tpu.dot_dimension_numbers<[1], [0], [0], [1], [0, 0, 1, 1], [], []>} : vector<8x64xf32>, vector<64x3xf32>, vector<8x3xf32> -> vector<8x3xf32>
    %320 = vector.broadcast %307 : vector<8x1xf32> to vector<8x3xf32>
    %321 = arith.addf %319, %320 : vector<8x3xf32>
    %322 = arith.addf %321, %237 : vector<8x3xf32>
    %c0_234 = arith.constant 0 : index
    %c0_235 = arith.constant 0 : index
    %323 = vector.load %arg72[%c0_234, %c0_235] : memref<3x32xf32, #tpu.memory_space<vmem>>, vector<3x32xf32>
    %c0_236 = arith.constant 0 : index
    %c0_237 = arith.constant 0 : index
    %324 = vector.load %arg73[%c0_236, %c0_237] : memref<1x32xf32, #tpu.memory_space<vmem>>, vector<1x32xf32>
    %c0_238 = arith.constant 0 : index
    %c0_239 = arith.constant 0 : index
    %325 = vector.load %arg74[%c0_238, %c0_239] : memref<32x8xf32, #tpu.memory_space<vmem>>, vector<32x8xf32>
    %c0_240 = arith.constant 0 : index
    %c0_241 = arith.constant 0 : index
    %326 = vector.load %arg75[%c0_240, %c0_241] : memref<1x8xf32, #tpu.memory_space<vmem>>, vector<1x8xf32>
    %c0_242 = arith.constant 0 : index
    %c0_243 = arith.constant 0 : index
    %327 = vector.load %arg76[%c0_242, %c0_243] : memref<3x8xf32, #tpu.memory_space<vmem>>, vector<3x8xf32>
    %c0_244 = arith.constant 0 : index
    %c0_245 = arith.constant 0 : index
    %328 = vector.load %arg77[%c0_244, %c0_245] : memref<1x8xf32, #tpu.memory_space<vmem>>, vector<1x8xf32>
    %cst_246 = arith.constant dense<0.000000e+00> : vector<8x32xf32>
    %329 = tpu.matmul %322, %323, %cst_246 {dimension_numbers = #tpu.dot_dimension_numbers<[1], [0], [0], [1], [0, 0, 1, 1], [], []>} : vector<8x3xf32>, vector<3x32xf32>, vector<8x32xf32> -> vector<8x32xf32>
    %330 = vector.broadcast %324 : vector<1x32xf32> to vector<8x32xf32>
    %331 = arith.addf %329, %330 : vector<8x32xf32>
    %cst_247 = arith.constant 5.000000e-01 : f32
    %332 = vector.broadcast %cst_247 : f32 to vector<8x32xf32>
    %333 = arith.mulf %332, %331 : vector<8x32xf32>
    %cst_248 = arith.constant 0.707106769 : f32
    %334 = vector.broadcast %cst_248 : f32 to vector<8x32xf32>
    %335 = arith.mulf %331, %334 : vector<8x32xf32>
    %336 = math.erf %335 : vector<8x32xf32>
    %cst_249 = arith.constant 1.000000e+00 : f32
    %337 = vector.broadcast %cst_249 : f32 to vector<8x32xf32>
    %338 = arith.addf %337, %336 : vector<8x32xf32>
    %339 = arith.mulf %333, %338 : vector<8x32xf32>
    %cst_250 = arith.constant dense<0.000000e+00> : vector<8x8xf32>
    %340 = tpu.matmul %339, %325, %cst_250 {dimension_numbers = #tpu.dot_dimension_numbers<[1], [0], [0], [1], [0, 0, 1, 1], [], []>} : vector<8x32xf32>, vector<32x8xf32>, vector<8x8xf32> -> vector<8x8xf32>
    %341 = vector.broadcast %326 : vector<1x8xf32> to vector<8x8xf32>
    %342 = arith.addf %340, %341 : vector<8x8xf32>
    %cst_251 = arith.constant dense<0.000000e+00> : vector<8x8xf32>
    %343 = tpu.matmul %322, %327, %cst_251 {dimension_numbers = #tpu.dot_dimension_numbers<[1], [0], [0], [1], [0, 0, 1, 1], [], []>} : vector<8x3xf32>, vector<3x8xf32>, vector<8x8xf32> -> vector<8x8xf32>
    %344 = vector.broadcast %328 : vector<1x8xf32> to vector<8x8xf32>
    %345 = arith.addf %343, %344 : vector<8x8xf32>
    %346 = arith.addf %342, %345 : vector<8x8xf32>
    %347 = arith.addf %174, %346 : vector<8x8xf32>
    %c0_252 = arith.constant 0 : index
    %c0_253 = arith.constant 0 : index
    %348 = vector.load %arg78[%c0_252, %c0_253] : memref<8x8xf32, #tpu.memory_space<vmem>>, vector<8x8xf32>
    tpu.vector_store %arg78[%c0_252, %c0_253], %347 {strides = array<i32>} : memref<8x8xf32, #tpu.memory_space<vmem>>, vector<8x8xf32>,
    return
  }
  func.func @transform_0(%arg0: i32) -> (i32, i32) {
    %c0_i32 = arith.constant 0 : i32
    %c0_i32_0 = arith.constant 0 : i32
    return %arg0, %c0_i32 : i32, i32
  }
  func.func @transform_1(%arg0: i32) -> (i32, i32) {
    %c0_i32 = arith.constant 0 : i32
    %c0_i32_0 = arith.constant 0 : i32
    %c0_i32_1 = arith.constant 0 : i32
    return %c0_i32, %c0_i32_0 : i32, i32
  }
  func.func @transform_2(%arg0: i32) -> (i32, i32) {
    %c0_i32 = arith.constant 0 : i32
    %c0_i32_0 = arith.constant 0 : i32
    %c0_i32_1 = arith.constant 0 : i32
    return %c0_i32, %c0_i32_0 : i32, i32
  }
  func.func @transform_3(%arg0: i32) -> (i32, i32) {
    %c0_i32 = arith.constant 0 : i32
    %c0_i32_0 = arith.constant 0 : i32
    %c0_i32_1 = arith.constant 0 : i32
    return %c0_i32, %c0_i32_0 : i32, i32
  }
  func.func @transform_4(%arg0: i32) -> (i32, i32) {
    %c0_i32 = arith.constant 0 : i32
    %c0_i32_0 = arith.constant 0 : i32
    %c0_i32_1 = arith.constant 0 : i32
    return %c0_i32, %c0_i32_0 : i32, i32
  }
  func.func @transform_5(%arg0: i32) -> (i32, i32) {
    %c0_i32 = arith.constant 0 : i32
    %c0_i32_0 = arith.constant 0 : i32
    %c0_i32_1 = arith.constant 0 : i32
    return %c0_i32, %c0_i32_0 : i32, i32
  }
  func.func @transform_6(%arg0: i32) -> (i32, i32) {
    %c0_i32 = arith.constant 0 : i32
    %c0_i32_0 = arith.constant 0 : i32
    %c0_i32_1 = arith.constant 0 : i32
    return %c0_i32, %c0_i32_0 : i32, i32
  }
  func.func @transform_7(%arg0: i32) -> (i32, i32) {
    %c0_i32 = arith.constant 0 : i32
    %c0_i32_0 = arith.constant 0 : i32
    %c0_i32_1 = arith.constant 0 : i32
    return %c0_i32, %c0_i32_0 : i32, i32
  }
  func.func @transform_8(%arg0: i32) -> (i32, i32) {
    %c0_i32 = arith.constant 0 : i32
    %c0_i32_0 = arith.constant 0 : i32
    %c0_i32_1 = arith.constant 0 : i32
    return %c0_i32, %c0_i32_0 : i32, i32
  }
  func.func @transform_9(%arg0: i32) -> (i32, i32) {
    %c0_i32 = arith.constant 0 : i32
    %c0_i32_0 = arith.constant 0 : i32
    %c0_i32_1 = arith.constant 0 : i32
    return %c0_i32, %c0_i32_0 : i32, i32
  }
  func.func @transform_10(%arg0: i32) -> (i32, i32) {
    %c0_i32 = arith.constant 0 : i32
    %c0_i32_0 = arith.constant 0 : i32
    %c0_i32_1 = arith.constant 0 : i32
    return %c0_i32, %c0_i32_0 : i32, i32
  }
  func.func @transform_11(%arg0: i32) -> (i32, i32) {
    %c0_i32 = arith.constant 0 : i32
    %c0_i32_0 = arith.constant 0 : i32
    %c0_i32_1 = arith.constant 0 : i32
    return %c0_i32, %c0_i32_0 : i32, i32
  }
  func.func @transform_12(%arg0: i32) -> (i32, i32) {
    %c0_i32 = arith.constant 0 : i32
    %c0_i32_0 = arith.constant 0 : i32
    %c0_i32_1 = arith.constant 0 : i32
    return %c0_i32, %c0_i32_0 : i32, i32
  }
  func.func @transform_13(%arg0: i32) -> (i32, i32) {
    %c0_i32 = arith.constant 0 : i32
    %c0_i32_0 = arith.constant 0 : i32
    %c0_i32_1 = arith.constant 0 : i32
    return %c0_i32, %c0_i32_0 : i32, i32
  }
  func.func @transform_14(%arg0: i32) -> (i32, i32) {
    %c0_i32 = arith.constant 0 : i32
    %c0_i32_0 = arith.constant 0 : i32
    %c0_i32_1 = arith.constant 0 : i32
    return %c0_i32, %c0_i32_0 : i32, i32
  }
  func.func @transform_15(%arg0: i32) -> (i32, i32) {
    %c0_i32 = arith.constant 0 : i32
    %c0_i32_0 = arith.constant 0 : i32
    %c0_i32_1 = arith.constant 0 : i32
    return %c0_i32, %c0_i32_0 : i32, i32
  }
  func.func @transform_16(%arg0: i32) -> (i32, i32) {
    %c0_i32 = arith.constant 0 : i32
    %c0_i32_0 = arith.constant 0 : i32
    %c0_i32_1 = arith.constant 0 : i32
    return %c0_i32, %c0_i32_0 : i32, i32
  }
  func.func @transform_17(%arg0: i32) -> (i32, i32) {
    %c0_i32 = arith.constant 0 : i32
    %c0_i32_0 = arith.constant 0 : i32
    %c0_i32_1 = arith.constant 0 : i32
    return %c0_i32, %c0_i32_0 : i32, i32
  }
  func.func @transform_18(%arg0: i32) -> (i32, i32) {
    %c0_i32 = arith.constant 0 : i32
    %c0_i32_0 = arith.constant 0 : i32
    %c0_i32_1 = arith.constant 0 : i32
    return %c0_i32, %c0_i32_0 : i32, i32
  }
  func.func @transform_19(%arg0: i32) -> (i32, i32) {
    %c0_i32 = arith.constant 0 : i32
    %c0_i32_0 = arith.constant 0 : i32
    %c0_i32_1 = arith.constant 0 : i32
    return %c0_i32, %c0_i32_0 : i32, i32
  }
  func.func @transform_20(%arg0: i32) -> (i32, i32) {
    %c0_i32 = arith.constant 0 : i32
    %c0_i32_0 = arith.constant 0 : i32
    %c0_i32_1 = arith.constant 0 : i32
    return %c0_i32, %c0_i32_0 : i32, i32
  }
  func.func @transform_21(%arg0: i32) -> (i32, i32) {
    %c0_i32 = arith.constant 0 : i32
    %c0_i32_0 = arith.constant 0 : i32
    %c0_i32_1 = arith.constant 0 : i32
    return %c0_i32, %c0_i32_0 : i32, i32
  }
  func.func @transform_22(%arg0: i32) -> (i32, i32) {
    %c0_i32 = arith.constant 0 : i32
    %c0_i32_0 = arith.constant 0 : i32
    %c0_i32_1 = arith.constant 0 : i32
    return %c0_i32, %c0_i32_0 : i32, i32
  }
  func.func @transform_23(%arg0: i32) -> (i32, i32) {
    %c0_i32 = arith.constant 0 : i32
    %c0_i32_0 = arith.constant 0 : i32
    %c0_i32_1 = arith.constant 0 : i32
    return %c0_i32, %c0_i32_0 : i32, i32
  }
  func.func @transform_24(%arg0: i32) -> (i32, i32) {
    %c0_i32 = arith.constant 0 : i32
    %c0_i32_0 = arith.constant 0 : i32
    %c0_i32_1 = arith.constant 0 : i32
    return %c0_i32, %c0_i32_0 : i32, i32
  }
  func.func @transform_25(%arg0: i32) -> (i32, i32) {
    %c0_i32 = arith.constant 0 : i32
    %c0_i32_0 = arith.constant 0 : i32
    %c0_i32_1 = arith.constant 0 : i32
    return %c0_i32, %c0_i32_0 : i32, i32
  }
  func.func @transform_26(%arg0: i32) -> (i32, i32) {
    %c0_i32 = arith.constant 0 : i32
    %c0_i32_0 = arith.constant 0 : i32
    %c0_i32_1 = arith.constant 0 : i32
    return %c0_i32, %c0_i32_0 : i32, i32
  }
  func.func @transform_27(%arg0: i32) -> (i32, i32) {
    %c0_i32 = arith.constant 0 : i32
    %c0_i32_0 = arith.constant 0 : i32
    %c0_i32_1 = arith.constant 0 : i32
    return %c0_i32, %c0_i32_0 : i32, i32
  }
  func.func @transform_28(%arg0: i32) -> (i32, i32) {
    %c0_i32 = arith.constant 0 : i32
    %c0_i32_0 = arith.constant 0 : i32
    %c0_i32_1 = arith.constant 0 : i32
    return %c0_i32, %c0_i32_0 : i32, i32
  }
  func.func @transform_29(%arg0: i32) -> (i32, i32) {
    %c0_i32 = arith.constant 0 : i32
    %c0_i32_0 = arith.constant 0 : i32
    %c0_i32_1 = arith.constant 0 : i32
    return %c0_i32, %c0_i32_0 : i32, i32
  }
  func.func @transform_30(%arg0: i32) -> (i32, i32) {
    %c0_i32 = arith.constant 0 : i32
    %c0_i32_0 = arith.constant 0 : i32
    %c0_i32_1 = arith.constant 0 : i32
    return %c0_i32, %c0_i32_0 : i32, i32
  }
  func.func @transform_31(%arg0: i32) -> (i32, i32) {
    %c0_i32 = arith.constant 0 : i32
    %c0_i32_0 = arith.constant 0 : i32
    %c0_i32_1 = arith.constant 0 : i32
    return %c0_i32, %c0_i32_0 : i32, i32
  }
  func.func @transform_32(%arg0: i32) -> (i32, i32) {
    %c0_i32 = arith.constant 0 : i32
    %c0_i32_0 = arith.constant 0 : i32
    %c0_i32_1 = arith.constant 0 : i32
    return %c0_i32, %c0_i32_0 : i32, i32
  }
  func.func @transform_33(%arg0: i32) -> (i32, i32) {
    %c0_i32 = arith.constant 0 : i32
    %c0_i32_0 = arith.constant 0 : i32
    %c0_i32_1 = arith.constant 0 : i32
    return %c0_i32, %c0_i32_0 : i32, i32
  }
  func.func @transform_34(%arg0: i32) -> (i32, i32) {
    %c0_i32 = arith.constant 0 : i32
    %c0_i32_0 = arith.constant 0 : i32
    %c0_i32_1 = arith.constant 0 : i32
    return %c0_i32, %c0_i32_0 : i32, i32
  }
  func.func @transform_35(%arg0: i32) -> (i32, i32) {
    %c0_i32 = arith.constant 0 : i32
    %c0_i32_0 = arith.constant 0 : i32
    %c0_i32_1 = arith.constant 0 : i32
    return %c0_i32, %c0_i32_0 : i32, i32
  }
  func.func @transform_36(%arg0: i32) -> (i32, i32) {
    %c0_i32 = arith.constant 0 : i32
    %c0_i32_0 = arith.constant 0 : i32
    %c0_i32_1 = arith.constant 0 : i32
    return %c0_i32, %c0_i32_0 : i32, i32
  }
  func.func @transform_37(%arg0: i32) -> (i32, i32) {
    %c0_i32 = arith.constant 0 : i32
    %c0_i32_0 = arith.constant 0 : i32
    %c0_i32_1 = arith.constant 0 : i32
    return %c0_i32, %c0_i32_0 : i32, i32
  }
  func.func @transform_38(%arg0: i32) -> (i32, i32) {
    %c0_i32 = arith.constant 0 : i32
    %c0_i32_0 = arith.constant 0 : i32
    %c0_i32_1 = arith.constant 0 : i32
    return %c0_i32, %c0_i32_0 : i32, i32
  }
  func.func @transform_39(%arg0: i32) -> (i32, i32) {
    %c0_i32 = arith.constant 0 : i32
    %c0_i32_0 = arith.constant 0 : i32
    %c0_i32_1 = arith.constant 0 : i32
    return %c0_i32, %c0_i32_0 : i32, i32
  }
  func.func @transform_40(%arg0: i32) -> (i32, i32) {
    %c0_i32 = arith.constant 0 : i32
    %c0_i32_0 = arith.constant 0 : i32
    %c0_i32_1 = arith.constant 0 : i32
    return %c0_i32, %c0_i32_0 : i32, i32
  }
  func.func @transform_41(%arg0: i32) -> (i32, i32) {
    %c0_i32 = arith.constant 0 : i32
    %c0_i32_0 = arith.constant 0 : i32
    %c0_i32_1 = arith.constant 0 : i32
    return %c0_i32, %c0_i32_0 : i32, i32
  }
  func.func @transform_42(%arg0: i32) -> (i32, i32) {
    %c0_i32 = arith.constant 0 : i32
    %c0_i32_0 = arith.constant 0 : i32
    %c0_i32_1 = arith.constant 0 : i32
    return %c0_i32, %c0_i32_0 : i32, i32
  }
  func.func @transform_43(%arg0: i32) -> (i32, i32) {
    %c0_i32 = arith.constant 0 : i32
    %c0_i32_0 = arith.constant 0 : i32
    %c0_i32_1 = arith.constant 0 : i32
    return %c0_i32, %c0_i32_0 : i32, i32
  }
  func.func @transform_44(%arg0: i32) -> (i32, i32) {
    %c0_i32 = arith.constant 0 : i32
    %c0_i32_0 = arith.constant 0 : i32
    %c0_i32_1 = arith.constant 0 : i32
    return %c0_i32, %c0_i32_0 : i32, i32
  }
  func.func @transform_45(%arg0: i32) -> (i32, i32) {
    %c0_i32 = arith.constant 0 : i32
    %c0_i32_0 = arith.constant 0 : i32
    %c0_i32_1 = arith.constant 0 : i32
    return %c0_i32, %c0_i32_0 : i32, i32
  }
  func.func @transform_46(%arg0: i32) -> (i32, i32) {
    %c0_i32 = arith.constant 0 : i32
    %c0_i32_0 = arith.constant 0 : i32
    %c0_i32_1 = arith.constant 0 : i32
    return %c0_i32, %c0_i32_0 : i32, i32
  }
  func.func @transform_47(%arg0: i32) -> (i32, i32) {
    %c0_i32 = arith.constant 0 : i32
    %c0_i32_0 = arith.constant 0 : i32
    %c0_i32_1 = arith.constant 0 : i32
    return %c0_i32, %c0_i32_0 : i32, i32
  }
  func.func @transform_48(%arg0: i32) -> (i32, i32) {
    %c0_i32 = arith.constant 0 : i32
    %c0_i32_0 = arith.constant 0 : i32
    %c0_i32_1 = arith.constant 0 : i32
    return %c0_i32, %c0_i32_0 : i32, i32
  }
  func.func @transform_49(%arg0: i32) -> (i32, i32) {
    %c0_i32 = arith.constant 0 : i32
    %c0_i32_0 = arith.constant 0 : i32
    %c0_i32_1 = arith.constant 0 : i32
    return %c0_i32, %c0_i32_0 : i32, i32
  }
  func.func @transform_50(%arg0: i32) -> (i32, i32) {
    %c0_i32 = arith.constant 0 : i32
    %c0_i32_0 = arith.constant 0 : i32
    %c0_i32_1 = arith.constant 0 : i32
    return %c0_i32, %c0_i32_0 : i32, i32
  }
  func.func @transform_51(%arg0: i32) -> (i32, i32) {
    %c0_i32 = arith.constant 0 : i32
    %c0_i32_0 = arith.constant 0 : i32
    %c0_i32_1 = arith.constant 0 : i32
    return %c0_i32, %c0_i32_0 : i32, i32
  }
  func.func @transform_52(%arg0: i32) -> (i32, i32) {
    %c0_i32 = arith.constant 0 : i32
    %c0_i32_0 = arith.constant 0 : i32
    %c0_i32_1 = arith.constant 0 : i32
    return %c0_i32, %c0_i32_0 : i32, i32
  }
  func.func @transform_53(%arg0: i32) -> (i32, i32) {
    %c0_i32 = arith.constant 0 : i32
    %c0_i32_0 = arith.constant 0 : i32
    %c0_i32_1 = arith.constant 0 : i32
    return %c0_i32, %c0_i32_0 : i32, i32
  }
  func.func @transform_54(%arg0: i32) -> (i32, i32) {
    %c0_i32 = arith.constant 0 : i32
    %c0_i32_0 = arith.constant 0 : i32
    %c0_i32_1 = arith.constant 0 : i32
    return %c0_i32, %c0_i32_0 : i32, i32
  }
  func.func @transform_55(%arg0: i32) -> (i32, i32) {
    %c0_i32 = arith.constant 0 : i32
    %c0_i32_0 = arith.constant 0 : i32
    %c0_i32_1 = arith.constant 0 : i32
    return %c0_i32, %c0_i32_0 : i32, i32
  }
  func.func @transform_56(%arg0: i32) -> (i32, i32) {
    %c0_i32 = arith.constant 0 : i32
    %c0_i32_0 = arith.constant 0 : i32
    %c0_i32_1 = arith.constant 0 : i32
    return %c0_i32, %c0_i32_0 : i32, i32
  }
  func.func @transform_57(%arg0: i32) -> (i32, i32) {
    %c0_i32 = arith.constant 0 : i32
    %c0_i32_0 = arith.constant 0 : i32
    %c0_i32_1 = arith.constant 0 : i32
    return %c0_i32, %c0_i32_0 : i32, i32
  }
  func.func @transform_58(%arg0: i32) -> (i32, i32) {
    %c0_i32 = arith.constant 0 : i32
    %c0_i32_0 = arith.constant 0 : i32
    %c0_i32_1 = arith.constant 0 : i32
    return %c0_i32, %c0_i32_0 : i32, i32
  }
  func.func @transform_59(%arg0: i32) -> (i32, i32) {
    %c0_i32 = arith.constant 0 : i32
    %c0_i32_0 = arith.constant 0 : i32
    %c0_i32_1 = arith.constant 0 : i32
    return %c0_i32, %c0_i32_0 : i32, i32
  }
  func.func @transform_60(%arg0: i32) -> (i32, i32) {
    %c0_i32 = arith.constant 0 : i32
    %c0_i32_0 = arith.constant 0 : i32
    %c0_i32_1 = arith.constant 0 : i32
    return %c0_i32, %c0_i32_0 : i32, i32
  }
  func.func @transform_61(%arg0: i32) -> (i32, i32) {
    %c0_i32 = arith.constant 0 : i32
    %c0_i32_0 = arith.constant 0 : i32
    %c0_i32_1 = arith.constant 0 : i32
    return %c0_i32, %c0_i32_0 : i32, i32
  }
  func.func @transform_62(%arg0: i32) -> (i32, i32) {
    %c0_i32 = arith.constant 0 : i32
    %c0_i32_0 = arith.constant 0 : i32
    %c0_i32_1 = arith.constant 0 : i32
    return %c0_i32, %c0_i32_0 : i32, i32
  }
  func.func @transform_63(%arg0: i32) -> (i32, i32) {
    %c0_i32 = arith.constant 0 : i32
    %c0_i32_0 = arith.constant 0 : i32
    %c0_i32_1 = arith.constant 0 : i32
    return %c0_i32, %c0_i32_0 : i32, i32
  }
  func.func @transform_64(%arg0: i32) -> (i32, i32) {
    %c0_i32 = arith.constant 0 : i32
    %c0_i32_0 = arith.constant 0 : i32
    %c0_i32_1 = arith.constant 0 : i32
    return %c0_i32, %c0_i32_0 : i32, i32
  }
  func.func @transform_65(%arg0: i32) -> (i32, i32) {
    %c0_i32 = arith.constant 0 : i32
    %c0_i32_0 = arith.constant 0 : i32
    %c0_i32_1 = arith.constant 0 : i32
    return %c0_i32, %c0_i32_0 : i32, i32
  }
  func.func @transform_66(%arg0: i32) -> (i32, i32) {
    %c0_i32 = arith.constant 0 : i32
    %c0_i32_0 = arith.constant 0 : i32
    %c0_i32_1 = arith.constant 0 : i32
    return %c0_i32, %c0_i32_0 : i32, i32
  }
  func.func @transform_67(%arg0: i32) -> (i32, i32) {
    %c0_i32 = arith.constant 0 : i32
    %c0_i32_0 = arith.constant 0 : i32
    %c0_i32_1 = arith.constant 0 : i32
    return %c0_i32, %c0_i32_0 : i32, i32
  }
  func.func @transform_68(%arg0: i32) -> (i32, i32) {
    %c0_i32 = arith.constant 0 : i32
    %c0_i32_0 = arith.constant 0 : i32
    %c0_i32_1 = arith.constant 0 : i32
    return %c0_i32, %c0_i32_0 : i32, i32
  }
  func.func @transform_69(%arg0: i32) -> (i32, i32) {
    %c0_i32 = arith.constant 0 : i32
    %c0_i32_0 = arith.constant 0 : i32
    %c0_i32_1 = arith.constant 0 : i32
    return %c0_i32, %c0_i32_0 : i32, i32
  }
  func.func @transform_70(%arg0: i32) -> (i32, i32) {
    %c0_i32 = arith.constant 0 : i32
    %c0_i32_0 = arith.constant 0 : i32
    %c0_i32_1 = arith.constant 0 : i32
    return %c0_i32, %c0_i32_0 : i32, i32
  }
  func.func @transform_71(%arg0: i32) -> (i32, i32) {
    %c0_i32 = arith.constant 0 : i32
    %c0_i32_0 = arith.constant 0 : i32
    %c0_i32_1 = arith.constant 0 : i32
    return %c0_i32, %c0_i32_0 : i32, i32
  }
  func.func @transform_72(%arg0: i32) -> (i32, i32) {
    %c0_i32 = arith.constant 0 : i32
    %c0_i32_0 = arith.constant 0 : i32
    %c0_i32_1 = arith.constant 0 : i32
    return %c0_i32, %c0_i32_0 : i32, i32
  }
  func.func @transform_73(%arg0: i32) -> (i32, i32) {
    %c0_i32 = arith.constant 0 : i32
    %c0_i32_0 = arith.constant 0 : i32
    %c0_i32_1 = arith.constant 0 : i32
    return %c0_i32, %c0_i32_0 : i32, i32
  }
  func.func @transform_74(%arg0: i32) -> (i32, i32) {
    %c0_i32 = arith.constant 0 : i32
    %c0_i32_0 = arith.constant 0 : i32
    %c0_i32_1 = arith.constant 0 : i32
    return %c0_i32, %c0_i32_0 : i32, i32
  }
  func.func @transform_75(%arg0: i32) -> (i32, i32) {
    %c0_i32 = arith.constant 0 : i32
    %c0_i32_0 = arith.constant 0 : i32
    %c0_i32_1 = arith.constant 0 : i32
    return %c0_i32, %c0_i32_0 : i32, i32
  }
  func.func @transform_76(%arg0: i32) -> (i32, i32) {
    %c0_i32 = arith.constant 0 : i32
    %c0_i32_0 = arith.constant 0 : i32
    %c0_i32_1 = arith.constant 0 : i32
    return %c0_i32, %c0_i32_0 : i32, i32
  }
  func.func @transform_77(%arg0: i32) -> (i32, i32) {
    %c0_i32 = arith.constant 0 : i32
    %c0_i32_0 = arith.constant 0 : i32
    return %arg0, %c0_i32 : i32, i32
  }
}

</mosaic_0001>

<bundles_post_ra>
// kernel: msd_mixer_forward.1
= control target key start
LH: loop header
LB: loop body
LE: loop exit
PB: predicated region body
PF: predicated region fallthrough
CT: control target
= control target key end

     0   :  { %s8064_s6 = smov 1   ;;  %s8065_s10 = smov 2   ;;  %s9275_s0 = inlined_call_operand.smem [shape: u32[78], index: -1, kind: input, shape index: {}] }
   0x1   :  { %s8225_s5 = sld [smem:[%s9275_s0]]   ;;  %s8066_s14 = smov 3  }
   0x2   :  { %s8230_s9 = sld [smem:[%s9275_s0 + %s8064_s6]]   ;;  %s8067_s18 = smov 4  }
   0x3   :  { %s8235_s13 = sld [smem:[%s9275_s0 + %s8065_s10]]   ;;  %s8068_s22 = smov 5  }
   0x4   :  { %s8240_s17 = sld [smem:[%s9275_s0 + %s8066_s14]]   ;;  %s8069_s26 = smov 6  }
   0x5   :  { %s8245_s21 = sld [smem:[%s9275_s0 + %s8067_s18]]   ;;  %s8070_s30 = smov 7  }
   0x6   :  { %s8250_s25 = sld [smem:[%s9275_s0 + %s8068_s22]]   ;;  %s8071_s4 = smov 8  }
   0x7   :  { %9278 = sst [smem:[#allocation138_spill]] %s8225_s5  ;;  %s8072_s10 = smov 9  }
   0x8   :  { %9279 = sst [smem:[#allocation139_spill]] %s8230_s9  ;;  %s8073_s15 = smov 10  }
   0x9   :  { %s8255_s29 = sld [smem:[%s9275_s0 + %s8069_s26]]   ;;  %s8074_s20 = smov 11  }
   0xa   :  { %9280 = sst [smem:[#allocation140_spill]] %s8240_s17  ;;  %s8075_s26 = smov 12  }
   0xb   :  { %s8260_s3 = sld [smem:[%s9275_s0 + %s8070_s30]]   ;;  %s8076_s1 = smov 13  }
   0xc   :  { %9281 = sst [smem:[#allocation141_spill]] %s8250_s25  ;;  %s8077_s7 = smov 14  }
   0xd   :  { %s8265_s8 = sld [smem:[%s9275_s0 + %s8071_s4]]   ;;  %s8079_s22 = smov 16  }
   0xe   :  { %s8270_s14 = sld [smem:[%s9275_s0 + %s8072_s10]]   ;;  %s8080_s28 = smov 17  }
   0xf   :  { %s8275_s19 = sld [smem:[%s9275_s0 + %s8073_s15]]   ;;  %s8078_s15 = smov 15  }
  0x10   :  { %s8280_s24 = sld [smem:[%s9275_s0 + %s8074_s20]]  }
  0x11   :  { %9282 = sst [smem:[#allocation142_spill]] %s8260_s3 }
  0x12   :  { %s8285_s30 = sld [smem:[%s9275_s0 + %s8075_s26]]  }
  0x13   :  { %s8290_s6 = sld [smem:[%s9275_s0 + %s8076_s1]]  }
  0x14   :  { %9283 = sst [smem:[#allocation143_spill]] %s8270_s14 }
  0x15   :  { %s8295_s12 = sld [smem:[%s9275_s0 + %s8077_s7]]   ;;  %s8081_s7 = smov 18  }
  0x16   :  { %9284 = sst [smem:[#allocation144_spill]] %s8280_s24 }
  0x17   :  { %s8300_s20 = sld [smem:[%s9275_s0 + %s8078_s15]]   ;;  %s8082_s15 = smov 19  }
  0x18   :  { %s8305_s27 = sld [smem:[%s9275_s0 + %s8079_s22]]   ;;  %s8083_s22 = smov 20  }
  0x19   :  { %9285 = sst [smem:[#allocation145_spill]] %s8290_s6 }
  0x1a   :  { %s8310_s4 = sld [smem:[%s9275_s0 + %s8080_s28]]   ;;  %s8084_s28 = smov 21  }
  0x1b   :  { %9286 = sst [smem:[#allocation146_spill]] %s8295_s12 }
  0x1c   :  { %s8315_s12 = sld [smem:[%s9275_s0 + %s8081_s7]]   ;;  %s8085_s7 = smov 22  }
  0x1d   :  { %s8320_s5 = sld [smem:[%s9275_s0 + %s8082_s15]]   ;;  %s8086_s15 = smov 23  }
  0x1e   :  { %9287 = sst [smem:[#allocation147_spill]] %s8305_s27 }
  0x1f   :  { %s8325_s27 = sld [smem:[%s9275_s0 + %s8083_s22]]   ;;  %s8087_s22 = smov 24  }
  0x20   :  { %s8330_s6 = sld [smem:[%s9275_s0 + %s8084_s28]]   ;;  %s8088_s28 = smov 25  }
  0x21   :  { %s8340_s24 = sld [smem:[%s9275_s0 + %s8086_s15]]   ;;  %s8090_s15 = smov 27  }
  0x22   :  { %9288 = sst [smem:[#allocation148_spill]] %s8315_s12 }
  0x23   :  { %s8335_s12 = sld [smem:[%s9275_s0 + %s8085_s7]]   ;;  %s8089_s7 = smov 26  }
  0x24   :  { %s8350_s14 = sld [smem:[%s9275_s0 + %s8088_s28]]   ;;  %s8092_s28 = smov 29  }
  0x25   :  { %9289 = sst [smem:[#allocation149_spill]] %s8325_s27 }
  0x26   :  { %s8345_s27 = sld [smem:[%s9275_s0 + %s8087_s22]]   ;;  %s8091_s22 = smov 28  }
  0x27   :  { %s8360_s3 = sld [smem:[%s9275_s0 + %s8090_s15]]   ;;  %s8094_s15 = smov 31  }
  0x28   :  { %s8370_s25 = sld [smem:[%s9275_s0 + %s8092_s28]]   ;;  %s8096_s28 = smov 33  }
  0x29   :  { %9290 = sst [smem:[#allocation150_spill]] %s8335_s12 }
  0x2a   :  { %s8355_s12 = sld [smem:[%s9275_s0 + %s8089_s7]]   ;;  %s8093_s7 = smov 30  }
  0x2b   :  { %s8380_s17 = sld [smem:[%s9275_s0 + %s8094_s15]]   ;;  %s8098_s15 = smov 35  }
  0x2c   :  { %9291 = sst [smem:[#allocation151_spill]] %s8345_s27 }
  0x2d   :  { %s8365_s27 = sld [smem:[%s9275_s0 + %s8091_s22]]   ;;  %s8095_s22 = smov 32  }
  0x2e   :  { %s8390_s9 = sld [smem:[%s9275_s0 + %s8096_s28]]   ;;  %s8100_s28 = smov 37  }
  0x30   :  { %9292 = sst [smem:[#allocation152_spill]] %s8355_s12 }
  0x31   :  { %s8375_s12 = sld [smem:[%s9275_s0 + %s8093_s7]]   ;;  %s8097_s7 = smov 34  }
  0x32   :  { %9295 = sst [smem:[#allocation155_spill]] %s8380_s17 }
  0x33   :  { %9293 = sst [smem:[#allocation153_spill]] %s8365_s27 }
  0x34   :  { %s8385_s27 = sld [smem:[%s9275_s0 + %s8095_s22]]   ;;  %s8099_s22 = smov 36  }
  0x35   :  { %9297 = sst [smem:[#allocation157_spill]] %s8390_s9 }
  0x36   :  { %s8400_s17 = sld [smem:[%s9275_s0 + %s8098_s15]]   ;;  %s8102_s15 = smov 39  }
  0x37   :  { %9294 = sst [smem:[#allocation154_spill]] %s8375_s12 }
  0x38   :  { %s8395_s12 = sld [smem:[%s9275_s0 + %s8097_s7]]   ;;  %s8101_s7 = smov 38  }
  0x39   :  { %s8410_s9 = sld [smem:[%s9275_s0 + %s8100_s28]]   ;;  %s8104_s28 = smov 41  }
  0x3a   :  { %9296 = sst [smem:[#allocation156_spill]] %s8385_s27 }
  0x3b   :  { %s8405_s27 = sld [smem:[%s9275_s0 + %s8099_s22]]   ;;  %s8103_s22 = smov 40  }
  0x3c   :  { %9299 = sst [smem:[#allocation159_spill]] %s8400_s17 }
  0x3d   :  { %s8420_s17 = sld [smem:[%s9275_s0 + %s8102_s15]]   ;;  %s8106_s15 = smov 43  }
  0x3e   :  { %9298 = sst [smem:[#allocation158_spill]] %s8395_s12 }
  0x3f   :  { %9301 = sst [smem:[#allocation161_spill]] %s8410_s9 }
  0x40   :  { %s8415_s12 = sld [smem:[%s9275_s0 + %s8101_s7]]   ;;  %s8105_s7 = smov 42  }
  0x41   :  { %9300 = sst [smem:[#allocation160_spill]] %s8405_s27 }
  0x42   :  { %s8425_s27 = sld [smem:[%s9275_s0 + %s8103_s22]]   ;;  %s8107_s22 = smov 44  }
  0x43   :  { %9303 = sst [smem:[#allocation163_spill]] %s8420_s17 }
  0x44   :  { %s8430_s9 = sld [smem:[%s9275_s0 + %s8104_s28]]   ;;  %s8108_s28 = smov 45  }
  0x45   :  { %s8440_s17 = sld [smem:[%s9275_s0 + %s8106_s15]]   ;;  %s8110_s15 = smov 47  }
  0x46   :  { %9302 = sst [smem:[#allocation162_spill]] %s8415_s12 }
  0x47   :  { %s8435_s12 = sld [smem:[%s9275_s0 + %s8105_s7]]   ;;  %s8109_s7 = smov 46  }
  0x48   :  { %9304 = sst [smem:[#allocation164_spill]] %s8425_s27 }
  0x49   :  { %s8445_s27 = sld [smem:[%s9275_s0 + %s8107_s22]]   ;;  %s8111_s22 = smov 48  }
  0x4a   :  { %9305 = sst [smem:[#allocation165_spill]] %s8430_s9 }
  0x4b   :  { %9307 = sst [smem:[#allocation167_spill]] %s8440_s17 }
  0x4c   :  { %s8450_s9 = sld [smem:[%s9275_s0 + %s8108_s28]]   ;;  %s8112_s28 = smov 49  }
  0x4d   :  { %9306 = sst [smem:[#allocation166_spill]] %s8435_s12 }
  0x4e   :  { %s8455_s12 = sld [smem:[%s9275_s0 + %s8109_s7]]   ;;  %s8113_s7 = smov 50  }
  0x4f   :  { %9308 = sst [smem:[#allocation168_spill]] %s8445_s27 }
  0x50   :  { %s8460_s17 = sld [smem:[%s9275_s0 + %s8110_s15]]   ;;  %s8114_s15 = smov 51  }
  0x51   :  { %s8465_s27 = sld [smem:[%s9275_s0 + %s8111_s22]]   ;;  %s8115_s22 = smov 52  }
  0x52   :  { %9309 = sst [smem:[#allocation169_spill]] %s8450_s9 }
  0x53   :  { %s8470_s9 = sld [smem:[%s9275_s0 + %s8112_s28]]   ;;  %s8116_s28 = smov 53  }
  0x54   :  { %9310 = sst [smem:[#allocation170_spill]] %s8455_s12 }
  0x55   :  { %s8475_s12 = sld [smem:[%s9275_s0 + %s8113_s7]]   ;;  %s8117_s7 = smov 54  }
  0x56   :  { %9311 = sst [smem:[#allocation171_spill]] %s8460_s17 }
  0x57   :  { %9312 = sst [smem:[#allocation172_spill]] %s8465_s27 }
  0x58   :  { %s8480_s17 = sld [smem:[%s9275_s0 + %s8114_s15]]   ;;  %s8118_s15 = smov 55  }
  0x59   :  { %9313 = sst [smem:[#allocation173_spill]] %s8470_s9 }
  0x5a   :  { %s8485_s27 = sld [smem:[%s9275_s0 + %s8115_s22]]   ;;  %s8119_s22 = smov 56  }
  0x5b   :  { %9314 = sst [smem:[#allocation174_spill]] %s8475_s12 }
  0x5c   :  { %s8490_s9 = sld [smem:[%s9275_s0 + %s8116_s28]]   ;;  %s8120_s28 = smov 57  }
  0x5d   :  { %s8495_s12 = sld [smem:[%s9275_s0 + %s8117_s7]]   ;;  %s8121_s7 = smov 58  }
  0x5e   :  { %9315 = sst [smem:[#allocation175_spill]] %s8480_s17 }
  0x5f   :  { %s8500_s17 = sld [smem:[%s9275_s0 + %s8118_s15]]   ;;  %s8122_s15 = smov 59  }
  0x60   :  { %9316 = sst [smem:[#allocation176_spill]] %s8485_s27 }
  0x61   :  { %s8505_s27 = sld [smem:[%s9275_s0 + %s8119_s22]]   ;;  %s8123_s22 = smov 60  }
  0x62   :  { %9317 = sst [smem:[#allocation177_spill]] %s8490_s9 }
  0x63   :  { %9318 = sst [smem:[#allocation178_spill]] %s8495_s12 }
  0x64   :  { %s8510_s9 = sld [smem:[%s9275_s0 + %s8120_s28]]   ;;  %s8124_s28 = smov 61  }
  0x65   :  { %9319 = sst [smem:[#allocation179_spill]] %s8500_s17 }
  0x66   :  { %s8515_s12 = sld [smem:[%s9275_s0 + %s8121_s7]]   ;;  %s8125_s7 = smov 62  }
  0x67   :  { %9320 = sst [smem:[#allocation180_spill]] %s8505_s27 }
  0x68   :  { %s8520_s17 = sld [smem:[%s9275_s0 + %s8122_s15]]   ;;  %s8126_s15 = smov 63  }
  0x69   :  { %s8525_s27 = sld [smem:[%s9275_s0 + %s8123_s22]]   ;;  %s8127_s22 = smov 64  }
  0x6a   :  { %9321 = sst [smem:[#allocation181_spill]] %s8510_s9 }
  0x6b   :  { %s8530_s9 = sld [smem:[%s9275_s0 + %s8124_s28]]   ;;  %s8128_s28 = smov 65  }
  0x6c   :  { %9322 = sst [smem:[#allocation182_spill]] %s8515_s12 }
  0x6d   :  { %s8535_s12 = sld [smem:[%s9275_s0 + %s8125_s7]]   ;;  %s8129_s7 = smov 66  }
  0x6e   :  { %9323 = sst [smem:[#allocation183_spill]] %s8520_s17 }
  0x6f   :  { %9324 = sst [smem:[#allocation184_spill]] %s8525_s27 }
  0x70   :  { %s8540_s17 = sld [smem:[%s9275_s0 + %s8126_s15]]   ;;  %s8130_s15 = smov 67  }
  0x71   :  { %9325 = sst [smem:[#allocation185_spill]] %s8530_s9 }
  0x72   :  { %s8545_s27 = sld [smem:[%s9275_s0 + %s8127_s22]]   ;;  %s8131_s22 = smov 68  }
  0x73   :  { %9326 = sst [smem:[#allocation186_spill]] %s8535_s12 }
  0x74   :  { %s8550_s9 = sld [smem:[%s9275_s0 + %s8128_s28]]   ;;  %s8132_s28 = smov 69  }
  0x75   :  { %s8555_s12 = sld [smem:[%s9275_s0 + %s8129_s7]]   ;;  %s8133_s7 = smov 70  }
  0x76   :  { %9327 = sst [smem:[#allocation187_spill]] %s8540_s17 }
  0x77   :  { %s8560_s17 = sld [smem:[%s9275_s0 + %s8130_s15]]   ;;  %s8134_s15 = smov 71  }
  0x78   :  { %9328 = sst [smem:[#allocation188_spill]] %s8545_s27 }
  0x79   :  { %s8565_s27 = sld [smem:[%s9275_s0 + %s8131_s22]]   ;;  %s8135_s22 = smov 72  }
  0x7a   :  { %9329 = sst [smem:[#allocation189_spill]] %s8550_s9 }
  0x7b   :  { %9330 = sst [smem:[#allocation190_spill]] %s8555_s12 }
  0x7c   :  { %s8570_s9 = sld [smem:[%s9275_s0 + %s8132_s28]]   ;;  %s8136_s28 = smov 73  }
  0x7d   :  { %9331 = sst [smem:[#allocation191_spill]] %s8560_s17 }
  0x7e   :  { %s8575_s12 = sld [smem:[%s9275_s0 + %s8133_s7]]   ;;  %s8137_s7 = smov 74  }
  0x7f   :  { %9332 = sst [smem:[#allocation192_spill]] %s8565_s27 }
  0x80   :  { %s8580_s17 = sld [smem:[%s9275_s0 + %s8134_s15]]   ;;  %s8138_s15 = smov 75  }
  0x81   :  { %s8585_s27 = sld [smem:[%s9275_s0 + %s8135_s22]]   ;;  %s8139_s22 = smov 76  }
  0x82   :  { %9333 = sst [smem:[#allocation193_spill]] %s8570_s9 }
  0x83   :  { %s8590_s9 = sld [smem:[%s9275_s0 + %s8136_s28]]   ;;  %s8140_s28 = smov 77  }
  0x84   :  { %9334 = sst [smem:[#allocation194_spill]] %s8575_s12 }
  0x85   :  { %s8595_s12 = sld [smem:[%s9275_s0 + %s8137_s7]]  }
  0x86   :  { %9335 = sst [smem:[#allocation195_spill]] %s8580_s17 }
  0x87   :  { %9336 = sst [smem:[#allocation196_spill]] %s8585_s27 }
  0x88   :  { %s8600_s17 = sld [smem:[%s9275_s0 + %s8138_s15]]  }
  0x89   :  { %9337 = sst [smem:[#allocation197_spill]] %s8590_s9 }
  0x8a   :  { %s8605_s27 = sld [smem:[%s9275_s0 + %s8139_s22]]  }
  0x8b   :  { %s8610_s9 = sld [smem:[%s9275_s0 + %s8140_s28]]  }
  0x8c   :  { %160 = vsyncpa [#allocation4], 0 }
  0x8d   :  { %161 = vsyncpa [#allocation6], 0 }
  0x8e   :  { %162 = vsyncpa [#allocation9], 0 }
  0x8f   :  { %163 = vsyncpa [#allocation12], 0 }
  0x90   :  { %164 = vsyncpa [#allocation15], 0 }
  0x91   :  { %165 = vsyncpa [#allocation18], 0 }
  0x92   :  { %166 = vsyncpa [#allocation21], 0 }
  0x93   :  { %167 = vsyncpa [#allocation24], 0 }
  0x94   :  { %168 = vsyncpa [#allocation27], 0 }
  0x95   :  { %169 = vsyncpa [#allocation30], 0 }
  0x96   :  { %170 = vsyncpa [#allocation33], 0 }
  0x97   :  { %171 = vsyncpa [#allocation36], 0 }
  0x98   :  { %172 = vsyncpa [#allocation39], 0 }
  0x99   :  { %173 = vsyncpa [#allocation42], 0 }
  0x9a   :  { %174 = vsyncpa [#allocation45], 0 }
  0x9b   :  { %175 = vsyncpa [#allocation48], 0 }
  0x9c   :  { %176 = vsyncpa [#allocation51], 0 }
  0x9d   :  { %177 = vsyncpa [#allocation54], 0 }
  0x9e   :  { %178 = vsyncpa [#allocation57], 0 }
  0x9f   :  { %179 = vsyncpa [#allocation60], 0 }
  0xa0   :  { %180 = vsyncpa [#allocation63], 0 }
  0xa1   :  { %181 = vsyncpa [#allocation66], 0 }
  0xa2   :  { %182 = vsyncpa [#allocation69], 0 }
  0xa3   :  { %183 = vsyncpa [#allocation72], 0 }
  0xa4   :  { %184 = vsyncpa [#allocation75], 0 }
  0xa5   :  { %185 = vsyncpa [#allocation78], 0 }
  0xa6   :  { %186 = vsyncpa [#allocation81], 0 }
  0xa7   :  { %187 = vsyncpa [#allocation84], 0 }
  0xa8   :  { %188 = vsyncpa [#allocation87], 0 }
  0xa9   :  { %189 = vsyncpa [#allocation90], 0 }
  0xaa   :  { %190 = vsyncpa [#allocation93], 0 }
  0xab   :  { %191 = vsyncpa [#allocation96], 0 }
  0xac   :  { %192 = vsyncpa [#allocation99], 0 }
  0xad   :  { %193 = vsyncpa [#allocation102], 0  ;;  %s8141_s0 = smov [#allocation5]   ;;  %s8142_s10 = smov [#allocation8]  }
  0xae   :  { %s213_s7 = sshll.u32 %s8141_s0, 4  ;;  %s236_s11 = sshll.u32 %s8142_s10, 4  ;;  %s214_s7 = int_to_ptr.vmem [resolvable:$true] %s213_s7  ;;  %s237_s11 = int_to_ptr.vmem [resolvable:$true] %s236_s11 }
  0xaf   :  { %s6664_s15 = scalar_lea.vmem %s214_s7, 1024  ;;  %p6669_p1 = scmp.lt.s32.totalorder %s214_s7, %s214_s7 }
  0xb0   :  { %p6665_p0 = scmp.ne.s32.totalorder %s214_s7, %s6664_s15  ;;  %p6670_p2 = scmp.lt.s32.totalorder %s6664_s15, %s6664_s15 }
  0xb2   :  { %p6671_p3 = por %p6670_p2, %p6669_p1 }
  0xb4   :  { %p6672_p4 = pnand %p6671_p3, %p6665_p0 }
  0xb6   :  { %6675 = shalt.err (!%p6672_p4)
}
  0xb7   :  { %s8143_s16 = smov 128   ;;  %s8144_s18 = smov 8  }
  0xb8   :  { %219 = dma.hbm_to_vmem [thread:$0]  %s8235_s13, 1024, %s214_s7, [#allocation6], %s8143_s16, %s8143_s16, %s8144_s18  }
  0xb9   :  { %s6684_s22 = scalar_lea.vmem %s237_s11, 128  ;;  %p6689_p6 = scmp.lt.s32.totalorder %s237_s11, %s237_s11 }
  0xba   :  { %p6685_p5 = scmp.ne.s32.totalorder %s237_s11, %s6684_s22  ;;  %p6690_p7 = scmp.lt.s32.totalorder %s6684_s22, %s6684_s22 }
  0xbc   :  { %p6691_p8 = por %p6690_p7, %p6689_p6 }
  0xbe   :  { %p6692_p9 = pnand %p6691_p8, %p6685_p5 }
  0xc0   :  { %6695 = shalt.err (!%p6692_p9)
}
  0xc1   :  { %239 = dma.hbm_to_vmem [thread:$0]  %s8245_s21, 128, %s237_s11, [#allocation9]  }
  0xc2   :  { %s8145_s23 = smov [#allocation11]   ;;  %s8146_s28 = smov [#allocation14]  }
  0xc3   :  { %s258_s26 = sshll.u32 %s8145_s23, 4  ;;  %s280_s1 = sshll.u32 %s8146_s28, 4  ;;  %s259_s26 = int_to_ptr.vmem [resolvable:$true] %s258_s26  ;;  %s281_s1 = int_to_ptr.vmem [resolvable:$true] %s280_s1 }
  0xc4   :  { %s6704_s2 = scalar_lea.vmem %s259_s26, 16  ;;  %s6708_s0 = scalar_lea.vmem %s259_s26, 32 }
  0xc5   :  { %p6705_p10 = scmp.ne.s32.totalorder %s259_s26, %s6704_s2  ;;  %p6709_p11 = scmp.lt.s32.totalorder %s259_s26, %s259_s26 }
  0xc6   :  { %p6710_p12 = scmp.lt.s32.totalorder %s6708_s0, %s6704_s2 }
  0xc8   :  { %p6711_p13 = por %p6710_p12, %p6709_p11 }
  0xca   :  { %p6712_p0 = pnand %p6711_p13, %p6705_p10 }
  0xcc   :  { %6715 = shalt.err (!%p6712_p0)
}
  0xcd   :  { %261 = dma.hbm_to_vmem [thread:$0]  %s8255_s29, 16, %s259_s26, [#allocation12]  }
  0xce   :  { %s6724_s13 = scalar_lea.vmem %s281_s1, 16  ;;  %s6728_s7 = scalar_lea.vmem %s281_s1, 32 }
  0xcf   :  { %p6725_p1 = scmp.ne.s32.totalorder %s281_s1, %s6724_s13  ;;  %p6729_p2 = scmp.lt.s32.totalorder %s281_s1, %s281_s1 }
  0xd0   :  { %p6730_p3 = scmp.lt.s32.totalorder %s6728_s7, %s6724_s13 }
  0xd2   :  { %p6731_p4 = por %p6730_p3, %p6729_p2 }
  0xd4   :  { %p6732_p5 = pnand %p6731_p4, %p6725_p1 }
  0xd6   :  { %6735 = shalt.err (!%p6732_p5)
}
  0xd7   :  { %283 = dma.hbm_to_vmem [thread:$0]  %s8265_s8, 16, %s281_s1, [#allocation15]  }
  0xd8   :  { %s8147_s21 = smov [#allocation17]   ;;  %s8148_s11 = smov [#allocation20]  }
  0xd9   :  { %s302_s10 = sshll.u32 %s8147_s21, 4  ;;  %s324_s15 = sshll.u32 %s8148_s11, 4  ;;  %s303_s10 = int_to_ptr.vmem [resolvable:$true] %s302_s10  ;;  %s325_s15 = int_to_ptr.vmem [resolvable:$true] %s324_s15 }
  0xda   :  { %s6744_s22 = scalar_lea.vmem %s303_s10, 16  ;;  %s6748_s23 = scalar_lea.vmem %s303_s10, 32 }
  0xdb   :  { %p6745_p6 = scmp.ne.s32.totalorder %s303_s10, %s6744_s22  ;;  %p6749_p7 = scmp.lt.s32.totalorder %s303_s10, %s303_s10 }
  0xdc   :  { %p6750_p8 = scmp.lt.s32.totalorder %s6748_s23, %s6744_s22 }
  0xde   :  { %p6751_p9 = por %p6750_p8, %p6749_p7 }
  0xe0   :  { %p6752_p10 = pnand %p6751_p9, %p6745_p6 }
  0xe2   :  { %6755 = shalt.err (!%p6752_p10)
}
  0xe3   :  { %305 = dma.hbm_to_vmem [thread:$0]  %s8275_s19, 16, %s303_s10, [#allocation18]  }
  0xe4   :  { %s6764_s29 = scalar_lea.vmem %s325_s15, 16  ;;  %s6768_s26 = scalar_lea.vmem %s325_s15, 32 }
  0xe5   :  { %p6765_p11 = scmp.ne.s32.totalorder %s325_s15, %s6764_s29  ;;  %p6769_p12 = scmp.lt.s32.totalorder %s325_s15, %s325_s15 }
  0xe6   :  { %p6770_p13 = scmp.lt.s32.totalorder %s6768_s26, %s6764_s29 }
  0xe8   :  { %p6771_p0 = por %p6770_p13, %p6769_p12 }
  0xea   :  { %p6772_p1 = pnand %p6771_p0, %p6765_p11 }
  0xec   :  { %6775 = shalt.err (!%p6772_p1)
}
  0xed   :  { %327 = dma.hbm_to_vmem [thread:$0]  %s8285_s30, 16, %s325_s15, [#allocation21]  }
  0xee   :  { %s8149_s8 = smov [#allocation23]   ;;  %s8150_s1 = smov [#allocation26]  }
  0xef   :  { %s348_s28 = sshll.u32 %s8149_s8, 4  ;;  %s367_s2 = sshll.u32 %s8150_s1, 4  ;;  %s349_s28 = int_to_ptr.vmem [resolvable:$true] %s348_s28  ;;  %s368_s2 = int_to_ptr.vmem [resolvable:$true] %s367_s2 }
  0xf0   :  { %s6784_s0 = scalar_lea.vmem %s349_s28, 64  ;;  %p6789_p3 = scmp.lt.s32.totalorder %s349_s28, %s349_s28 }
  0xf1   :  { %p6785_p2 = scmp.ne.s32.totalorder %s349_s28, %s6784_s0  ;;  %p6790_p4 = scmp.lt.s32.totalorder %s6784_s0, %s6784_s0 }
  0xf3   :  { %p6791_p5 = por %p6790_p4, %p6789_p3 }
  0xf5   :  { %p6792_p6 = pnand %p6791_p5, %p6785_p2 }
  0xf7   :  { %6795 = shalt.err (!%p6792_p6)
}
  0xf8   :  { %351 = dma.hbm_to_vmem [thread:$0]  %s8300_s20, 64, %s349_s28, [#allocation24]  }
  0xf9   :  { %s6804_s19 = scalar_lea.vmem %s368_s2, 256  ;;  %p6809_p8 = scmp.lt.s32.totalorder %s368_s2, %s368_s2 }
  0xfa   :  { %p6805_p7 = scmp.ne.s32.totalorder %s368_s2, %s6804_s19  ;;  %p6810_p9 = scmp.lt.s32.totalorder %s6804_s19, %s6804_s19 }
  0xfc   :  { %p6811_p10 = por %p6810_p9, %p6809_p8 }
  0xfe   :  { %p6812_p11 = pnand %p6811_p10, %p6805_p7 }
 0x100   :  { %6815 = shalt.err (!%p6812_p11)
}
 0x101   :  { %373 = dma.hbm_to_vmem [thread:$0]  %s8310_s4, 256, %s368_s2, [#allocation27], %s8143_s16, %s8143_s16, %s8144_s18  }
 0x102   :  { %s8151_s30 = smov [#allocation29]   ;;  %s8152_s7 = smov [#allocation32]  }
 0x103   :  { %s389_s13 = sshll.u32 %s8151_s30, 4  ;;  %s411_s21 = sshll.u32 %s8152_s7, 4  ;;  %s390_s13 = int_to_ptr.vmem [resolvable:$true] %s389_s13  ;;  %s412_s21 = int_to_ptr.vmem [resolvable:$true] %s411_s21 }
 0x104   :  { %s6824_s10 = scalar_lea.vmem %s390_s13, 2048  ;;  %p6829_p13 = scmp.lt.s32.totalorder %s390_s13, %s390_s13 }
 0x105   :  { %p6825_p12 = scmp.ne.s32.totalorder %s390_s13, %s6824_s10  ;;  %p6830_p0 = scmp.lt.s32.totalorder %s6824_s10, %s6824_s10 }
 0x107   :  { %p6831_p1 = por %p6830_p0, %p6829_p13 }
 0x109   :  { %p6832_p2 = pnand %p6831_p1, %p6825_p12 }
 0x10b   :  { %6835 = shalt.err (!%p6832_p2)
}
 0x10c   :  { %395 = dma.hbm_to_vmem [thread:$0]  %s8320_s5, 2048, %s390_s13, [#allocation30], %s8143_s16, %s8143_s16, %s8144_s18  }
 0x10d   :  { %s6844_s20 = scalar_lea.vmem %s412_s21, 256  ;;  %p6849_p4 = scmp.lt.s32.totalorder %s412_s21, %s412_s21 }
 0x10e   :  { %p6845_p3 = scmp.ne.s32.totalorder %s412_s21, %s6844_s20  ;;  %p6850_p5 = scmp.lt.s32.totalorder %s6844_s20, %s6844_s20 }
 0x110   :  { %p6851_p6 = por %p6850_p5, %p6849_p4 }
 0x112   :  { %p6852_p7 = pnand %p6851_p6, %p6845_p3 }
 0x114   :  { %6855 = shalt.err (!%p6852_p7)
}
 0x115   :  { %417 = dma.hbm_to_vmem [thread:$0]  %s8330_s6, 256, %s412_s21, [#allocation33], %s8143_s16, %s8143_s16, %s8144_s18  }
 0x116   :  { %s8153_s4 = smov [#allocation35]   ;;  %s8154_s15 = smov [#allocation38]  }
 0x117   :  { %s433_s11 = sshll.u32 %s8153_s4, 4  ;;  %s455_s22 = sshll.u32 %s8154_s15, 4  ;;  %s434_s11 = int_to_ptr.vmem [resolvable:$true] %s433_s11  ;;  %s456_s22 = int_to_ptr.vmem [resolvable:$true] %s455_s22 }
 0x118   :  { %s6864_s23 = scalar_lea.vmem %s434_s11, 2048  ;;  %p6869_p9 = scmp.lt.s32.totalorder %s434_s11, %s434_s11 }
 0x119   :  { %p6865_p8 = scmp.ne.s32.totalorder %s434_s11, %s6864_s23  ;;  %p6870_p10 = scmp.lt.s32.totalorder %s6864_s23, %s6864_s23 }
 0x11b   :  { %p6871_p11 = por %p6870_p10, %p6869_p9 }
 0x11d   :  { %p6872_p12 = pnand %p6871_p11, %p6865_p8 }
 0x11f   :  { %6875 = shalt.err (!%p6872_p12)
}
 0x120   :  { %439 = dma.hbm_to_vmem [thread:$0]  %s8340_s24, 2048, %s434_s11, [#allocation36], %s8143_s16, %s8143_s16, %s8144_s18  }
 0x121   :  { %s6884_s5 = scalar_lea.vmem %s456_s22, 1024  ;;  %p6889_p0 = scmp.lt.s32.totalorder %s456_s22, %s456_s22 }
 0x122   :  { %p6885_p13 = scmp.ne.s32.totalorder %s456_s22, %s6884_s5  ;;  %p6890_p1 = scmp.lt.s32.totalorder %s6884_s5, %s6884_s5 }
 0x124   :  { %p6891_p2 = por %p6890_p1, %p6889_p0 }
 0x126   :  { %p6892_p3 = pnand %p6891_p2, %p6885_p13 }
 0x128   :  { %6895 = shalt.err (!%p6892_p3)
}
 0x129   :  { %461 = dma.hbm_to_vmem [thread:$0]  %s8350_s14, 1024, %s456_s22, [#allocation39], %s8143_s16, %s8143_s16, %s8144_s18  }
 0x12a   :  { %s8155_s6 = smov [#allocation41]   ;;  %s8156_s26 = smov [#allocation44]  }
 0x12b   :  { %s480_s29 = sshll.u32 %s8155_s6, 4  ;;  %s499_s8 = sshll.u32 %s8156_s26, 4  ;;  %s481_s29 = int_to_ptr.vmem [resolvable:$true] %s480_s29  ;;  %s500_s8 = int_to_ptr.vmem [resolvable:$true] %s499_s8 }
 0x12c   :  { %s6904_s28 = scalar_lea.vmem %s481_s29, 128  ;;  %p6909_p5 = scmp.lt.s32.totalorder %s481_s29, %s481_s29 }
 0x12d   :  { %p6905_p4 = scmp.ne.s32.totalorder %s481_s29, %s6904_s28  ;;  %p6910_p6 = scmp.lt.s32.totalorder %s6904_s28, %s6904_s28 }
 0x12f   :  { %p6911_p7 = por %p6910_p6, %p6909_p5 }
 0x131   :  { %p6912_p8 = pnand %p6911_p7, %p6905_p4 }
 0x133   :  { %6915 = shalt.err (!%p6912_p8)
}
 0x134   :  { %483 = dma.hbm_to_vmem [thread:$0]  %s8360_s3, 128, %s481_s29, [#allocation42]  }
 0x135   :  { %s6924_s24 = scalar_lea.vmem %s500_s8, 1024  ;;  %p6929_p10 = scmp.lt.s32.totalorder %s500_s8, %s500_s8 }
 0x136   :  { %p6925_p9 = scmp.ne.s32.totalorder %s500_s8, %s6924_s24  ;;  %p6930_p11 = scmp.lt.s32.totalorder %s6924_s24, %s6924_s24 }
 0x138   :  { %p6931_p12 = por %p6930_p11, %p6929_p10 }
 0x13a   :  { %p6932_p13 = pnand %p6931_p12, %p6925_p9 }
 0x13c   :  { %6935 = shalt.err (!%p6932_p13)
}
 0x13d   :  { %505 = dma.hbm_to_vmem [thread:$0]  %s8370_s25, 1024, %s500_s8, [#allocation45], %s8143_s16, %s8143_s16, %s8144_s18  }
 0x13e   :  { %s8157_s14 = smov [#allocation47]   ;;  %s8158_s2 = smov [#allocation50]  }
 0x13f   :  { %s524_s1 = sshll.u32 %s8157_s14, 4  ;;  %s544_s0 = sshll.u32 %s8158_s2, 4  ;;  %s525_s1 = int_to_ptr.vmem [resolvable:$true] %s524_s1  ;;  %s545_s0 = int_to_ptr.vmem [resolvable:$true] %s544_s0 }
 0x140   :  { %s6944_s19 = scalar_lea.vmem %s525_s1, 128  ;;  %p6949_p1 = scmp.lt.s32.totalorder %s525_s1, %s525_s1 }
 0x141   :  { %p6945_p0 = scmp.ne.s32.totalorder %s525_s1, %s6944_s19  ;;  %p6950_p2 = scmp.lt.s32.totalorder %s6944_s19, %s6944_s19 }
 0x143   :  { %p6951_p3 = por %p6950_p2, %p6949_p1 }
 0x145   :  { %p6952_p4 = pnand %p6951_p3, %p6945_p0 }
 0x147   :  { %6955 = shalt.err (!%p6952_p4)
}
 0x148   :  { %s9338_s3 = sld [smem:[#allocation155_spill]]  ;;  %s6964_s30 = scalar_lea.vmem %s545_s0, 64 }
 0x149   :  { %p6965_p5 = scmp.ne.s32.totalorder %s545_s0, %s6964_s30  ;;  %p6969_p6 = scmp.lt.s32.totalorder %s545_s0, %s545_s0 }
 0x14a   :  { %p6970_p7 = scmp.lt.s32.totalorder %s6964_s30, %s6964_s30 }
 0x14c   :  { %p6971_p8 = por %p6970_p7, %p6969_p6 }
 0x14e   :  { %527 = dma.hbm_to_vmem [thread:$0]  %s9338_s3, 128, %s525_s1, [#allocation48]  }
 0x14f   :  { %p6972_p9 = pnand %p6971_p8, %p6965_p5 }
 0x151   :  { %6975 = shalt.err (!%p6972_p9)
}
 0x152   :  { %s9339_s25 = sld [smem:[#allocation157_spill]]  ;;  %s8159_s13 = smov [#allocation53]  }
 0x153   :  { %s563_s7 = sshll.u32 %s8159_s13, 4  ;;  %s8160_s21 = smov [#allocation56]   ;;  %s564_s7 = int_to_ptr.vmem [resolvable:$true] %s563_s7 }
 0x154   :  { %s586_s10 = sshll.u32 %s8160_s21, 4  ;;  %s6984_s20 = scalar_lea.vmem %s564_s7, 512  ;;  %s587_s10 = int_to_ptr.vmem [resolvable:$true] %s586_s10 }
 0x155   :  { %p6985_p10 = scmp.ne.s32.totalorder %s564_s7, %s6984_s20  ;;  %p6989_p11 = scmp.lt.s32.totalorder %s564_s7, %s564_s7 }
 0x156   :  { %p6990_p12 = scmp.lt.s32.totalorder %s6984_s20, %s6984_s20 }
 0x158   :  { %547 = dma.hbm_to_vmem [thread:$0]  %s9339_s25, 64, %s545_s0, [#allocation51]  }
 0x159   :  { %p6991_p13 = por %p6990_p12, %p6989_p11 }
 0x15b   :  { %p6992_p0 = pnand %p6991_p13, %p6985_p10 }
 0x15d   :  { %6995 = shalt.err (!%p6992_p0)
}
 0x15e   :  { %s9340_s4 = sld [smem:[#allocation159_spill]]  ;;  %s7004_s11 = scalar_lea.vmem %s587_s10, 64 }
 0x15f   :  { %p7005_p1 = scmp.ne.s32.totalorder %s587_s10, %s7004_s11  ;;  %p7009_p2 = scmp.lt.s32.totalorder %s587_s10, %s587_s10 }
 0x160   :  { %p7010_p3 = scmp.lt.s32.totalorder %s7004_s11, %s7004_s11 }
 0x162   :  { %p7011_p4 = por %p7010_p3, %p7009_p2 }
 0x164   :  { %569 = dma.hbm_to_vmem [thread:$0]  %s9340_s4, 512, %s564_s7, [#allocation54], %s8143_s16, %s8143_s16, %s8144_s18  }
 0x165   :  { %p7012_p5 = pnand %p7011_p4, %p7005_p1 }
 0x167   :  { %7015 = shalt.err (!%p7012_p5)
}
 0x168   :  { %s9341_s15 = sld [smem:[#allocation161_spill]]  ;;  %s8161_s22 = smov [#allocation59]  }
 0x169   :  { %s605_s23 = sshll.u32 %s8161_s22, 4  ;;  %s8162_s5 = smov [#allocation62]   ;;  %s606_s23 = int_to_ptr.vmem [resolvable:$true] %s605_s23 }
 0x16a   :  { %s630_s6 = sshll.u32 %s8162_s5, 4  ;;  %s7024_s29 = scalar_lea.vmem %s606_s23, 1024  ;;  %s631_s6 = int_to_ptr.vmem [resolvable:$true] %s630_s6 }
 0x16b   :  { %p7025_p6 = scmp.ne.s32.totalorder %s606_s23, %s7024_s29  ;;  %p7029_p7 = scmp.lt.s32.totalorder %s606_s23, %s606_s23 }
 0x16c   :  { %p7030_p8 = scmp.lt.s32.totalorder %s7024_s29, %s7024_s29 }
 0x16e   :  { %589 = dma.hbm_to_vmem [thread:$0]  %s9341_s15, 64, %s587_s10, [#allocation57]  }
 0x16f   :  { %p7031_p9 = por %p7030_p8, %p7029_p7 }
 0x171   :  { %p7032_p10 = pnand %p7031_p9, %p7025_p6 }
 0x173   :  { %7035 = shalt.err (!%p7032_p10)
}
 0x174   :  { %s9342_s26 = sld [smem:[#allocation163_spill]]  ;;  %s7044_s8 = scalar_lea.vmem %s631_s6, 128 }
 0x175   :  { %p7045_p11 = scmp.ne.s32.totalorder %s631_s6, %s7044_s8  ;;  %p7049_p12 = scmp.lt.s32.totalorder %s631_s6, %s631_s6 }
 0x176   :  { %p7050_p13 = scmp.lt.s32.totalorder %s7044_s8, %s7044_s8 }
 0x178   :  { %p7051_p0 = por %p7050_p13, %p7049_p12 }
 0x17a   :  { %611 = dma.hbm_to_vmem [thread:$0]  %s9342_s26, 1024, %s606_s23, [#allocation60], %s8143_s16, %s8143_s16, %s8144_s18  }
 0x17b   :  { %p7052_p1 = pnand %p7051_p0, %p7045_p11 }
 0x17d   :  { %7055 = shalt.err (!%p7052_p1)
}
 0x17e   :  { %s9343_s28 = sld [smem:[#allocation165_spill]]  ;;  %s8163_s24 = smov [#allocation65]  }
 0x17f   :  { %s649_s14 = sshll.u32 %s8163_s24, 4  ;;  %s650_s14 = int_to_ptr.vmem [resolvable:$true] %s649_s14 }
 0x180   :  { %s7064_s1 = scalar_lea.vmem %s650_s14, 768  ;;  %p7069_p3 = scmp.lt.s32.totalorder %s650_s14, %s650_s14 }
 0x181   :  { %p7065_p2 = scmp.ne.s32.totalorder %s650_s14, %s7064_s1  ;;  %p7070_p4 = scmp.lt.s32.totalorder %s7064_s1, %s7064_s1 }
 0x183   :  { %p7071_p5 = por %p7070_p4, %p7069_p3 }
 0x184   :  { %633 = dma.hbm_to_vmem [thread:$0]  %s9343_s28, 128, %s631_s6, [#allocation63]  }
 0x185   :  { %p7072_p6 = pnand %p7071_p5, %p7065_p2 }
 0x187   :  { %7075 = shalt.err (!%p7072_p6)
}
 0x188   :  { %s8164_s2 = smov 256   ;;  %s9344_s0 = sld [smem:[#allocation167_spill]] }
 0x189   :  { %s8165_s19 = smov 16   ;;  %s8166_s3 = smov [#allocation68]  }
 0x18a   :  { %s671_s30 = sshll.u32 %s8166_s3, 4  ;;  %s8167_s25 = smov [#allocation71]   ;;  %s672_s30 = int_to_ptr.vmem [resolvable:$true] %s671_s30 }
 0x18b   :  { %s693_s13 = sshll.u32 %s8167_s25, 4  ;;  %s7084_s7 = scalar_lea.vmem %s672_s30, 3072  ;;  %s694_s13 = int_to_ptr.vmem [resolvable:$true] %s693_s13 }
 0x18c   :  { %p7085_p7 = scmp.ne.s32.totalorder %s672_s30, %s7084_s7  ;;  %p7089_p8 = scmp.lt.s32.totalorder %s672_s30, %s672_s30 }
 0x18d   :  { %p7090_p9 = scmp.lt.s32.totalorder %s7084_s7, %s7084_s7 }
 0x18e   :  { %655 = dma.hbm_to_vmem [thread:$0]  %s9344_s0, 768, %s650_s14, [#allocation66], %s8164_s2, %s8164_s2, %s8165_s19  }
 0x18f   :  { %p7091_p10 = por %p7090_p9, %p7089_p8 }
 0x191   :  { %p7092_p11 = pnand %p7091_p10, %p7085_p7 }
 0x193   :  { %7095 = shalt.err (!%p7092_p11)
}
 0x194   :  { %s9345_s21 = sld [smem:[#allocation169_spill]]  ;;  %s7104_s10 = scalar_lea.vmem %s694_s13, 384 }
 0x195   :  { %p7105_p12 = scmp.ne.s32.totalorder %s694_s13, %s7104_s10  ;;  %p7109_p13 = scmp.lt.s32.totalorder %s694_s13, %s694_s13 }
 0x196   :  { %p7110_p0 = scmp.lt.s32.totalorder %s7104_s10, %s7104_s10 }
 0x198   :  { %p7111_p1 = por %p7110_p0, %p7109_p13 }
 0x19a   :  { %677 = dma.hbm_to_vmem [thread:$0]  %s9345_s21, 3072, %s672_s30, [#allocation69], %s8143_s16, %s8143_s16, %s8144_s18  }
 0x19b   :  { %p7112_p2 = pnand %p7111_p1, %p7105_p12 }
 0x19d   :  { %7115 = shalt.err (!%p7112_p2)
}
 0x19e   :  { %s9346_s20 = sld [smem:[#allocation171_spill]]  ;;  %s8168_s4 = smov [#allocation74]  }
 0x19f   :  { %s715_s11 = sshll.u32 %s8168_s4, 4  ;;  %s8169_s15 = smov [#allocation77]   ;;  %s716_s11 = int_to_ptr.vmem [resolvable:$true] %s715_s11 }
 0x1a0   :  { %s737_s22 = sshll.u32 %s8169_s15, 4  ;;  %s7124_s23 = scalar_lea.vmem %s716_s11, 1536  ;;  %s738_s22 = int_to_ptr.vmem [resolvable:$true] %s737_s22 }
 0x1a1   :  { %p7125_p3 = scmp.ne.s32.totalorder %s716_s11, %s7124_s23  ;;  %p7129_p4 = scmp.lt.s32.totalorder %s716_s11, %s716_s11 }
 0x1a2   :  { %p7130_p5 = scmp.lt.s32.totalorder %s7124_s23, %s7124_s23 }
 0x1a4   :  { %699 = dma.hbm_to_vmem [thread:$0]  %s9346_s20, 384, %s694_s13, [#allocation72], %s8143_s16, %s8143_s16, %s8144_s18  }
 0x1a5   :  { %p7131_p6 = por %p7130_p5, %p7129_p4 }
 0x1a7   :  { %p7132_p7 = pnand %p7131_p6, %p7125_p3 }
 0x1a9   :  { %7135 = shalt.err (!%p7132_p7)
}
 0x1aa   :  { %s9347_s5 = sld [smem:[#allocation173_spill]]  ;;  %s7144_s6 = scalar_lea.vmem %s738_s22, 384 }
 0x1ab   :  { %p7145_p8 = scmp.ne.s32.totalorder %s738_s22, %s7144_s6  ;;  %p7149_p9 = scmp.lt.s32.totalorder %s738_s22, %s738_s22 }
 0x1ac   :  { %p7150_p10 = scmp.lt.s32.totalorder %s7144_s6, %s7144_s6 }
 0x1ae   :  { %p7151_p11 = por %p7150_p10, %p7149_p9 }
 0x1b0   :  { %721 = dma.hbm_to_vmem [thread:$0]  %s9347_s5, 1536, %s716_s11, [#allocation75], %s8143_s16, %s8143_s16, %s8144_s18  }
 0x1b1   :  { %p7152_p12 = pnand %p7151_p11, %p7145_p8 }
 0x1b3   :  { %7155 = shalt.err (!%p7152_p12)
}
 0x1b4   :  { %s9348_s29 = sld [smem:[#allocation175_spill]]  ;;  %s8170_s26 = smov [#allocation80]  }
 0x1b5   :  { %s762_s8 = sshll.u32 %s8170_s26, 4  ;;  %s8171_s28 = smov [#allocation83]   ;;  %s763_s8 = int_to_ptr.vmem [resolvable:$true] %s762_s8 }
 0x1b6   :  { %s784_s24 = sshll.u32 %s8171_s28, 4  ;;  %s7164_s14 = scalar_lea.vmem %s763_s8, 16  ;;  %s785_s24 = int_to_ptr.vmem [resolvable:$true] %s784_s24 }
 0x1b7   :  { %p7165_p13 = scmp.ne.s32.totalorder %s763_s8, %s7164_s14  ;;  %s7168_s1 = scalar_lea.vmem %s763_s8, 32 }
 0x1b8   :  { %p7169_p0 = scmp.lt.s32.totalorder %s763_s8, %s763_s8  ;;  %p7170_p1 = scmp.lt.s32.totalorder %s7168_s1, %s7164_s14 }
 0x1ba   :  { %743 = dma.hbm_to_vmem [thread:$0]  %s9348_s29, 384, %s738_s22, [#allocation78], %s8143_s16, %s8143_s16, %s8144_s18  }
 0x1bb   :  { %p7171_p2 = por %p7170_p1, %p7169_p0 }
 0x1bd   :  { %p7172_p3 = pnand %p7171_p2, %p7165_p13 }
 0x1bf   :  { %7175 = shalt.err (!%p7172_p3)
}
 0x1c0   :  { %s9349_s0 = sld [smem:[#allocation178_spill]]  ;;  %s7184_s3 = scalar_lea.vmem %s785_s24, 16 }
 0x1c1   :  { %p7185_p4 = scmp.ne.s32.totalorder %s785_s24, %s7184_s3  ;;  %s7188_s30 = scalar_lea.vmem %s785_s24, 32 }
 0x1c2   :  { %p7189_p5 = scmp.lt.s32.totalorder %s785_s24, %s785_s24  ;;  %p7190_p6 = scmp.lt.s32.totalorder %s7188_s30, %s7184_s3 }
 0x1c4   :  { %p7191_p7 = por %p7190_p6, %p7189_p5 }
 0x1c6   :  { %765 = dma.hbm_to_vmem [thread:$0]  %s9349_s0, 16, %s763_s8, [#allocation81]  }
 0x1c7   :  { %p7192_p8 = pnand %p7191_p7, %p7185_p4 }
 0x1c9   :  { %7195 = shalt.err (!%p7192_p8)
}
 0x1ca   :  { %s9350_s25 = sld [smem:[#allocation180_spill]]  ;;  %s8172_s13 = smov [#allocation86]  }
 0x1cb   :  { %s805_s7 = sshll.u32 %s8172_s13, 4  ;;  %s8173_s21 = smov [#allocation89]   ;;  %s806_s7 = int_to_ptr.vmem [resolvable:$true] %s805_s7 }
 0x1cc   :  { %s827_s10 = sshll.u32 %s8173_s21, 4  ;;  %s7204_s20 = scalar_lea.vmem %s806_s7, 768  ;;  %s828_s10 = int_to_ptr.vmem [resolvable:$true] %s827_s10 }
 0x1cd   :  { %p7205_p9 = scmp.ne.s32.totalorder %s806_s7, %s7204_s20  ;;  %p7209_p10 = scmp.lt.s32.totalorder %s806_s7, %s806_s7 }
 0x1ce   :  { %p7210_p11 = scmp.lt.s32.totalorder %s7204_s20, %s7204_s20 }
 0x1d0   :  { %787 = dma.hbm_to_vmem [thread:$0]  %s9350_s25, 16, %s785_s24, [#allocation84]  }
 0x1d1   :  { %p7211_p12 = por %p7210_p11, %p7209_p10 }
 0x1d3   :  { %p7212_p13 = pnand %p7211_p12, %p7205_p9 }
 0x1d5   :  { %7215 = shalt.err (!%p7212_p13)
}
 0x1d6   :  { %s9351_s4 = sld [smem:[#allocation183_spill]]  ;;  %s7224_s11 = scalar_lea.vmem %s828_s10, 3072 }
 0x1d7   :  { %p7225_p0 = scmp.ne.s32.totalorder %s828_s10, %s7224_s11  ;;  %p7229_p1 = scmp.lt.s32.totalorder %s828_s10, %s828_s10 }
 0x1d8   :  { %p7230_p2 = scmp.lt.s32.totalorder %s7224_s11, %s7224_s11 }
 0x1da   :  { %p7231_p3 = por %p7230_p2, %p7229_p1 }
 0x1dc   :  { %811 = dma.hbm_to_vmem [thread:$0]  %s9351_s4, 768, %s806_s7, [#allocation87], %s8164_s2, %s8164_s2, %s8165_s19  }
 0x1dd   :  { %p7232_p4 = pnand %p7231_p3, %p7225_p0 }
 0x1df   :  { %7235 = shalt.err (!%p7232_p4)
}
 0x1e0   :  { %s9352_s15 = sld [smem:[#allocation185_spill]]  ;;  %s8174_s22 = smov [#allocation92]  }
 0x1e1   :  { %s849_s23 = sshll.u32 %s8174_s22, 4  ;;  %s8175_s5 = smov [#allocation95]   ;;  %s850_s23 = int_to_ptr.vmem [resolvable:$true] %s849_s23 }
 0x1e2   :  { %s874_s6 = sshll.u32 %s8175_s5, 4  ;;  %s7244_s29 = scalar_lea.vmem %s850_s23, 1024  ;;  %s875_s6 = int_to_ptr.vmem [resolvable:$true] %s874_s6 }
 0x1e3   :  { %p7245_p5 = scmp.ne.s32.totalorder %s850_s23, %s7244_s29  ;;  %p7249_p6 = scmp.lt.s32.totalorder %s850_s23, %s850_s23 }
 0x1e4   :  { %p7250_p7 = scmp.lt.s32.totalorder %s7244_s29, %s7244_s29 }
 0x1e6   :  { %833 = dma.hbm_to_vmem [thread:$0]  %s9352_s15, 3072, %s828_s10, [#allocation90], %s8143_s16, %s8143_s16, %s8144_s18  }
 0x1e7   :  { %p7251_p8 = por %p7250_p7, %p7249_p6 }
 0x1e9   :  { %p7252_p9 = pnand %p7251_p8, %p7245_p5 }
 0x1eb   :  { %7255 = shalt.err (!%p7252_p9)
}
 0x1ec   :  { %s9353_s2 = sld [smem:[#allocation187_spill]]  ;;  %s7264_s19 = scalar_lea.vmem %s875_s6, 128 }
 0x1ed   :  { %p7265_p10 = scmp.ne.s32.totalorder %s875_s6, %s7264_s19  ;;  %p7269_p11 = scmp.lt.s32.totalorder %s875_s6, %s875_s6 }
 0x1ee   :  { %p7270_p12 = scmp.lt.s32.totalorder %s7264_s19, %s7264_s19 }
 0x1f0   :  { %p7271_p13 = por %p7270_p12, %p7269_p11 }
 0x1f2   :  { %855 = dma.hbm_to_vmem [thread:$0]  %s9353_s2, 1024, %s850_s23, [#allocation93], %s8143_s16, %s8143_s16, %s8144_s18  }
 0x1f3   :  { %p7272_p0 = pnand %p7271_p13, %p7265_p10 }
 0x1f5   :  { %7275 = shalt.err (!%p7272_p0)
}
 0x1f6   :  { %s9354_s26 = sld [smem:[#allocation189_spill]]  ;;  %s8176_s8 = smov [#allocation98]  }
 0x1f7   :  { %s893_s28 = sshll.u32 %s8176_s8, 4  ;;  %s8177_s24 = smov [#allocation101]   ;;  %s894_s28 = int_to_ptr.vmem [resolvable:$true] %s893_s28 }
 0x1f8   :  { %s922_s14 = sshll.u32 %s8177_s24, 4  ;;  %s7284_s1 = scalar_lea.vmem %s894_s28, 1024  ;;  %s923_s14 = int_to_ptr.vmem [resolvable:$true] %s922_s14 }
 0x1f9   :  { %p7285_p1 = scmp.ne.s32.totalorder %s894_s28, %s7284_s1  ;;  %p7289_p2 = scmp.lt.s32.totalorder %s894_s28, %s894_s28 }
 0x1fa   :  { %p7290_p3 = scmp.lt.s32.totalorder %s7284_s1, %s7284_s1 }
 0x1fc   :  { %877 = dma.hbm_to_vmem [thread:$0]  %s9354_s26, 128, %s875_s6, [#allocation96]  }
 0x1fd   :  { %p7291_p4 = por %p7290_p3, %p7289_p2 }
 0x1ff   :  { %p7292_p5 = pnand %p7291_p4, %p7285_p1 }
 0x201   :  { %7295 = shalt.err (!%p7292_p5)
}
 0x202   :  { %s9355_s0 = sld [smem:[#allocation191_spill]]  ;;  %s7304_s3 = scalar_lea.vmem %s923_s14, 16 }
 0x203   :  { %p7305_p6 = scmp.ne.s32.totalorder %s923_s14, %s7304_s3  ;;  %s7308_s30 = scalar_lea.vmem %s923_s14, 32 }
 0x204   :  { %p7309_p7 = scmp.lt.s32.totalorder %s923_s14, %s923_s14  ;;  %p7310_p8 = scmp.lt.s32.totalorder %s7308_s30, %s7304_s3 }
 0x206   :  { %p7311_p9 = por %p7310_p8, %p7309_p7 }
 0x208   :  { %899 = dma.hbm_to_vmem [thread:$0]  %s9355_s0, 1024, %s894_s28, [#allocation99], %s8143_s16, %s8143_s16, %s8144_s18  }
 0x209   :  { %p7312_p10 = pnand %p7311_p9, %p7305_p6 }
 0x20b   :  { %7315 = shalt.err (!%p7312_p10)
}
 0x20c   :  { %s9356_s25 = sld [smem:[#allocation196_spill]]  ;;  %s8178_s13 = smov [#allocation3]  }
 0x20d   :  { %s201_s7 = sshll.u32 %s8178_s13, 4  ;;  %s8179_s21 = smov [#allocation7]   ;;  %s202_s7 = int_to_ptr.vmem [resolvable:$true] %s201_s7 }
 0x20e   :  { %s226_s10 = sshll.u32 %s8179_s21, 4  ;;  %s7324_s20 = scalar_lea.vmem %s202_s7, 1024  ;;  %s227_s10 = int_to_ptr.vmem [resolvable:$true] %s226_s10 }
 0x20f   :  { %p7325_p11 = scmp.ne.s32.totalorder %s202_s7, %s7324_s20  ;;  %p7329_p12 = scmp.lt.s32.totalorder %s202_s7, %s202_s7 }
 0x210   :  { %p7330_p13 = scmp.lt.s32.totalorder %s7324_s20, %s7324_s20 }
 0x212   :  { %925 = dma.hbm_to_vmem [thread:$0]  %s9356_s25, 16, %s923_s14, [#allocation102]  }
 0x213   :  { %p7331_p0 = por %p7330_p13, %p7329_p12 }
 0x215   :  { %p7332_p1 = pnand %p7331_p0, %p7325_p11 }
 0x217   :  { %7335 = shalt.err (!%p7332_p1)
}
 0x218   :  { %s9357_s4 = sld [smem:[#allocation139_spill]]  ;;  %s7344_s11 = scalar_lea.vmem %s227_s10, 128 }
 0x219   :  { %p7345_p2 = scmp.ne.s32.totalorder %s227_s10, %s7344_s11  ;;  %p7349_p3 = scmp.lt.s32.totalorder %s227_s10, %s227_s10 }
 0x21a   :  { %p7350_p4 = scmp.lt.s32.totalorder %s7344_s11, %s7344_s11 }
 0x21c   :  { %p7351_p5 = por %p7350_p4, %p7349_p3 }
 0x21e   :  { %207 = dma.hbm_to_vmem [thread:$0]  %s9357_s4, 1024, %s202_s7, [#allocation4], %s8143_s16, %s8143_s16, %s8144_s18  }
 0x21f   :  { %p7352_p6 = pnand %p7351_p5, %p7345_p2 }
 0x221   :  { %7355 = shalt.err (!%p7352_p6)
}
 0x222   :  { %s9358_s15 = sld [smem:[#allocation140_spill]]  ;;  %s8180_s22 = smov [#allocation10]  }
 0x223   :  { %s245_s23 = sshll.u32 %s8180_s22, 4  ;;  %s8181_s5 = smov [#allocation13]   ;;  %s246_s23 = int_to_ptr.vmem [resolvable:$true] %s245_s23 }
 0x224   :  { %s267_s6 = sshll.u32 %s8181_s5, 4  ;;  %s7364_s29 = scalar_lea.vmem %s246_s23, 256  ;;  %s268_s6 = int_to_ptr.vmem [resolvable:$true] %s267_s6 }
 0x225   :  { %p7365_p7 = scmp.ne.s32.totalorder %s246_s23, %s7364_s29  ;;  %p7369_p8 = scmp.lt.s32.totalorder %s246_s23, %s246_s23 }
 0x226   :  { %p7370_p9 = scmp.lt.s32.totalorder %s7364_s29, %s7364_s29 }
 0x228   :  { %229 = dma.hbm_to_vmem [thread:$0]  %s9358_s15, 128, %s227_s10, [#allocation6]  }
 0x229   :  { %p7371_p10 = por %p7370_p9, %p7369_p8 }
 0x22b   :  { %p7372_p11 = pnand %p7371_p10, %p7365_p7 }
 0x22d   :  { %7375 = shalt.err (!%p7372_p11)
}
 0x22e   :  { %s9359_s2 = sld [smem:[#allocation141_spill]]  ;;  %s7384_s19 = scalar_lea.vmem %s268_s6, 2048 }
 0x22f   :  { %p7385_p12 = scmp.ne.s32.totalorder %s268_s6, %s7384_s19  ;;  %p7389_p13 = scmp.lt.s32.totalorder %s268_s6, %s268_s6 }
 0x230   :  { %p7390_p0 = scmp.lt.s32.totalorder %s7384_s19, %s7384_s19 }
 0x232   :  { %p7391_p1 = por %p7390_p0, %p7389_p13 }
 0x234   :  { %251 = dma.hbm_to_vmem [thread:$0]  %s9359_s2, 256, %s246_s23, [#allocation9], %s8143_s16, %s8143_s16, %s8144_s18  }
 0x235   :  { %p7392_p2 = pnand %p7391_p1, %p7385_p12 }
 0x237   :  { %7395 = shalt.err (!%p7392_p2)
}
 0x238   :  { %s9360_s26 = sld [smem:[#allocation142_spill]]  ;;  %s8182_s8 = smov [#allocation16]  }
 0x239   :  { %s289_s28 = sshll.u32 %s8182_s8, 4  ;;  %s8183_s24 = smov [#allocation19]   ;;  %s290_s28 = int_to_ptr.vmem [resolvable:$true] %s289_s28 }
 0x23a   :  { %s311_s14 = sshll.u32 %s8183_s24, 4  ;;  %s7404_s1 = scalar_lea.vmem %s290_s28, 256  ;;  %s312_s14 = int_to_ptr.vmem [resolvable:$true] %s311_s14 }
 0x23b   :  { %p7405_p3 = scmp.ne.s32.totalorder %s290_s28, %s7404_s1  ;;  %p7409_p4 = scmp.lt.s32.totalorder %s290_s28, %s290_s28 }
 0x23c   :  { %p7410_p5 = scmp.lt.s32.totalorder %s7404_s1, %s7404_s1 }
 0x23e   :  { %273 = dma.hbm_to_vmem [thread:$0]  %s9360_s26, 2048, %s268_s6, [#allocation12], %s8143_s16, %s8143_s16, %s8144_s18  }
 0x23f   :  { %p7411_p6 = por %p7410_p5, %p7409_p4 }
 0x241   :  { %p7412_p7 = pnand %p7411_p6, %p7405_p3 }
 0x243   :  { %7415 = shalt.err (!%p7412_p7)
}
 0x244   :  { %s9361_s0 = sld [smem:[#allocation143_spill]]  ;;  %s7424_s3 = scalar_lea.vmem %s312_s14, 2048 }
 0x245   :  { %p7425_p8 = scmp.ne.s32.totalorder %s312_s14, %s7424_s3  ;;  %p7429_p9 = scmp.lt.s32.totalorder %s312_s14, %s312_s14 }
 0x246   :  { %p7430_p10 = scmp.lt.s32.totalorder %s7424_s3, %s7424_s3 }
 0x248   :  { %p7431_p11 = por %p7430_p10, %p7429_p9 }
 0x24a   :  { %295 = dma.hbm_to_vmem [thread:$0]  %s9361_s0, 256, %s290_s28, [#allocation15], %s8143_s16, %s8143_s16, %s8144_s18  }
 0x24b   :  { %p7432_p12 = pnand %p7431_p11, %p7425_p8 }
 0x24d   :  { %7435 = shalt.err (!%p7432_p12)
}
 0x24e   :  { %s9362_s30 = sld [smem:[#allocation144_spill]]  ;;  %s8184_s25 = smov [#allocation22]  }
 0x24f   :  { %s333_s13 = sshll.u32 %s8184_s25, 4  ;;  %s8185_s7 = smov [#allocation25]   ;;  %s334_s13 = int_to_ptr.vmem [resolvable:$true] %s333_s13 }
 0x250   :  { %s358_s21 = sshll.u32 %s8185_s7, 4  ;;  %s7444_s10 = scalar_lea.vmem %s334_s13, 256  ;;  %s359_s21 = int_to_ptr.vmem [resolvable:$true] %s358_s21 }
 0x251   :  { %p7445_p13 = scmp.ne.s32.totalorder %s334_s13, %s7444_s10  ;;  %p7449_p0 = scmp.lt.s32.totalorder %s334_s13, %s334_s13 }
 0x252   :  { %p7450_p1 = scmp.lt.s32.totalorder %s7444_s10, %s7444_s10 }
 0x254   :  { %317 = dma.hbm_to_vmem [thread:$0]  %s9362_s30, 2048, %s312_s14, [#allocation18], %s8143_s16, %s8143_s16, %s8144_s18  }
 0x255   :  { %p7451_p2 = por %p7450_p1, %p7449_p0 }
 0x257   :  { %p7452_p3 = pnand %p7451_p2, %p7445_p13 }
 0x259   :  { %7455 = shalt.err (!%p7452_p3)
}
 0x25a   :  { %s9363_s20 = sld [smem:[#allocation145_spill]]  ;;  %s7464_s4 = scalar_lea.vmem %s359_s21, 16 }
 0x25b   :  { %p7465_p4 = scmp.ne.s32.totalorder %s359_s21, %s7464_s4  ;;  %s7468_s11 = scalar_lea.vmem %s359_s21, 32 }
 0x25c   :  { %p7469_p5 = scmp.lt.s32.totalorder %s359_s21, %s359_s21  ;;  %p7470_p6 = scmp.lt.s32.totalorder %s7468_s11, %s7464_s4 }
 0x25e   :  { %p7471_p7 = por %p7470_p6, %p7469_p5 }
 0x260   :  { %339 = dma.hbm_to_vmem [thread:$0]  %s9363_s20, 256, %s334_s13, [#allocation21], %s8143_s16, %s8143_s16, %s8144_s18  }
 0x261   :  { %p7472_p8 = pnand %p7471_p7, %p7465_p4 }
 0x263   :  { %7475 = shalt.err (!%p7472_p8)
}
 0x264   :  { %s9364_s15 = sld [smem:[#allocation147_spill]]  ;;  %s8186_s22 = smov [#allocation28]  }
 0x265   :  { %s380_s23 = sshll.u32 %s8186_s22, 4  ;;  %s8187_s5 = smov [#allocation31]   ;;  %s381_s23 = int_to_ptr.vmem [resolvable:$true] %s380_s23 }
 0x266   :  { %s402_s6 = sshll.u32 %s8187_s5, 4  ;;  %s7484_s29 = scalar_lea.vmem %s381_s23, 16  ;;  %s403_s6 = int_to_ptr.vmem [resolvable:$true] %s402_s6 }
 0x267   :  { %p7485_p9 = scmp.ne.s32.totalorder %s381_s23, %s7484_s29  ;;  %s7488_s2 = scalar_lea.vmem %s381_s23, 32 }
 0x268   :  { %p7489_p10 = scmp.lt.s32.totalorder %s381_s23, %s381_s23  ;;  %p7490_p11 = scmp.lt.s32.totalorder %s7488_s2, %s7484_s29 }
 0x26a   :  { %361 = dma.hbm_to_vmem [thread:$0]  %s9364_s15, 16, %s359_s21, [#allocation24]  }
 0x26b   :  { %p7491_p12 = por %p7490_p11, %p7489_p10 }
 0x26d   :  { %p7492_p13 = pnand %p7491_p12, %p7485_p9 }
 0x26f   :  { %7495 = shalt.err (!%p7492_p13)
}
 0x270   :  { %s9365_s19 = sld [smem:[#allocation148_spill]]  ;;  %s7504_s26 = scalar_lea.vmem %s403_s6, 16 }
 0x271   :  { %p7505_p0 = scmp.ne.s32.totalorder %s403_s6, %s7504_s26  ;;  %s7508_s8 = scalar_lea.vmem %s403_s6, 32 }
 0x272   :  { %p7509_p1 = scmp.lt.s32.totalorder %s403_s6, %s403_s6  ;;  %p7510_p2 = scmp.lt.s32.totalorder %s7508_s8, %s7504_s26 }
 0x274   :  { %p7511_p3 = por %p7510_p2, %p7509_p1 }
 0x276   :  { %383 = dma.hbm_to_vmem [thread:$0]  %s9365_s19, 16, %s381_s23, [#allocation27]  }
 0x277   :  { %p7512_p4 = pnand %p7511_p3, %p7505_p0 }
 0x279   :  { %7515 = shalt.err (!%p7512_p4)
}
 0x27a   :  { %s9366_s28 = sld [smem:[#allocation149_spill]]  ;;  %s8188_s24 = smov [#allocation34]  }
 0x27b   :  { %s424_s14 = sshll.u32 %s8188_s24, 4  ;;  %s8189_s1 = smov [#allocation37]   ;;  %s425_s14 = int_to_ptr.vmem [resolvable:$true] %s424_s14 }
 0x27c   :  { %s446_s0 = sshll.u32 %s8189_s1, 4  ;;  %s7524_s3 = scalar_lea.vmem %s425_s14, 16  ;;  %s447_s0 = int_to_ptr.vmem [resolvable:$true] %s446_s0 }
 0x27d   :  { %p7525_p5 = scmp.ne.s32.totalorder %s425_s14, %s7524_s3  ;;  %s7528_s30 = scalar_lea.vmem %s425_s14, 32 }
 0x27e   :  { %p7529_p6 = scmp.lt.s32.totalorder %s425_s14, %s425_s14  ;;  %p7530_p7 = scmp.lt.s32.totalorder %s7528_s30, %s7524_s3 }
 0x280   :  { %405 = dma.hbm_to_vmem [thread:$0]  %s9366_s28, 16, %s403_s6, [#allocation30]  }
 0x281   :  { %p7531_p8 = por %p7530_p7, %p7529_p6 }
 0x283   :  { %p7532_p9 = pnand %p7531_p8, %p7525_p5 }
 0x285   :  { %7535 = shalt.err (!%p7532_p9)
}
 0x286   :  { %s9367_s25 = sld [smem:[#allocation150_spill]]  ;;  %s7544_s13 = scalar_lea.vmem %s447_s0, 16 }
 0x287   :  { %p7545_p10 = scmp.ne.s32.totalorder %s447_s0, %s7544_s13  ;;  %s7548_s7 = scalar_lea.vmem %s447_s0, 32 }
 0x288   :  { %p7549_p11 = scmp.lt.s32.totalorder %s447_s0, %s447_s0  ;;  %p7550_p12 = scmp.lt.s32.totalorder %s7548_s7, %s7544_s13 }
 0x28a   :  { %p7551_p13 = por %p7550_p12, %p7549_p11 }
 0x28c   :  { %427 = dma.hbm_to_vmem [thread:$0]  %s9367_s25, 16, %s425_s14, [#allocation33]  }
 0x28d   :  { %p7552_p0 = pnand %p7551_p13, %p7545_p10 }
 0x28f   :  { %7555 = shalt.err (!%p7552_p0)
}
 0x290   :  { %s9368_s21 = sld [smem:[#allocation151_spill]]  ;;  %s8190_s10 = smov [#allocation40]  }
 0x291   :  { %s467_s20 = sshll.u32 %s8190_s10, 4  ;;  %s8191_s4 = smov [#allocation43]   ;;  %s468_s20 = int_to_ptr.vmem [resolvable:$true] %s467_s20 }
 0x292   :  { %s490_s11 = sshll.u32 %s8191_s4, 4  ;;  %s7564_s15 = scalar_lea.vmem %s468_s20, 1024  ;;  %s491_s11 = int_to_ptr.vmem [resolvable:$true] %s490_s11 }
 0x293   :  { %p7565_p1 = scmp.ne.s32.totalorder %s468_s20, %s7564_s15  ;;  %p7569_p2 = scmp.lt.s32.totalorder %s468_s20, %s468_s20 }
 0x294   :  { %p7570_p3 = scmp.lt.s32.totalorder %s7564_s15, %s7564_s15 }
 0x296   :  { %449 = dma.hbm_to_vmem [thread:$0]  %s9368_s21, 16, %s447_s0, [#allocation36]  }
 0x297   :  { %p7571_p4 = por %p7570_p3, %p7569_p2 }
 0x299   :  { %p7572_p5 = pnand %p7571_p4, %p7565_p1 }
 0x29b   :  { %7575 = shalt.err (!%p7572_p5)
}
 0x29c   :  { %s9369_s22 = sld [smem:[#allocation152_spill]]  ;;  %s7584_s23 = scalar_lea.vmem %s491_s11, 128 }
 0x29d   :  { %p7585_p6 = scmp.ne.s32.totalorder %s491_s11, %s7584_s23  ;;  %p7589_p7 = scmp.lt.s32.totalorder %s491_s11, %s491_s11 }
 0x29e   :  { %p7590_p8 = scmp.lt.s32.totalorder %s7584_s23, %s7584_s23 }
 0x2a0   :  { %p7591_p9 = por %p7590_p8, %p7589_p7 }
 0x2a2   :  { %473 = dma.hbm_to_vmem [thread:$0]  %s9369_s22, 1024, %s468_s20, [#allocation39], %s8143_s16, %s8143_s16, %s8144_s18  }
 0x2a3   :  { %p7592_p10 = pnand %p7591_p9, %p7585_p6 }
 0x2a5   :  { %7595 = shalt.err (!%p7592_p10)
}
 0x2a6   :  { %s9370_s5 = sld [smem:[#allocation153_spill]]  ;;  %s8192_s6 = smov [#allocation46]  }
 0x2a7   :  { %s511_s29 = sshll.u32 %s8192_s6, 4  ;;  %s8193_s2 = smov [#allocation49]   ;;  %s512_s29 = int_to_ptr.vmem [resolvable:$true] %s511_s29 }
 0x2a8   :  { %s534_s19 = sshll.u32 %s8193_s2, 4  ;;  %s7604_s26 = scalar_lea.vmem %s512_s29, 1024  ;;  %s535_s19 = int_to_ptr.vmem [resolvable:$true] %s534_s19 }
 0x2a9   :  { %p7605_p11 = scmp.ne.s32.totalorder %s512_s29, %s7604_s26  ;;  %p7609_p12 = scmp.lt.s32.totalorder %s512_s29, %s512_s29 }
 0x2aa   :  { %p7610_p13 = scmp.lt.s32.totalorder %s7604_s26, %s7604_s26 }
 0x2ac   :  { %493 = dma.hbm_to_vmem [thread:$0]  %s9370_s5, 128, %s491_s11, [#allocation42]  }
 0x2ad   :  { %p7611_p0 = por %p7610_p13, %p7609_p12 }
 0x2af   :  { %p7612_p1 = pnand %p7611_p0, %p7605_p11 }
 0x2b1   :  { %7615 = shalt.err (!%p7612_p1)
}
 0x2b2   :  { %s9371_s8 = sld [smem:[#allocation154_spill]]  ;;  %s7624_s28 = scalar_lea.vmem %s535_s19, 128 }
 0x2b3   :  { %p7625_p2 = scmp.ne.s32.totalorder %s535_s19, %s7624_s28  ;;  %p7629_p3 = scmp.lt.s32.totalorder %s535_s19, %s535_s19 }
 0x2b4   :  { %p7630_p4 = scmp.lt.s32.totalorder %s7624_s28, %s7624_s28 }
 0x2b6   :  { %p7631_p5 = por %p7630_p4, %p7629_p3 }
 0x2b8   :  { %517 = dma.hbm_to_vmem [thread:$0]  %s9371_s8, 1024, %s512_s29, [#allocation45], %s8143_s16, %s8143_s16, %s8144_s18  }
 0x2b9   :  { %p7632_p6 = pnand %p7631_p5, %p7625_p2 }
 0x2bb   :  { %7635 = shalt.err (!%p7632_p6)
}
 0x2bc   :  { %s9372_s24 = sld [smem:[#allocation156_spill]]  ;;  %s8194_s14 = smov [#allocation52]  }
 0x2bd   :  { %s554_s1 = sshll.u32 %s8194_s14, 4  ;;  %s8195_s0 = smov [#allocation55]   ;;  %s555_s1 = int_to_ptr.vmem [resolvable:$true] %s554_s1 }
 0x2be   :  { %s576_s3 = sshll.u32 %s8195_s0, 4  ;;  %s7644_s30 = scalar_lea.vmem %s555_s1, 16  ;;  %s577_s3 = int_to_ptr.vmem [resolvable:$true] %s576_s3 }
 0x2bf   :  { %p7645_p7 = scmp.ne.s32.totalorder %s555_s1, %s7644_s30  ;;  %s7648_s25 = scalar_lea.vmem %s555_s1, 32 }
 0x2c0   :  { %p7649_p8 = scmp.lt.s32.totalorder %s555_s1, %s555_s1  ;;  %p7650_p9 = scmp.lt.s32.totalorder %s7648_s25, %s7644_s30 }
 0x2c2   :  { %537 = dma.hbm_to_vmem [thread:$0]  %s9372_s24, 128, %s535_s19, [#allocation48]  }
 0x2c3   :  { %p7651_p10 = por %p7650_p9, %p7649_p8 }
 0x2c5   :  { %p7652_p11 = pnand %p7651_p10, %p7645_p7 }
 0x2c7   :  { %7655 = shalt.err (!%p7652_p11)
}
 0x2c8   :  { %s9373_s13 = sld [smem:[#allocation158_spill]]  ;;  %s7664_s7 = scalar_lea.vmem %s577_s3, 16 }
 0x2c9   :  { %p7665_p12 = scmp.ne.s32.totalorder %s577_s3, %s7664_s7  ;;  %s7668_s21 = scalar_lea.vmem %s577_s3, 32 }
 0x2ca   :  { %p7669_p13 = scmp.lt.s32.totalorder %s577_s3, %s577_s3  ;;  %p7670_p0 = scmp.lt.s32.totalorder %s7668_s21, %s7664_s7 }
 0x2cc   :  { %p7671_p1 = por %p7670_p0, %p7669_p13 }
 0x2ce   :  { %557 = dma.hbm_to_vmem [thread:$0]  %s9373_s13, 16, %s555_s1, [#allocation51]  }
 0x2cf   :  { %p7672_p2 = pnand %p7671_p1, %p7665_p12 }
 0x2d1   :  { %7675 = shalt.err (!%p7672_p2)
}
 0x2d2   :  { %s9374_s10 = sld [smem:[#allocation160_spill]]  ;;  %s8196_s20 = smov [#allocation58]  }
 0x2d3   :  { %s596_s4 = sshll.u32 %s8196_s20, 4  ;;  %s8197_s11 = smov [#allocation61]   ;;  %s597_s4 = int_to_ptr.vmem [resolvable:$true] %s596_s4 }
 0x2d4   :  { %s617_s15 = sshll.u32 %s8197_s11, 4  ;;  %s7684_s22 = scalar_lea.vmem %s597_s4, 16  ;;  %s618_s15 = int_to_ptr.vmem [resolvable:$true] %s617_s15 }
 0x2d5   :  { %p7685_p3 = scmp.ne.s32.totalorder %s597_s4, %s7684_s22  ;;  %s7688_s23 = scalar_lea.vmem %s597_s4, 32 }
 0x2d6   :  { %p7689_p4 = scmp.lt.s32.totalorder %s597_s4, %s597_s4  ;;  %p7690_p5 = scmp.lt.s32.totalorder %s7688_s23, %s7684_s22 }
 0x2d8   :  { %579 = dma.hbm_to_vmem [thread:$0]  %s9374_s10, 16, %s577_s3, [#allocation54]  }
 0x2d9   :  { %p7691_p6 = por %p7690_p5, %p7689_p4 }
 0x2db   :  { %p7692_p7 = pnand %p7691_p6, %p7685_p3 }
 0x2dd   :  { %7695 = shalt.err (!%p7692_p7)
}
 0x2de   :  { %s9375_s5 = sld [smem:[#allocation162_spill]]  ;;  %s7704_s6 = scalar_lea.vmem %s618_s15, 1024 }
 0x2df   :  { %p7705_p8 = scmp.ne.s32.totalorder %s618_s15, %s7704_s6  ;;  %p7709_p9 = scmp.lt.s32.totalorder %s618_s15, %s618_s15 }
 0x2e0   :  { %p7710_p10 = scmp.lt.s32.totalorder %s7704_s6, %s7704_s6 }
 0x2e2   :  { %p7711_p11 = por %p7710_p10, %p7709_p9 }
 0x2e4   :  { %599 = dma.hbm_to_vmem [thread:$0]  %s9375_s5, 16, %s597_s4, [#allocation57]  }
 0x2e5   :  { %p7712_p12 = pnand %p7711_p11, %p7705_p8 }
 0x2e7   :  { %7715 = shalt.err (!%p7712_p12)
}
 0x2e8   :  { %s9376_s29 = sld [smem:[#allocation164_spill]]  ;;  %s8198_s2 = smov [#allocation64]  }
 0x2e9   :  { %s640_s19 = sshll.u32 %s8198_s2, 4  ;;  %s8199_s26 = smov [#allocation67]   ;;  %s641_s19 = int_to_ptr.vmem [resolvable:$true] %s640_s19 }
 0x2ea   :  { %s662_s8 = sshll.u32 %s8199_s26, 4  ;;  %s7724_s28 = scalar_lea.vmem %s641_s19, 128  ;;  %s663_s8 = int_to_ptr.vmem [resolvable:$true] %s662_s8 }
 0x2eb   :  { %p7725_p13 = scmp.ne.s32.totalorder %s641_s19, %s7724_s28  ;;  %p7729_p0 = scmp.lt.s32.totalorder %s641_s19, %s641_s19 }
 0x2ec   :  { %p7730_p1 = scmp.lt.s32.totalorder %s7724_s28, %s7724_s28 }
 0x2ee   :  { %623 = dma.hbm_to_vmem [thread:$0]  %s9376_s29, 1024, %s618_s15, [#allocation60], %s8143_s16, %s8143_s16, %s8144_s18  }
 0x2ef   :  { %p7731_p2 = por %p7730_p1, %p7729_p0 }
 0x2f1   :  { %p7732_p3 = pnand %p7731_p2, %p7725_p13 }
 0x2f3   :  { %7735 = shalt.err (!%p7732_p3)
}
 0x2f4   :  { %s9377_s24 = sld [smem:[#allocation166_spill]]  ;;  %s7744_s14 = scalar_lea.vmem %s663_s8, 32 }
 0x2f5   :  { %p7745_p4 = scmp.ne.s32.totalorder %s663_s8, %s7744_s14  ;;  %p7749_p5 = scmp.lt.s32.totalorder %s663_s8, %s663_s8 }
 0x2f6   :  { %p7750_p6 = scmp.lt.s32.totalorder %s7744_s14, %s7744_s14 }
 0x2f8   :  { %p7751_p7 = por %p7750_p6, %p7749_p5 }
 0x2fa   :  { %643 = dma.hbm_to_vmem [thread:$0]  %s9377_s24, 128, %s641_s19, [#allocation63]  }
 0x2fb   :  { %p7752_p8 = pnand %p7751_p7, %p7745_p4 }
 0x2fd   :  { %7755 = shalt.err (!%p7752_p8)
}
 0x2fe   :  { %s9378_s1 = sld [smem:[#allocation168_spill]]  ;;  %s8200_s0 = smov [#allocation70]  }
 0x2ff   :  { %s684_s3 = sshll.u32 %s8200_s0, 4  ;;  %s8201_s30 = smov [#allocation73]   ;;  %s685_s3 = int_to_ptr.vmem [resolvable:$true] %s684_s3 }
 0x300   :  { %s706_s25 = sshll.u32 %s8201_s30, 4  ;;  %s7764_s13 = scalar_lea.vmem %s685_s3, 16  ;;  %s707_s25 = int_to_ptr.vmem [resolvable:$true] %s706_s25 }
 0x301   :  { %p7765_p9 = scmp.ne.s32.totalorder %s685_s3, %s7764_s13  ;;  %s7768_s7 = scalar_lea.vmem %s685_s3, 32 }
 0x302   :  { %p7769_p10 = scmp.lt.s32.totalorder %s685_s3, %s685_s3  ;;  %p7770_p11 = scmp.lt.s32.totalorder %s7768_s7, %s7764_s13 }
 0x304   :  { %665 = dma.hbm_to_vmem [thread:$0]  %s9378_s1, 32, %s663_s8, [#allocation66]  }
 0x305   :  { %p7771_p12 = por %p7770_p11, %p7769_p10 }
 0x307   :  { %p7772_p13 = pnand %p7771_p12, %p7765_p9 }
 0x309   :  { %7775 = shalt.err (!%p7772_p13)
}
 0x30a   :  { %s9379_s21 = sld [smem:[#allocation170_spill]]  ;;  %s7784_s10 = scalar_lea.vmem %s707_s25, 16 }
 0x30b   :  { %p7785_p0 = scmp.ne.s32.totalorder %s707_s25, %s7784_s10  ;;  %s7788_s20 = scalar_lea.vmem %s707_s25, 32 }
 0x30c   :  { %p7789_p1 = scmp.lt.s32.totalorder %s707_s25, %s707_s25  ;;  %p7790_p2 = scmp.lt.s32.totalorder %s7788_s20, %s7784_s10 }
 0x30e   :  { %p7791_p3 = por %p7790_p2, %p7789_p1 }
 0x310   :  { %687 = dma.hbm_to_vmem [thread:$0]  %s9379_s21, 16, %s685_s3, [#allocation69]  }
 0x311   :  { %p7792_p4 = pnand %p7791_p3, %p7785_p0 }
 0x313   :  { %7795 = shalt.err (!%p7792_p4)
}
 0x314   :  { %s9380_s4 = sld [smem:[#allocation172_spill]]  ;;  %s8202_s11 = smov [#allocation76]  }
 0x315   :  { %s728_s15 = sshll.u32 %s8202_s11, 4  ;;  %s8203_s22 = smov [#allocation79]   ;;  %s729_s15 = int_to_ptr.vmem [resolvable:$true] %s728_s15 }
 0x316   :  { %s752_s23 = sshll.u32 %s8203_s22, 4  ;;  %s7804_s5 = scalar_lea.vmem %s729_s15, 16  ;;  %s753_s23 = int_to_ptr.vmem [resolvable:$true] %s752_s23 }
 0x317   :  { %p7805_p5 = scmp.ne.s32.totalorder %s729_s15, %s7804_s5  ;;  %s7808_s6 = scalar_lea.vmem %s729_s15, 32 }
 0x318   :  { %p7809_p6 = scmp.lt.s32.totalorder %s729_s15, %s729_s15  ;;  %p7810_p7 = scmp.lt.s32.totalorder %s7808_s6, %s7804_s5 }
 0x31a   :  { %709 = dma.hbm_to_vmem [thread:$0]  %s9380_s4, 16, %s707_s25, [#allocation72]  }
 0x31b   :  { %p7811_p8 = por %p7810_p7, %p7809_p6 }
 0x31d   :  { %p7812_p9 = pnand %p7811_p8, %p7805_p5 }
 0x31f   :  { %7815 = shalt.err (!%p7812_p9)
}
 0x320   :  { %s9381_s29 = sld [smem:[#allocation174_spill]]  ;;  %s7824_s2 = scalar_lea.vmem %s753_s23, 64 }
 0x321   :  { %p7825_p10 = scmp.ne.s32.totalorder %s753_s23, %s7824_s2  ;;  %p7829_p11 = scmp.lt.s32.totalorder %s753_s23, %s753_s23 }
 0x322   :  { %p7830_p12 = scmp.lt.s32.totalorder %s7824_s2, %s7824_s2 }
 0x324   :  { %p7831_p13 = por %p7830_p12, %p7829_p11 }
 0x326   :  { %731 = dma.hbm_to_vmem [thread:$0]  %s9381_s29, 16, %s729_s15, [#allocation75]  }
 0x327   :  { %p7832_p0 = pnand %p7831_p13, %p7825_p10 }
 0x329   :  { %7835 = shalt.err (!%p7832_p0)
}
 0x32a   :  { %s9382_s19 = sld [smem:[#allocation177_spill]]  ;;  %s8204_s26 = smov [#allocation82]  }
 0x32b   :  { %s771_s8 = sshll.u32 %s8204_s26, 4  ;;  %s8205_s28 = smov [#allocation85]   ;;  %s772_s8 = int_to_ptr.vmem [resolvable:$true] %s771_s8 }
 0x32c   :  { %s796_s24 = sshll.u32 %s8205_s28, 4  ;;  %s7844_s14 = scalar_lea.vmem %s772_s8, 384  ;;  %s797_s24 = int_to_ptr.vmem [resolvable:$true] %s796_s24 }
 0x32d   :  { %p7845_p1 = scmp.ne.s32.totalorder %s772_s8, %s7844_s14  ;;  %p7849_p2 = scmp.lt.s32.totalorder %s772_s8, %s772_s8 }
 0x32e   :  { %p7850_p3 = scmp.lt.s32.totalorder %s7844_s14, %s7844_s14 }
 0x330   :  { %755 = dma.hbm_to_vmem [thread:$0]  %s9382_s19, 64, %s753_s23, [#allocation78]  }
 0x331   :  { %p7851_p4 = por %p7850_p3, %p7849_p2 }
 0x333   :  { %p7852_p5 = pnand %p7851_p4, %p7845_p1 }
 0x335   :  { %7855 = shalt.err (!%p7852_p5)
}
 0x336   :  { %s9383_s1 = sld [smem:[#allocation179_spill]]  ;;  %s7864_s0 = scalar_lea.vmem %s797_s24, 16 }
 0x337   :  { %p7865_p6 = scmp.ne.s32.totalorder %s797_s24, %s7864_s0  ;;  %s7868_s3 = scalar_lea.vmem %s797_s24, 32 }
 0x338   :  { %p7869_p7 = scmp.lt.s32.totalorder %s797_s24, %s797_s24  ;;  %p7870_p8 = scmp.lt.s32.totalorder %s7868_s3, %s7864_s0 }
 0x33a   :  { %p7871_p9 = por %p7870_p8, %p7869_p7 }
 0x33c   :  { %777 = dma.hbm_to_vmem [thread:$0]  %s9383_s1, 384, %s772_s8, [#allocation81], %s8143_s16, %s8143_s16, %s8144_s18  }
 0x33d   :  { %p7872_p10 = pnand %p7871_p9, %p7865_p6 }
 0x33f   :  { %7875 = shalt.err (!%p7872_p10)
}
 0x340   :  { %s9384_s30 = sld [smem:[#allocation182_spill]]  ;;  %s8206_s25 = smov [#allocation88]  }
 0x341   :  { %s818_s13 = sshll.u32 %s8206_s25, 4  ;;  %s8207_s7 = smov [#allocation91]   ;;  %s819_s13 = int_to_ptr.vmem [resolvable:$true] %s818_s13 }
 0x342   :  { %s840_s21 = sshll.u32 %s8207_s7, 4  ;;  %s7884_s10 = scalar_lea.vmem %s819_s13, 32  ;;  %s841_s21 = int_to_ptr.vmem [resolvable:$true] %s840_s21 }
 0x343   :  { %p7885_p11 = scmp.ne.s32.totalorder %s819_s13, %s7884_s10  ;;  %p7889_p12 = scmp.lt.s32.totalorder %s819_s13, %s819_s13 }
 0x344   :  { %p7890_p13 = scmp.lt.s32.totalorder %s7884_s10, %s7884_s10 }
 0x346   :  { %799 = dma.hbm_to_vmem [thread:$0]  %s9384_s30, 16, %s797_s24, [#allocation84]  }
 0x347   :  { %p7891_p0 = por %p7890_p13, %p7889_p12 }
 0x349   :  { %p7892_p1 = pnand %p7891_p0, %p7885_p11 }
 0x34b   :  { %7895 = shalt.err (!%p7892_p1)
}
 0x34c   :  { %s9385_s20 = sld [smem:[#allocation184_spill]]  ;;  %s7904_s4 = scalar_lea.vmem %s841_s21, 16 }
 0x34d   :  { %p7905_p2 = scmp.ne.s32.totalorder %s841_s21, %s7904_s4  ;;  %s7908_s11 = scalar_lea.vmem %s841_s21, 32 }
 0x34e   :  { %p7909_p3 = scmp.lt.s32.totalorder %s841_s21, %s841_s21  ;;  %p7910_p4 = scmp.lt.s32.totalorder %s7908_s11, %s7904_s4 }
 0x350   :  { %p7911_p5 = por %p7910_p4, %p7909_p3 }
 0x352   :  { %821 = dma.hbm_to_vmem [thread:$0]  %s9385_s20, 32, %s819_s13, [#allocation87]  }
 0x353   :  { %p7912_p6 = pnand %p7911_p5, %p7905_p2 }
 0x355   :  { %7915 = shalt.err (!%p7912_p6)
}
 0x356   :  { %s9386_s15 = sld [smem:[#allocation186_spill]]  ;;  %s8208_s22 = smov [#allocation94]  }
 0x357   :  { %s861_s23 = sshll.u32 %s8208_s22, 4  ;;  %s8209_s5 = smov [#allocation97]   ;;  %s862_s23 = int_to_ptr.vmem [resolvable:$true] %s861_s23 }
 0x358   :  { %s884_s6 = sshll.u32 %s8209_s5, 4  ;;  %s7924_s29 = scalar_lea.vmem %s862_s23, 1024  ;;  %s885_s6 = int_to_ptr.vmem [resolvable:$true] %s884_s6 }
 0x359   :  { %p7925_p7 = scmp.ne.s32.totalorder %s862_s23, %s7924_s29  ;;  %p7929_p8 = scmp.lt.s32.totalorder %s862_s23, %s862_s23 }
 0x35a   :  { %p7930_p9 = scmp.lt.s32.totalorder %s7924_s29, %s7924_s29 }
 0x35c   :  { %843 = dma.hbm_to_vmem [thread:$0]  %s9386_s15, 16, %s841_s21, [#allocation90]  }
 0x35d   :  { %p7931_p10 = por %p7930_p9, %p7929_p8 }
 0x35f   :  { %p7932_p11 = pnand %p7931_p10, %p7925_p7 }
 0x361   :  { %7935 = shalt.err (!%p7932_p11)
}
 0x362   :  { %s9387_s2 = sld [smem:[#allocation188_spill]]  ;;  %s7944_s19 = scalar_lea.vmem %s885_s6, 128 }
 0x363   :  { %p7945_p12 = scmp.ne.s32.totalorder %s885_s6, %s7944_s19  ;;  %p7949_p13 = scmp.lt.s32.totalorder %s885_s6, %s885_s6 }
 0x364   :  { %p7950_p0 = scmp.lt.s32.totalorder %s7944_s19, %s7944_s19 }
 0x366   :  { %p7951_p1 = por %p7950_p0, %p7949_p13 }
 0x368   :  { %867 = dma.hbm_to_vmem [thread:$0]  %s9387_s2, 1024, %s862_s23, [#allocation93], %s8143_s16, %s8143_s16, %s8144_s18  }
 0x369   :  { %p7952_p2 = pnand %p7951_p1, %p7945_p12 }
 0x36b   :  { %7955 = shalt.err (!%p7952_p2)
}
 0x36c   :  { %s9388_s26 = sld [smem:[#allocation190_spill]]  ;;  %s8210_s8 = smov [#allocation100]  }
 0x36d   :  { %s912_s28 = sshll.u32 %s8210_s8, 4  ;;  %s8211_s24 = smov [#allocation103]   ;;  %s913_s28 = int_to_ptr.vmem [resolvable:$true] %s912_s28 }
 0x36e   :  { %s931_s14 = sshll.u32 %s8211_s24, 4  ;;  %s7964_s1 = scalar_lea.vmem %s913_s28, 64  ;;  %s932_s14 = int_to_ptr.vmem [resolvable:$true] %s931_s14 }
 0x36f   :  { %p7965_p3 = scmp.ne.s32.totalorder %s913_s28, %s7964_s1  ;;  %p7969_p4 = scmp.lt.s32.totalorder %s913_s28, %s913_s28 }
 0x370   :  { %p7970_p5 = scmp.lt.s32.totalorder %s7964_s1, %s7964_s1 }
 0x372   :  { %887 = dma.hbm_to_vmem [thread:$0]  %s9388_s26, 128, %s885_s6, [#allocation96]  }
 0x373   :  { %p7971_p6 = por %p7970_p5, %p7969_p4 }
 0x375   :  { %p7972_p7 = pnand %p7971_p6, %p7965_p3 }
 0x377   :  { %7975 = shalt.err (!%p7972_p7)
}
 0x378   :  { %s9389_s0 = sld [smem:[#allocation195_spill]]  ;;  %s7984_s3 = scalar_lea.vmem %s932_s14, 512 }
 0x379   :  { %p7985_p8 = scmp.ne.s32.totalorder %s932_s14, %s7984_s3  ;;  %p7989_p9 = scmp.lt.s32.totalorder %s932_s14, %s932_s14 }
 0x37a   :  { %p7990_p10 = scmp.lt.s32.totalorder %s7984_s3, %s7984_s3 }
 0x37c   :  { %p7991_p11 = por %p7990_p10, %p7989_p9 }
 0x37e   :  { %915 = dma.hbm_to_vmem [thread:$0]  %s9389_s0, 64, %s913_s28, [#allocation99]  }
 0x37f   :  { %p7992_p12 = pnand %p7991_p11, %p7985_p8 }
 0x381   :  { %7995 = shalt.err (!%p7992_p12)
}
 0x382   :  { %s9390_s30 = sld [smem:[#allocation197_spill]] }
 0x388   :  { %937 = dma.hbm_to_vmem [thread:$0]  %s9390_s30, 512, %s932_s14, [#allocation102], %s8143_s16, %s8143_s16, %s8144_s18  }
 0x389   :  { %7996 = dma.done.wait [#allocation4], 1024  }
 0x38a   :  { %7997 = vsyncadd [#allocation4], 4294966272 }
 0x38b   :  { %7998 = dma.done.wait [#allocation6], 1152  }
 0x38c   :  { %7999 = vsyncadd [#allocation6], 4294966144 }
 0x38d   :  { %8000 = dma.done.wait [#allocation9], 384  }
 0x38e   :  { %8001 = vsyncadd [#allocation9], 4294966912 }
 0x38f   :  { %8002 = dma.done.wait [#allocation12], 2064  }
 0x390   :  { %8003 = vsyncadd [#allocation12], 4294965232 }
 0x391   :  { %8004 = dma.done.wait [#allocation15], 272  }
 0x392   :  { %8005 = vsyncadd [#allocation15], 4294967024 }
 0x393   :  { %8006 = dma.done.wait [#allocation18], 2064  }
 0x394   :  { %8007 = vsyncadd [#allocation18], 4294965232 }
 0x395   :  { %8008 = dma.done.wait [#allocation21], 272  }
 0x396   :  { %8009 = vsyncadd [#allocation21], 4294967024 }
 0x397   :  { %8010 = dma.done.wait [#allocation24], 80  }
 0x398   :  { %8011 = vsyncadd [#allocation24], 4294967216 }
 0x399   :  { %8012 = dma.done.wait [#allocation27], 272  }
 0x39a   :  { %8013 = vsyncadd [#allocation27], 4294967024 }
 0x39b   :  { %8014 = dma.done.wait [#allocation30], 2064  }
 0x39c   :  { %8015 = vsyncadd [#allocation30], 4294965232 }
 0x39d   :  { %8016 = dma.done.wait [#allocation33], 272  }
 0x39e   :  { %8017 = vsyncadd [#allocation33], 4294967024 }
 0x39f   :  { %8018 = dma.done.wait [#allocation36], 2064  }
 0x3a0   :  { %8019 = vsyncadd [#allocation36], 4294965232 }
 0x3a1   :  { %8020 = dma.done.wait [#allocation39], 2048  }
 0x3a2   :  { %8021 = vsyncadd [#allocation39], 4294965248 }
 0x3a3   :  { %8022 = dma.done.wait [#allocation42], 256  }
 0x3a4   :  { %8023 = vsyncadd [#allocation42], 4294967040 }
 0x3a5   :  { %8024 = dma.done.wait [#allocation45], 2048  }
 0x3a6   :  { %8025 = vsyncadd [#allocation45], 4294965248 }
 0x3a7   :  { %8026 = dma.done.wait [#allocation48], 256  }
 0x3a8   :  { %8027 = vsyncadd [#allocation48], 4294967040 }
 0x3a9   :  { %8028 = dma.done.wait [#allocation51], 80  }
 0x3aa   :  { %8029 = vsyncadd [#allocation51], 4294967216 }
 0x3ab   :  { %8030 = dma.done.wait [#allocation54], 528  }
 0x3ac   :  { %8031 = vsyncadd [#allocation54], 4294966768 }
 0x3ad   :  { %8032 = dma.done.wait [#allocation57], 80  }
 0x3ae   :  { %8033 = vsyncadd [#allocation57], 4294967216 }
 0x3af   :  { %8034 = dma.done.wait [#allocation60], 2048  }
 0x3b0   :  { %8035 = vsyncadd [#allocation60], 4294965248 }
 0x3b1   :  { %8036 = dma.done.wait [#allocation63], 256  }
 0x3b2   :  { %8037 = vsyncadd [#allocation63], 4294967040 }
 0x3b3   :  { %8038 = dma.done.wait [#allocation66], 800  }
 0x3b4   :  { %8039 = vsyncadd [#allocation66], 4294966496 }
 0x3b5   :  { %8040 = dma.done.wait [#allocation69], 3088  }
 0x3b6   :  { %8041 = vsyncadd [#allocation69], 4294964208 }
 0x3b7   :  { %8042 = dma.done.wait [#allocation72], 400  }
 0x3b8   :  { %8043 = vsyncadd [#allocation72], 4294966896 }
 0x3b9   :  { %8044 = dma.done.wait [#allocation75], 1552  }
 0x3ba   :  { %8045 = vsyncadd [#allocation75], 4294965744 }
 0x3bb   :  { %8046 = dma.done.wait [#allocation78], 448  }
 0x3bc   :  { %8047 = vsyncadd [#allocation78], 4294966848 }
 0x3bd   :  { %8048 = dma.done.wait [#allocation81], 400  }
 0x3be   :  { %8049 = vsyncadd [#allocation81], 4294966896 }
 0x3bf   :  { %8050 = dma.done.wait [#allocation84], 32  }
 0x3c0   :  { %8051 = vsyncadd [#allocation84], 4294967264 }
 0x3c1   :  { %8052 = dma.done.wait [#allocation87], 800  }
 0x3c2   :  { %8053 = vsyncadd [#allocation87], 4294966496 }
 0x3c3   :  { %8054 = dma.done.wait [#allocation90], 3088  }
 0x3c4   :  { %8055 = vsyncadd [#allocation90], 4294964208 }
 0x3c5   :  { %8056 = dma.done.wait [#allocation93], 2048  }
 0x3c6   :  { %8057 = vsyncadd [#allocation93], 4294965248 }
 0x3c7   :  { %8058 = dma.done.wait [#allocation96], 256  }
 0x3c8   :  { %8059 = vsyncadd [#allocation96], 4294967040 }
 0x3c9   :  { %8060 = dma.done.wait [#allocation99], 1088  }
 0x3ca   :  { %8061 = vsyncadd [#allocation99], 4294966208 }
 0x3cb   :  { %8062 = dma.done.wait [#allocation102], 528  }
 0x3cc   :  { %8063 = vsyncadd [#allocation102], 4294966768  ;;  %s9391_s16 = sld [smem:[#allocation138_spill]]  ;;  %vm1146_vm0 = vcmask 146432   ;;  %vm1211_vm1 = vcmask 64512   ;;  %v1149_v1 = vld [vmem:[#allocation3] sm:$0xff] }
 0x3cd   :  { %5875 = vmatprep.mubr.msk.f32.mxu0 %vm1211_vm1, %v1149_v1  ;;  %s8212_s18 = smov 126   ;;  %v1163_v3 = vld [vmem:[#allocation5 + $0x30] sm:$0xff]  ;;  %v1164_v4 = vld [vmem:[#allocation5 + $0x38] sm:$0xff]  ;;  %v8213_v5 = vmov 0   ;;  %v1162_v6 = vld [vmem:[#allocation5 + $0x28] sm:$0xff]  ;;  %v8214_v21 = vmov 0.0  }
 0x3ce   :  { %6533 = vset.pattern.permute.xlu1 %v8213_v5  ;;  %6532 = vset.pattern.permute.xlu0 %v8213_v5  ;;  %v1160_v7 = vld [vmem:[#allocation5 + $0x18] sm:$0xff]  ;;  %v1161_v8 = vld [vmem:[#allocation5 + $0x20] sm:$0xff]  ;;  %v1158_v9 = vld [vmem:[#allocation5 + $0x8] sm:$0xff]  ;;  %vm8215_vm2 = vmmov 0   ;;  %vm1386_vm3 = vcmask 523264   ;;  %s8216_s25 = smov 2  }
 0x3cf   :  { %1199 = vperm.xlu1 %6533, %v1163_v3   ;;  %v1159_v10 = vld [vmem:[#allocation5 + $0x10] sm:$0xff]  ;;  %v1166_v11 = vld [vmem:[#allocation8] sm:$0xff]  ;;  %v1157_v12 = vld [vmem:[#allocation5] sm:$0xff]  ;;  %5887 = vmatprep.subr.mxu1 %v8214_v21  ;;  %vm1494_vm4 = vcmask 130048   ;;  %s9392_s13 = sld [smem:[#allocation192_spill]]  ;;  %vm1936_vm5 = vcmask 1043456  }
 0x3d0   :  { %v1150_v14 = vld [vmem:[#allocation3 + $0x8] sm:$0xff]  ;;  %v1151_v15 = vld [vmem:[#allocation3 + $0x10] sm:$0xff]  ;;  %v1152_v16 = vld [vmem:[#allocation3 + $0x18] sm:$0xff]  ;;  %5903 = vmatprep.mubr.msk.f32.mxu1 %vm8215_vm2, %v8214_v21  ;;  %s9393_s7 = sld [smem:[#allocation146_spill]]  ;;  %vm1932_vm6 = vcmask 31744   ;;  %vm3093_vm7 = vcmask 261120  }
 0x3d1   :  { %v1153_v17 = vld [vmem:[#allocation3 + $0x20] sm:$0xff]  ;;  %v1154_v18 = vld [vmem:[#allocation3 + $0x28] sm:$0xff]  ;;  %v1155_v19 = vld [vmem:[#allocation3 + $0x30] sm:$0xff]  ;;  %s9394_s21 = sld [smem:[#allocation194_spill]]  ;;  %vm2683_vm8 = vcmask 146448   ;;  %vm3601_vm9 = vcmask 1041408  }
 0x3d2   :  { %v1145_v0 = vld [vmem:[%s9391_s16] sm:$0xff]  ;;  %vm3879_vm10 = vcmask 785408   ;;  %s9395_s10 = sld [smem:[#allocation176_spill]]  ;;  %vm4052_vm11 = vcmask 1042432   ;;  %vm4048_vm12 = vcmask 23552  }
 0x3d3   :  { %1147 = vst.msk [vmem:[#allocation2] sm:$0xff] %vm1146_vm0, %v1145_v0  ;;  %1194 = vperm.xlu1 %6533, %v1162_v6   ;;  %v1156_v20 = vld [vmem:[#allocation3 + $0x38] sm:$0xff]  ;;  %s9396_s20 = sld [smem:[#allocation181_spill]] }
 0x3d4   :  { %s9397_s4 = sld [smem:[#allocation193_spill]] }
 0x3d7   :  { %1189 = vperm.xlu1 %6533, %v1161_v8  }
 0x3da   :  { %v8772_v2 = vld [vmem:[#allocation2] sm:$0xff] }
 0x3db   :  { %1208 = vrot.lane.b32.xlu0 %v8772_v2, %s8212_s18  ;;  %1179 = vperm.xlu1 %6533, %v1159_v10  }
 0x3df   :  { %1204 = vperm.xlu0 %6532, %v1164_v4   ;;  %1169 = vperm.xlu1 %6533, %v1157_v12  }
 0x3e3   :  { %1184 = vperm.xlu0 %6532, %v1160_v7  }
 0x3e7   :  { %1174 = vperm.xlu0 %6532, %v1158_v9  }
 0x3eb   :  { %1383 = vperm.xlu0 %6532, %v1166_v11  }
 0x44a   :  { %v1200_v22 = vpop.permute.xlu1 %1199 }
 0x44d   :  { %v1209_v13 = vpop.permute.xlu0 %1208 }
 0x44e   :  { %5873 = vmatprep.subr.mxu0 %v1209_v13  ;;  %v1195_v23 = vpop.permute.xlu1 %1194 }
 0x44f   :  { %5874 = vmatpush3.msra.mxu0 %v1209_v13 }
 0x450   :  { %5876 = vmatmul.mubr.msk.f32.vlgmr.msra.gmra.mxu0 %vm1211_vm1, %v1150_v14  ;;  %5906 = vmatprep.subr.mxu0 %v8214_v21 }
 0x451   :  { %5878 = vmatprep.mubr.msk.f32.mxu0 %vm1211_vm1, %v1151_v15 }
 0x452   :  { %v1190_v27 = vpop.permute.xlu1 %1189 }
 0x454   :  { %5879 = vmatmul.mubr.msk.f32.gmra.mxu0 %vm1211_vm1, %v1152_v16 }
 0x455   :  { %5881 = vmatprep.mubr.msk.f32.mxu0 %vm1211_vm1, %v1153_v17 }
 0x456   :  { %v1180_v33 = vpop.permute.xlu1 %1179 }
 0x458   :  { %5882 = vmatmul.mubr.msk.f32.gmra.mxu0 %vm1211_vm1, %v1154_v18 }
 0x459   :  { %5884 = vmatprep.mubr.msk.f32.mxu0 %vm1211_vm1, %v1155_v19 }
 0x45a   :  { %v1205_v25 = vpop.permute.xlu0 %1204  ;;  %v1170_v46 = vpop.permute.xlu1 %1169 }
 0x45c   :  { %5885 = vmatmul.mubr.msk.f32.gmra.mxu0 %vm1211_vm1, %v1156_v20 }
 0x45d   :  { %5910 = vmatprep.mubr.msk.f32.mxu0 %vm8215_vm2, %v8214_v21 }
 0x45e   :  { %v1185_v30 = vpop.permute.xlu0 %1184 }
 0x462   :  { %v1175_v40 = vpop.permute.xlu0 %1174 }
 0x510   :  { %v5877_v24 = vpop.f32.mrf.mxu0 }
 0x511   :  { %v1308_v47 = vadd.f32 %v5877_v24, %v1175_v40  ;;  %v1165_v24 = vld [vmem:[#allocation7] sm:$0xff] }
 0x512   :  { %v1302_v26 = vpop.f32.mrf.mxu0  ;;  %v1476_v40 = vld [vmem:[#allocation13 + $0x40] sm:$0xff] }
 0x513   :  { %v1303_v50 = vadd.f32 %v1302_v26, %v1170_v46  ;;  %v1350_v52 = vmul.f32 0.70710677, %v1308_v47  ;;  %v1342_v17 = vmul.f32 0.5, %v1308_v47  ;;  %v1465_v26 = vld [vmem:[#allocation10] sm:$0xff] }
 0x514   :  { %v5880_v28 = vpop.f32.mrf.mxu0  ;;  %v1470_v46 = vld [vmem:[#allocation13 + $0x10] sm:$0xff]  ;;  %v1469_v47 = vld [vmem:[#allocation13 + $0x8] sm:$0xff] }
 0x515   :  { %v1318_v38 = vadd.f32 %v5880_v28, %v1185_v30  ;;  %v1349_v53 = vmul.f32 0.70710677, %v1303_v50  ;;  %v1341_v20 = vmul.f32 0.5, %v1303_v50 }
 0x516   :  { %v1312_v29 = vpop.f32.mrf.mxu0 }
 0x517   :  { %v1313_v43 = vadd.f32 %v1312_v29, %v1180_v33  ;;  %v1352_v48 = vmul.f32 0.70710677, %v1318_v38  ;;  %v1344_v10 = vmul.f32 0.5, %v1318_v38  ;;  %v1481_v33 = vld [vmem:[#allocation13 + $0x68] sm:$0xff]  ;;  %v1479_v38 = vld [vmem:[#allocation13 + $0x58] sm:$0xff] }
 0x518   :  { %v5883_v31 = vpop.f32.mrf.mxu0 }
 0x519   :  { %v1328_v32 = vadd.f32 %v5883_v31, %v1195_v23  ;;  %v1351_v51 = vmul.f32 0.70710677, %v1313_v43  ;;  %v1343_v14 = vmul.f32 0.5, %v1313_v43  ;;  %v1483_v31 = vld [vmem:[#allocation13 + $0x78] sm:$0xff]  ;;  %v1473_v43 = vld [vmem:[#allocation13 + $0x28] sm:$0xff] }
 0x51a   :  { %v1322_v34 = vpop.f32.mrf.mxu0 }
 0x51b   :  { %v1323_v35 = vadd.f32 %v1322_v34, %v1190_v27  ;;  %v1354_v36 = vmul.f32 0.70710677, %v1328_v32  ;;  %v1346_v1 = vmul.f32 0.5, %v1328_v32  ;;  %v1384_v27 = vpop.permute.xlu0 %1383  ;;  %v1482_v32 = vld [vmem:[#allocation13 + $0x70] sm:$0xff]  ;;  %v1480_v34 = vld [vmem:[#allocation13 + $0x60] sm:$0xff] }
 0x51c   :  { %v5886_v37 = vpop.f32.mrf.mxu0 }
 0x51d   :  { %v1338_v39 = vadd.f32 %v5886_v37, %v1205_v25  ;;  %v1353_v41 = vmul.f32 0.70710677, %v1323_v35  ;;  %6534 = verf.f32 %v1354_v36  ;;  %v1345_v6 = vmul.f32 0.5, %v1323_v35  ;;  %v1466_v25 = vld [vmem:[#allocation10 + $0x8] sm:$0xff] }
 0x51e   :  { %v1332_v42 = vpop.f32.mrf.mxu0  ;;  %5907 = vmatpush3.msra.mxu0 %v1466_v25 }
 0x51f   :  { %v1356_v44 = vmul.f32 0.70710677, %v1338_v39  ;;  %v1333_v45 = vadd.f32 %v1332_v42, %v1200_v22  ;;  %v1348_v57 = vmul.f32 0.5, %v1338_v39  ;;  %5908 = vmatprep.subr.mxu0 %v8214_v21  ;;  %v1478_v39 = vld [vmem:[#allocation13 + $0x50] sm:$0xff] }
 0x520   :  { %5909 = vmatpush3.msra.mxu0 %v1465_v26  ;;  %v1474_v42 = vld [vmem:[#allocation13 + $0x30] sm:$0xff] }
 0x521   :  { %6536 = verf.f32 %v1356_v44  ;;  %v1355_v49 = vmul.f32 0.70710677, %v1333_v45  ;;  %v1347_v60 = vmul.f32 0.5, %v1333_v45  ;;  %5948 = vmatprep.subr.mxu0 %v8214_v21  ;;  %v1472_v44 = vld [vmem:[#allocation13 + $0x20] sm:$0xff]  ;;  %v1471_v45 = vld [vmem:[#allocation13 + $0x18] sm:$0xff] }
 0x522   :  { %6538 = verf.f32 %v1353_v41  ;;  %v1475_v41 = vld [vmem:[#allocation13 + $0x38] sm:$0xff] }
 0x523   :  { %6540 = verf.f32 %v1355_v49  ;;  %v5518_v49 = vld [vmem:[#allocation11] ss:$0 sm:$0xff] }
 0x524   :  { %6542 = verf.f32 %v1352_v48  ;;  %v1468_v48 = vld [vmem:[#allocation13] sm:$0xff] }
 0x525   :  { %6544 = verf.f32 %v1351_v51 }
 0x526   :  { %6546 = verf.f32 %v1350_v52 }
 0x527   :  { %6548 = verf.f32 %v1349_v53 }
 0x52a   :  { %v6535_v54 = vpop.eup %6534 }
 0x52b   :  { %v1370_v63 = vadd.f32 1.0, %v6535_v54 }
 0x52d   :  { %v1378_v7 = vmul.f32 %v1370_v63, %v1346_v1 }
 0x52e   :  { %v6537_v55 = vpop.eup %6536 }
 0x52f   :  { %v6539_v56 = vpop.eup %6538  ;;  %v1372_v58 = vadd.f32 1.0, %v6537_v55 }
 0x530   :  { %v6541_v59 = vpop.eup %6540  ;;  %v1369_v4 = vadd.f32 1.0, %v6539_v56 }
 0x531   :  { %v1380_v61 = vmul.f32 %v1372_v58, %v1348_v57  ;;  %v1371_v62 = vadd.f32 1.0, %v6541_v59  ;;  %v6543_v0 = vpop.eup %6542  ;;  %v1654_v58 = vld [vmem:[#allocation16 + $0x8] sm:$0xff]  ;;  %v1653_v59 = vld [vmem:[#allocation16] sm:$0xff] }
 0x532   :  { %v6545_v5 = vpop.eup %6544  ;;  %v1368_v8 = vadd.f32 1.0, %v6543_v0  ;;  %v1377_v11 = vmul.f32 %v1369_v4, %v1345_v6  ;;  %v1669_v6 = vld [vmem:[#allocation19 + $0x68] sm:$0xff] }
 0x533   :  { %5888 = vmatpush3.msra.mxu1 %v1380_v61  ;;  %v1379_v3 = vmul.f32 %v1371_v62, %v1347_v60  ;;  %v6547_v9 = vpop.eup %6546  ;;  %v1367_v12 = vadd.f32 1.0, %v6545_v5  ;;  %v5520_v60 = vld [vmem:[#allocation14] ss:$0 sm:$0xff]  ;;  %v1670_v5 = vld [vmem:[#allocation19 + $0x70] sm:$0xff] }
 0x534   :  { %5889 = vmatprep.subr.mxu1 %v8214_v21  ;;  %v6549_v13 = vpop.eup %6548  ;;  %v1376_v15 = vmul.f32 %v1368_v8, %v1344_v10  ;;  %v1366_v16 = vadd.f32 1.0, %v6547_v9  ;;  %v1667_v8 = vld [vmem:[#allocation19 + $0x58] sm:$0xff]  ;;  %v1666_v9 = vld [vmem:[#allocation19 + $0x50] sm:$0xff]  ;;  %v1665_v10 = vld [vmem:[#allocation19 + $0x48] sm:$0xff] }
 0x535   :  { %5890 = vmatpush3.msra.mxu1 %v1379_v3  ;;  %v1375_v18 = vmul.f32 %v1367_v12, %v1343_v14  ;;  %v1365_v19 = vadd.f32 1.0, %v6549_v13  ;;  %v1671_v3 = vld [vmem:[#allocation19 + $0x78] sm:$0xff]  ;;  %v1662_v13 = vld [vmem:[#allocation19 + $0x30] sm:$0xff]  ;;  %v1661_v14 = vld [vmem:[#allocation19 + $0x28] sm:$0xff] }
 0x536   :  { %5891 = vmatprep.subr.mxu1 %v8214_v21  ;;  %v1374_v22 = vmul.f32 %v1366_v16, %v1342_v17  ;;  %v1663_v12 = vld [vmem:[#allocation19 + $0x38] sm:$0xff]  ;;  %v1658_v17 = vld [vmem:[#allocation19 + $0x10] sm:$0xff] }
 0x537   :  { %5892 = vmatpush3.msra.mxu1 %v1378_v7  ;;  %v1373_v23 = vmul.f32 %v1365_v19, %v1341_v20  ;;  %v1668_v7 = vld [vmem:[#allocation19 + $0x60] sm:$0xff]  ;;  %v1659_v16 = vld [vmem:[#allocation19 + $0x18] sm:$0xff] }
 0x538   :  { %5893 = vmatprep.subr.mxu1 %v8214_v21  ;;  %v1656_v19 = vld [vmem:[#allocation19] sm:$0xff]  ;;  %v5521_v20 = vld [vmem:[#allocation17] ss:$0 sm:$0xff] }
 0x539   :  { %5894 = vmatpush3.msra.mxu1 %v1377_v11  ;;  %v1664_v11 = vld [vmem:[#allocation19 + $0x40] sm:$0xff] }
 0x53a   :  { %5895 = vmatprep.subr.mxu1 %v8214_v21 }
 0x53b   :  { %5896 = vmatpush3.msra.mxu1 %v1376_v15  ;;  %v1660_v15 = vld [vmem:[#allocation19 + $0x20] sm:$0xff] }
 0x53c   :  { %5897 = vmatprep.subr.mxu1 %v8214_v21 }
 0x53d   :  { %5898 = vmatpush3.msra.mxu1 %v1375_v18  ;;  %v1657_v18 = vld [vmem:[#allocation19 + $0x8] sm:$0xff] }
 0x53e   :  { %5899 = vmatprep.subr.mxu1 %v8214_v21 }
 0x53f   :  { %5900 = vmatpush3.msra.mxu1 %v1374_v22 }
 0x540   :  { %5901 = vmatprep.subr.mxu1 %v8214_v21 }
 0x541   :  { %5902 = vmatpush3.msra.mxu1 %v1373_v23 }
 0x542   :  { %5904 = vmatmul.mubr.msk.f32.vlgmr.msra.gmra.mxu1 %vm1386_vm3, %v1165_v24  ;;  %5913 = vmatprep.subr.mxu1 %v8214_v21 }
 0x543   :  { %5945 = vmatprep.mubr.msk.f32.mxu1 %vm8215_vm2, %v8214_v21  ;;  %5914 = vmatpush3.msra.mxu1 %v1483_v31 }
 0x544   :  { %5915 = vmatprep.subr.mxu1 %v8214_v21 }
 0x545   :  { %5916 = vmatpush3.msra.mxu1 %v1482_v32 }
 0x546   :  { %5917 = vmatprep.subr.mxu1 %v8214_v21 }
 0x547   :  { %5918 = vmatpush3.msra.mxu1 %v1481_v33 }
 0x548   :  { %5919 = vmatprep.subr.mxu1 %v8214_v21 }
 0x549   :  { %5920 = vmatpush3.msra.mxu1 %v1480_v34  ;;  %v2387_v34 = vld [vmem:[#allocation40 + $0x38] sm:$0xff] }
 0x54a   :  { %5921 = vmatprep.subr.mxu1 %v8214_v21 }
 0x54b   :  { %5922 = vmatpush3.msra.mxu1 %v1479_v38  ;;  %v2700_v38 = vld [vmem:[#allocation46 + $0x38] sm:$0xff] }
 0x54c   :  { %5923 = vmatprep.subr.mxu1 %v8214_v21 }
 0x54d   :  { %5924 = vmatpush3.msra.mxu1 %v1478_v39  ;;  %v2698_v39 = vld [vmem:[#allocation46 + $0x28] sm:$0xff] }
 0x54e   :  { %5925 = vmatprep.subr.mxu1 %v8214_v21 }
 0x602   :  { %v1456_v28 = vpop.f32.mrf.mxu1 }
 0x603   :  { %v1457_v29 = vadd.f32 %v1456_v28, %v1384_v27 }
 0x604   :  { %v5905_v30 = vpop.f32.mrf.mxu1 }
 0x605   :  { %1461 = vrot.lane.b32.xlu1 %v1457_v29, %s8216_s25  ;;  %v5523_v30 = vld [vmem:[#allocation20] ss:$0 sm:$0xff] }
 0x677   :  { %v1462_v35 = vpop.permute.xlu1 %1461 }
 0x678   :  { %v8808_v36 = vadd.f32 %v1462_v35, %v8772_v2  ;;  %v1477_v2 = vld [vmem:[#allocation13 + $0x48] sm:$0xff]  ;;  %v2385_v35 = vld [vmem:[#allocation40 + $0x28] sm:$0xff] }
 0x679   :  { %5926 = vmatpush3.msra.mxu1 %v1477_v2  ;;  %v2696_v2 = vld [vmem:[#allocation46 + $0x18] sm:$0xff] }
 0x67a   :  { %1492 = vrot.lane.b32.xlu0 %v8808_v36, %s8212_s18  ;;  %5927 = vmatprep.subr.mxu1 %v8214_v21 }
 0x67b   :  { %5928 = vmatpush3.msra.mxu1 %v1476_v40  ;;  %v2694_v40 = vld [vmem:[#allocation46 + $0x8] sm:$0xff] }
 0x67c   :  { %5929 = vmatprep.subr.mxu1 %v8214_v21 }
 0x67d   :  { %5930 = vmatpush3.msra.mxu1 %v1475_v41  ;;  %v2389_v41 = vld [vmem:[#allocation43] sm:$0xff] }
 0x67e   :  { %5931 = vmatprep.subr.mxu1 %v8214_v21 }
 0x67f   :  { %5932 = vmatpush3.msra.mxu1 %v1474_v42  ;;  %v1841_v42 = vld [vmem:[#allocation22 + $0x8] sm:$0xff] }
 0x680   :  { %5933 = vmatprep.subr.mxu1 %v8214_v21 }
 0x681   :  { %5934 = vmatpush3.msra.mxu1 %v1473_v43  ;;  %v1840_v43 = vld [vmem:[#allocation22] sm:$0xff] }
 0x682   :  { %5935 = vmatprep.subr.mxu1 %v8214_v21 }
 0x683   :  { %5936 = vmatpush3.msra.mxu1 %v1472_v44 }
 0x684   :  { %5937 = vmatprep.subr.mxu1 %v8214_v21 }
 0x685   :  { %5938 = vmatpush3.msra.mxu1 %v1471_v45 }
 0x686   :  { %5939 = vmatprep.subr.mxu1 %v8214_v21 }
 0x687   :  { %5940 = vmatpush3.msra.mxu1 %v1470_v46  ;;  %v2386_v46 = vld [vmem:[#allocation40 + $0x30] sm:$0xff] }
 0x688   :  { %5941 = vmatprep.subr.mxu1 %v8214_v21 }
 0x689   :  { %5942 = vmatpush3.msra.mxu1 %v1469_v47  ;;  %v2384_v47 = vld [vmem:[#allocation40 + $0x20] sm:$0xff] }
 0x68a   :  { %5943 = vmatprep.subr.mxu1 %v8214_v21 }
 0x68b   :  { %5944 = vmatpush3.msra.mxu1 %v1468_v48  ;;  %v2382_v48 = vld [vmem:[#allocation40 + $0x10] sm:$0xff] }
 0x68c   :  { %5990 = vmatprep.subr.mxu1 %v8214_v21 }
 0x6ec   :  { %v1493_v37 = vpop.permute.xlu0 %1492 }
 0x6ed   :  { %5911 = vmatmul.mubr.msk.f32.vlgmr.msra.gmra.mxu0 %vm1494_vm4, %v1493_v37  ;;  %v2381_v37 = vld [vmem:[#allocation40 + $0x8] sm:$0xff] }
 0x6ee   :  { %5952 = vmatprep.mubr.msk.f32.mxu0 %vm8215_vm2, %v8214_v21  ;;  %5949 = vmatpush3.msra.mxu0 %v1654_v58  ;;  %v3258_v58 = vld [vmem:[#allocation61 + $0x8] sm:$0xff] }
 0x6ef   :  { %5950 = vmatprep.subr.mxu0 %v8214_v21 }
 0x6f0   :  { %5951 = vmatpush3.msra.mxu0 %v1653_v59  ;;  %v3266_v59 = vld [vmem:[#allocation64] sm:$0xff] }
 0x6f1   :  { %5955 = vmatprep.subr.mxu0 %v8214_v21 }
 0x7ad   :  { %v1563_v50 = vpop.f32.mrf.mxu0 }
 0x7ae   :  { %v1564_v51 = vadd.f32 %v5518_v49, %v1563_v50  ;;  %v2380_v49 = vld [vmem:[#allocation40] sm:$0xff] }
 0x7af   :  { %v5912_v52 = vpop.f32.mrf.mxu0  ;;  %v2699_v50 = vld [vmem:[#allocation46 + $0x30] sm:$0xff] }
 0x7b0   :  { %v1568_v53 = vmul.f32 0.70710677, %v1564_v51  ;;  %v1567_v55 = vmul.f32 0.5, %v1564_v51  ;;  %v2697_v51 = vld [vmem:[#allocation46 + $0x20] sm:$0xff]  ;;  %v2695_v52 = vld [vmem:[#allocation46 + $0x10] sm:$0xff] }
 0x7b2   :  { %6550 = verf.f32 %v1568_v53  ;;  %v2693_v53 = vld [vmem:[#allocation46] sm:$0xff] }
 0x7bf   :  { %v6551_v54 = vpop.eup %6550 }
 0x7c0   :  { %v1570_v56 = vadd.f32 1.0, %v6551_v54  ;;  %v2702_v54 = vld [vmem:[#allocation49] sm:$0xff] }
 0x7c2   :  { %v1571_v57 = vmul.f32 %v1570_v56, %v1567_v55  ;;  %v3264_v55 = vld [vmem:[#allocation61 + $0x38] sm:$0xff]  ;;  %v3262_v56 = vld [vmem:[#allocation61 + $0x28] sm:$0xff] }
 0x7c4   :  { %5946 = vmatmul.mubr.f32.vlgmr.msra.gmra.mxu1 %v1571_v57  ;;  %v3260_v57 = vld [vmem:[#allocation61 + $0x18] sm:$0xff] }
 0x7c5   :  { %5994 = vmatprep.mubr.msk.f32.mxu1 %vm8215_vm2, %v8214_v21  ;;  %5991 = vmatpush3.msra.mxu1 %v1841_v42 }
 0x7c6   :  { %5992 = vmatprep.subr.mxu1 %v8214_v21 }
 0x7c7   :  { %5993 = vmatpush3.msra.mxu1 %v1840_v43  ;;  %v2192_v43 = vld [vmem:[#allocation32 + $0x8] sm:$0xff] }
 0x7c8   :  { %5997 = vmatprep.subr.mxu1 %v8214_v21 }
 0x884   :  { %v1644_v61 = vpop.f32.mrf.mxu1 }
 0x885   :  { %v1645_v62 = vadd.f32 %v5520_v60, %v1644_v61  ;;  %v4537_v60 = vld [vmem:[#allocation94 + $0x30] sm:$0xff]  ;;  %v4535_v61 = vld [vmem:[#allocation94 + $0x20] sm:$0xff] }
 0x886   :  { %v5947_v63 = vpop.f32.mrf.mxu1 }
 0x887   :  { %1649 = vrot.lane.b32.xlu1 %v1645_v62, %s8216_s25  ;;  %v4533_v62 = vld [vmem:[#allocation94 + $0x10] sm:$0xff]  ;;  %v4531_v63 = vld [vmem:[#allocation94] sm:$0xff] }
 0x8f9   :  { %v1650_v0 = vpop.permute.xlu1 %1649 }
 0x8fa   :  { %v8833_v1 = vadd.f32 %v1650_v0, %v8808_v36  ;;  %v2383_v36 = vld [vmem:[#allocation40 + $0x18] sm:$0xff] }
 0x8fb   :  { %v4845_v0 = vld [vmem:[%s9392_s13 + $0x30] sm:$0xff] }
 0x8fc   :  { %1680 = vrot.lane.b32.xlu0 %v8833_v1, %s8212_s18 }
 0x96e   :  { %v1681_v4 = vpop.permute.xlu0 %1680 }
 0x96f   :  { %5953 = vmatmul.mubr.msk.f32.vlgmr.msra.gmra.mxu0 %vm1494_vm4, %v1681_v4  ;;  %v4839_v4 = vld [vmem:[%s9392_s13] sm:$0xff] }
 0x970   :  { %5956 = vmatpush3.msra.mxu0 %v1671_v3  ;;  %5987 = vmatprep.mubr.msk.f32.mxu0 %vm8215_vm2, %v8214_v21  ;;  %v4841_v3 = vld [vmem:[%s9392_s13 + $0x10] sm:$0xff] }
 0x971   :  { %5957 = vmatprep.subr.mxu0 %v8214_v21 }
 0x972   :  { %5958 = vmatpush3.msra.mxu0 %v1670_v5  ;;  %v4540_v5 = vld [vmem:[#allocation97] sm:$0xff] }
 0x973   :  { %5959 = vmatprep.subr.mxu0 %v8214_v21 }
 0x974   :  { %5960 = vmatpush3.msra.mxu0 %v1669_v6 }
 0x975   :  { %5961 = vmatprep.subr.mxu0 %v8214_v21 }
 0x976   :  { %5962 = vmatpush3.msra.mxu0 %v1668_v7  ;;  %v1924_v7 = vld [vmem:[#allocation23] sm:$0xf] }
 0x977   :  { %5963 = vmatprep.subr.mxu0 %v8214_v21 }
 0x978   :  { %5964 = vmatpush3.msra.mxu0 %v1667_v8  ;;  %v5524_v8 = vld [vmem:[%s9393_s7] ss:$0 sm:$0xff] }
 0x979   :  { %5965 = vmatprep.subr.mxu0 %v8214_v21 }
 0x97a   :  { %5966 = vmatpush3.msra.mxu0 %v1666_v9 }
 0x97b   :  { %5967 = vmatprep.subr.mxu0 %v8214_v21 }
 0x97c   :  { %5968 = vmatpush3.msra.mxu0 %v1665_v10 }
 0x97d   :  { %5969 = vmatprep.subr.mxu0 %v8214_v21 }
 0x97e   :  { %5970 = vmatpush3.msra.mxu0 %v1664_v11 }
 0x97f   :  { %5971 = vmatprep.subr.mxu0 %v8214_v21 }
 0x980   :  { %5972 = vmatpush3.msra.mxu0 %v1663_v12  ;;  %v2011_v12 = vld [vmem:[#allocation26 + $0x8] sm:$0xff] }
 0x981   :  { %5973 = vmatprep.subr.mxu0 %v8214_v21 }
 0x982   :  { %5974 = vmatpush3.msra.mxu0 %v1662_v13  ;;  %v2010_v13 = vld [vmem:[#allocation26] sm:$0xff] }
 0x983   :  { %5975 = vmatprep.subr.mxu0 %v8214_v21 }
 0x984   :  { %5976 = vmatpush3.msra.mxu0 %v1661_v14  ;;  %v2028_v14 = vld [vmem:[#allocation29 + $0x78] sm:$0xff] }
 0x985   :  { %5977 = vmatprep.subr.mxu0 %v8214_v21 }
 0x986   :  { %5978 = vmatpush3.msra.mxu0 %v1660_v15  ;;  %v2027_v15 = vld [vmem:[#allocation29 + $0x70] sm:$0xff] }
 0x987   :  { %5979 = vmatprep.subr.mxu0 %v8214_v21 }
 0x988   :  { %5980 = vmatpush3.msra.mxu0 %v1659_v16  ;;  %v2026_v16 = vld [vmem:[#allocation29 + $0x68] sm:$0xff] }
 0x989   :  { %5981 = vmatprep.subr.mxu0 %v8214_v21 }
 0x98a   :  { %5982 = vmatpush3.msra.mxu0 %v1658_v17  ;;  %v2025_v17 = vld [vmem:[#allocation29 + $0x60] sm:$0xff] }
 0x98b   :  { %5983 = vmatprep.subr.mxu0 %v8214_v21 }
 0x98c   :  { %5984 = vmatpush3.msra.mxu0 %v1657_v18  ;;  %v5526_v18 = vld [vmem:[#allocation25] ss:$0 sm:$0xff] }
 0x98d   :  { %5985 = vmatprep.subr.mxu0 %v8214_v21 }
 0x98e   :  { %5986 = vmatpush3.msra.mxu0 %v1656_v19 }
 0x98f   :  { %6002 = vmatprep.subr.mxu0 %v8214_v21 }
 0xa2f   :  { %v1750_v22 = vpop.f32.mrf.mxu0 }
 0xa30   :  { %v1751_v23 = vadd.f32 %v5521_v20, %v1750_v22 }
 0xa31   :  { %v5954_v24 = vpop.f32.mrf.mxu0 }
 0xa32   :  { %v1755_v25 = vmul.f32 0.70710677, %v1751_v23  ;;  %v1754_v27 = vmul.f32 0.5, %v1751_v23  ;;  %v2024_v23 = vld [vmem:[#allocation29 + $0x58] sm:$0xff]  ;;  %v2023_v24 = vld [vmem:[#allocation29 + $0x50] sm:$0xff] }
 0xa34   :  { %6552 = verf.f32 %v1755_v25  ;;  %v2022_v25 = vld [vmem:[#allocation29 + $0x48] sm:$0xff] }
 0xa41   :  { %v6553_v26 = vpop.eup %6552 }
 0xa42   :  { %v1757_v28 = vadd.f32 1.0, %v6553_v26  ;;  %v2021_v26 = vld [vmem:[#allocation29 + $0x40] sm:$0xff] }
 0xa44   :  { %v1758_v29 = vmul.f32 %v1757_v28, %v1754_v27  ;;  %v2020_v27 = vld [vmem:[#allocation29 + $0x38] sm:$0xff]  ;;  %v2019_v28 = vld [vmem:[#allocation29 + $0x30] sm:$0xff] }
 0xa46   :  { %5988 = vmatmul.mubr.f32.vlgmr.msra.gmra.mxu0 %v1758_v29  ;;  %v2018_v29 = vld [vmem:[#allocation29 + $0x28] sm:$0xff] }
 0xa47   :  { %6006 = vmatprep.mubr.msk.f32.mxu0 %vm8215_vm2, %v8214_v21  ;;  %6003 = vmatpush3.msra.mxu0 %v2011_v12 }
 0xa48   :  { %6004 = vmatprep.subr.mxu0 %v8214_v21 }
 0xa49   :  { %6005 = vmatpush3.msra.mxu0 %v2010_v13  ;;  %v2685_v13 = vld [vmem:[#allocation44] sm:$0xff] }
 0xa4a   :  { %6044 = vmatprep.subr.mxu0 %v8214_v21 }
 0xb06   :  { %v1831_v31 = vpop.f32.mrf.mxu0 }
 0xb07   :  { %v1832_v32 = vadd.f32 %v5523_v30, %v1831_v31  ;;  %v2017_v30 = vld [vmem:[#allocation29 + $0x20] sm:$0xff]  ;;  %v2016_v31 = vld [vmem:[#allocation29 + $0x18] sm:$0xff] }
 0xb08   :  { %v5989_v33 = vpop.f32.mrf.mxu0 }
 0xb09   :  { %1836 = vrot.lane.b32.xlu1 %v1832_v32, %s8216_s25  ;;  %v2015_v32 = vld [vmem:[#allocation29 + $0x10] sm:$0xff]  ;;  %v2014_v33 = vld [vmem:[#allocation29 + $0x8] sm:$0xff] }
 0xb0d   :  { %2427 = vperm.xlu1 %6533, %v2387_v34   ;;  %v2013_v34 = vld [vmem:[#allocation29] sm:$0xff] }
 0xb11   :  { %2417 = vperm.xlu1 %6533, %v2385_v35   ;;  %v5529_v35 = vld [vmem:[#allocation28] ss:$0 sm:$0xff] }
 0xb15   :  { %2407 = vperm.xlu1 %6533, %v2383_v36  }
 0xb19   :  { %2397 = vperm.xlu1 %6533, %v2381_v37  }
 0xb1d   :  { %2740 = vperm.xlu1 %6533, %v2700_v38  }
 0xb21   :  { %2730 = vperm.xlu1 %6533, %v2698_v39  }
 0xb25   :  { %2720 = vperm.xlu1 %6533, %v2696_v2  }
 0xb29   :  { %2710 = vperm.xlu1 %6533, %v2694_v40  }
 0xb2d   :  { %2601 = vperm.xlu1 %6533, %v2389_v41  }
 0xb7b   :  { %v1837_v44 = vpop.permute.xlu1 %1836 }
 0xb7c   :  { %v1839_v45 = vadd.f32 %v1837_v44, %v8833_v1  ;;  %v4843_v1 = vld [vmem:[%s9392_s13 + $0x20] sm:$0xff]  ;;  %v2191_v44 = vld [vmem:[#allocation32] sm:$0xff] }
 0xb7e   :  { %1850 = vrot.lane.b32.xlu0 %v1839_v45, %s8212_s18  ;;  %v5531_v45 = vld [vmem:[#allocation31] ss:$0 sm:$0xff] }
 0xb82   :  { %2422 = vperm.xlu0 %6532, %v2386_v46  }
 0xb86   :  { %2412 = vperm.xlu0 %6532, %v2384_v47  }
 0xb8a   :  { %2402 = vperm.xlu0 %6532, %v2382_v48  }
 0xb8e   :  { %2392 = vperm.xlu0 %6532, %v2380_v49  }
 0xb92   :  { %2735 = vperm.xlu0 %6532, %v2699_v50   ;;  %v2209_v50 = vld [vmem:[#allocation35 + $0x78] sm:$0xff] }
 0xb96   :  { %2725 = vperm.xlu0 %6532, %v2697_v51   ;;  %v2208_v51 = vld [vmem:[#allocation35 + $0x70] sm:$0xff] }
 0xb9a   :  { %2715 = vperm.xlu0 %6532, %v2695_v52   ;;  %v2207_v52 = vld [vmem:[#allocation35 + $0x68] sm:$0xff] }
 0xb9e   :  { %2705 = vperm.xlu0 %6532, %v2693_v53   ;;  %v2206_v53 = vld [vmem:[#allocation35 + $0x60] sm:$0xff] }
 0xba2   :  { %2914 = vperm.xlu0 %6532, %v2702_v54   ;;  %v2205_v54 = vld [vmem:[#allocation35 + $0x58] sm:$0xff] }
 0xba6   :  { %3304 = vperm.xlu0 %6532, %v3264_v55   ;;  %v2204_v55 = vld [vmem:[#allocation35 + $0x50] sm:$0xff] }
 0xbaa   :  { %3294 = vperm.xlu0 %6532, %v3262_v56   ;;  %v2203_v56 = vld [vmem:[#allocation35 + $0x48] sm:$0xff] }
 0xbae   :  { %3284 = vperm.xlu0 %6532, %v3260_v57   ;;  %v2202_v57 = vld [vmem:[#allocation35 + $0x40] sm:$0xff] }
 0xbb2   :  { %3274 = vperm.xlu0 %6532, %v3258_v58   ;;  %v2201_v58 = vld [vmem:[#allocation35 + $0x38] sm:$0xff] }
 0xbb6   :  { %3478 = vperm.xlu0 %6532, %v3266_v59   ;;  %v2200_v59 = vld [vmem:[#allocation35 + $0x30] sm:$0xff] }
 0xbba   :  { %4573 = vperm.xlu0 %6532, %v4537_v60   ;;  %v2199_v60 = vld [vmem:[#allocation35 + $0x28] sm:$0xff] }
 0xbbe   :  { %4563 = vperm.xlu0 %6532, %v4535_v61   ;;  %v2198_v61 = vld [vmem:[#allocation35 + $0x20] sm:$0xff] }
 0xbc2   :  { %4553 = vperm.xlu0 %6532, %v4533_v62   ;;  %v2197_v62 = vld [vmem:[#allocation35 + $0x18] sm:$0xff] }
 0xbc6   :  { %4543 = vperm.xlu0 %6532, %v4531_v63   ;;  %v2196_v63 = vld [vmem:[#allocation35 + $0x10] sm:$0xff] }
 0xbca   :  { %4881 = vperm.xlu0 %6532, %v4845_v0   ;;  %v2195_v0 = vld [vmem:[#allocation35 + $0x8] sm:$0xff] }
 0xbce   :  { %4871 = vperm.xlu0 %6532, %v4843_v1   ;;  %v2194_v1 = vld [vmem:[#allocation35] sm:$0xff] }
 0xbd2   :  { %4861 = vperm.xlu0 %6532, %v4841_v3   ;;  %v5532_v3 = vld [vmem:[#allocation34] ss:$0 sm:$0xff] }
 0xbd6   :  { %4851 = vperm.xlu0 %6532, %v4839_v4  }
 0xbda   :  { %4752 = vperm.xlu0 %6532, %v4540_v5  }
 0xbf0   :  { %v1851_v6 = vpop.permute.xlu0 %1850 }
 0xbf1   :  { %5995 = vmatmul.mubr.msk.f32.vlgmr.msra.gmra.mxu1 %vm1494_vm4, %v1851_v6 }
 0xbf2   :  { %5999 = vmatprep.mubr.msk.f32.mxu1 %vm8215_vm2, %v8214_v21  ;;  %5998 = vmatpush3.msk.msra.mxu1 %vm1936_vm5, %v1924_v7 }
 0xbf3   :  { %6009 = vmatprep.subr.mxu1 %v8214_v21 }
 0xcb1   :  { %v1920_v9 = vpop.f32.mrf.mxu1 }
 0xcb2   :  { %v8873_v10 = vadd.f32 %v5524_v8, %v1920_v9 }
 0xcb3   :  { %v5996_v11 = vpop.f32.mrf.mxu1 }
 0xcb4   :  { %6000 = vmatmul.mubr.msk.f32.vlgmr.msra.gmra.mxu1 %vm1932_vm6, %v8873_v10 }
 0xcb5   :  { %6041 = vmatprep.mubr.msk.f32.mxu1 %vm8215_vm2, %v8214_v21  ;;  %6010 = vmatpush3.msra.mxu1 %v2028_v14  ;;  %v2686_v14 = vld [vmem:[#allocation44 + $0x8] sm:$0xff] }
 0xcb6   :  { %6011 = vmatprep.subr.mxu1 %v8214_v21 }
 0xcb7   :  { %6012 = vmatpush3.msra.mxu1 %v2027_v15  ;;  %v2687_v15 = vld [vmem:[#allocation44 + $0x10] sm:$0xff] }
 0xcb8   :  { %6013 = vmatprep.subr.mxu1 %v8214_v21 }
 0xcb9   :  { %6014 = vmatpush3.msra.mxu1 %v2026_v16  ;;  %v2688_v16 = vld [vmem:[#allocation44 + $0x18] sm:$0xff] }
 0xcba   :  { %6015 = vmatprep.subr.mxu1 %v8214_v21 }
 0xcbb   :  { %6016 = vmatpush3.msra.mxu1 %v2025_v17  ;;  %v2689_v17 = vld [vmem:[#allocation44 + $0x20] sm:$0xff] }
 0xcbc   :  { %6017 = vmatprep.subr.mxu1 %v8214_v21 }
 0xcbd   :  { %6018 = vmatpush3.msra.mxu1 %v2024_v23  ;;  %v8936_v23 = vpop.permute.xlu1 %2427 }
 0xcbe   :  { %6019 = vmatprep.subr.mxu1 %v8214_v21 }
 0xcbf   :  { %6020 = vmatpush3.msra.mxu1 %v2023_v24  ;;  %v8938_v24 = vpop.permute.xlu0 %2422 }
 0xcc0   :  { %6021 = vmatprep.subr.mxu1 %v8214_v21 }
 0xcc1   :  { %6022 = vmatpush3.msra.mxu1 %v2022_v25  ;;  %v8940_v25 = vpop.permute.xlu1 %2417 }
 0xcc2   :  { %6023 = vmatprep.subr.mxu1 %v8214_v21 }
 0xcc3   :  { %6024 = vmatpush3.msra.mxu1 %v2021_v26  ;;  %v8942_v26 = vpop.permute.xlu0 %2412 }
 0xcc4   :  { %6025 = vmatprep.subr.mxu1 %v8214_v21 }
 0xcc5   :  { %6026 = vmatpush3.msra.mxu1 %v2020_v27  ;;  %v8944_v27 = vpop.permute.xlu1 %2407 }
 0xcc6   :  { %6027 = vmatprep.subr.mxu1 %v8214_v21 }
 0xcc7   :  { %6028 = vmatpush3.msra.mxu1 %v2019_v28  ;;  %v8946_v28 = vpop.permute.xlu0 %2402 }
 0xcc8   :  { %6029 = vmatprep.subr.mxu1 %v8214_v21 }
 0xcc9   :  { %6030 = vmatpush3.msra.mxu1 %v2018_v29  ;;  %v8948_v29 = vpop.permute.xlu1 %2397 }
 0xcca   :  { %6031 = vmatprep.subr.mxu1 %v8214_v21 }
 0xccb   :  { %6032 = vmatpush3.msra.mxu1 %v2017_v30  ;;  %v8950_v30 = vpop.permute.xlu0 %2392 }
 0xccc   :  { %6033 = vmatprep.subr.mxu1 %v8214_v21 }
 0xccd   :  { %6034 = vmatpush3.msra.mxu1 %v2016_v31  ;;  %v5534_v31 = vld [vmem:[#allocation37] ss:$0 sm:$0xff] }
 0xcce   :  { %6035 = vmatprep.subr.mxu1 %v8214_v21 }
 0xccf   :  { %6036 = vmatpush3.msra.mxu1 %v2015_v32 }
 0xcd0   :  { %6037 = vmatprep.subr.mxu1 %v8214_v21 }
 0xcd1   :  { %6038 = vmatpush3.msra.mxu1 %v2014_v33 }
 0xcd2   :  { %6039 = vmatprep.subr.mxu1 %v8214_v21 }
 0xcd3   :  { %6040 = vmatpush3.msra.mxu1 %v2013_v34  ;;  %v2741_v34 = vpop.permute.xlu1 %2740 }
 0xd74   :  { %v2006_v19 = vpop.f32.mrf.mxu1 }
 0xd75   :  { %v2007_v20 = vadd.f32 %v5526_v18, %v2006_v19  ;;  %v2690_v18 = vld [vmem:[#allocation44 + $0x28] sm:$0xff]  ;;  %v2691_v19 = vld [vmem:[#allocation44 + $0x30] sm:$0xff] }
 0xd76   :  { %v6001_v22 = vpop.f32.mrf.mxu1 }
 0xd77   :  { %6007 = vmatmul.mubr.msk.f32.vlgmr.msra.gmra.mxu0 %vm1494_vm4, %v2007_v20  ;;  %v2372_v22 = vld [vmem:[#allocation38] sm:$0xff] }
 0xd78   :  { %6048 = vmatprep.mubr.msk.f32.mxu0 %vm8215_vm2, %v8214_v21  ;;  %6045 = vmatpush3.msra.mxu0 %v2192_v43  ;;  %v2375_v43 = vld [vmem:[#allocation38 + $0x18] sm:$0xff] }
 0xd79   :  { %6046 = vmatprep.subr.mxu0 %v8214_v21 }
 0xd7a   :  { %6047 = vmatpush3.msra.mxu0 %v2191_v44  ;;  %v2376_v44 = vld [vmem:[#allocation38 + $0x20] sm:$0xff] }
 0xd7b   :  { %6051 = vmatprep.subr.mxu0 %v8214_v21 }
 0xe37   :  { %v2105_v36 = vpop.f32.mrf.mxu0 }
 0xe38   :  { %v2106_v37 = vadd.f32 %v5529_v35, %v2105_v36 }
 0xe39   :  { %v6008_v38 = vpop.f32.mrf.mxu0 }
 0xe3a   :  { %v2110_v39 = vmul.f32 0.70710677, %v2106_v37  ;;  %v2109_v40 = vmul.f32 0.5, %v2106_v37  ;;  %v2736_v37 = vpop.permute.xlu0 %2735 }
 0xe3c   :  { %6554 = verf.f32 %v2110_v39  ;;  %v2373_v39 = vld [vmem:[#allocation38 + $0x8] sm:$0xff] }
 0xe49   :  { %v6555_v2 = vpop.eup %6554 }
 0xe4a   :  { %v2112_v41 = vadd.f32 1.0, %v6555_v2  ;;  %v2374_v2 = vld [vmem:[#allocation38 + $0x10] sm:$0xff] }
 0xe4c   :  { %v2113_v42 = vmul.f32 %v2112_v41, %v2109_v40  ;;  %v2731_v41 = vpop.permute.xlu1 %2730 }
 0xe4e   :  { %6042 = vmatmul.mubr.f32.vlgmr.msra.gmra.mxu1 %v2113_v42 }
 0xe4f   :  { %6088 = vmatprep.mubr.msk.f32.mxu1 %vm1211_vm1, %v2372_v22 }
 0xf0e   :  { %v2186_v46 = vpop.f32.mrf.mxu1 }
 0xf0f   :  { %v2187_v47 = vadd.f32 %v5531_v45, %v2186_v46  ;;  %v2726_v45 = vpop.permute.xlu0 %2725 }
 0xf10   :  { %v6043_v48 = vpop.f32.mrf.mxu1 }
 0xf11   :  { %v8901_v49 = vadd.f32 %v2187_v47, %v2007_v20  ;;  %v2692_v20 = vld [vmem:[#allocation44 + $0x38] sm:$0xff] }
 0xf12   :  { %v2377_v48 = vld [vmem:[#allocation38 + $0x28] sm:$0xff] }
 0xf13   :  { %6049 = vmatmul.mubr.msk.f32.vlgmr.msra.gmra.mxu0 %vm1494_vm4, %v8901_v49 }
 0xf14   :  { %6052 = vmatpush3.msra.mxu0 %v2209_v50  ;;  %6083 = vmatprep.mubr.msk.f32.mxu0 %vm8215_vm2, %v8214_v21  ;;  %v2378_v50 = vld [vmem:[#allocation38 + $0x30] sm:$0xff] }
 0xf15   :  { %6053 = vmatprep.subr.mxu0 %v8214_v21 }
 0xf16   :  { %6054 = vmatpush3.msra.mxu0 %v2208_v51  ;;  %v2721_v51 = vpop.permute.xlu1 %2720 }
 0xf17   :  { %6055 = vmatprep.subr.mxu0 %v8214_v21 }
 0xf18   :  { %6056 = vmatpush3.msra.mxu0 %v2207_v52 }
 0xf19   :  { %6057 = vmatprep.subr.mxu0 %v8214_v21 }
 0xf1a   :  { %6058 = vmatpush3.msra.mxu0 %v2206_v53 }
 0xf1b   :  { %6059 = vmatprep.subr.mxu0 %v8214_v21 }
 0xf1c   :  { %6060 = vmatpush3.msra.mxu0 %v2205_v54  ;;  %v2716_v54 = vpop.permute.xlu0 %2715 }
 0xf1d   :  { %6061 = vmatprep.subr.mxu0 %v8214_v21 }
 0xf1e   :  { %6062 = vmatpush3.msra.mxu0 %v2204_v55 }
 0xf1f   :  { %6063 = vmatprep.subr.mxu0 %v8214_v21 }
 0xf20   :  { %6064 = vmatpush3.msra.mxu0 %v2203_v56 }
 0xf21   :  { %6065 = vmatprep.subr.mxu0 %v8214_v21 }
 0xf22   :  { %6066 = vmatpush3.msra.mxu0 %v2202_v57  ;;  %v2379_v57 = vld [vmem:[#allocation38 + $0x38] sm:$0xff] }
 0xf23   :  { %6067 = vmatprep.subr.mxu0 %v8214_v21 }
 0xf24   :  { %6068 = vmatpush3.msra.mxu0 %v2201_v58 }
 0xf25   :  { %6069 = vmatprep.subr.mxu0 %v8214_v21 }
 0xf26   :  { %6070 = vmatpush3.msra.mxu0 %v2200_v59 }
 0xf27   :  { %6071 = vmatprep.subr.mxu0 %v8214_v21 }
 0xf28   :  { %6072 = vmatpush3.msra.mxu0 %v2199_v60 }
 0xf29   :  { %6073 = vmatprep.subr.mxu0 %v8214_v21 }
 0xf2a   :  { %6074 = vmatpush3.msra.mxu0 %v2198_v61 }
 0xf2b   :  { %6075 = vmatprep.subr.mxu0 %v8214_v21 }
 0xf2c   :  { %6076 = vmatpush3.msra.mxu0 %v2197_v62 }
 0xf2d   :  { %6077 = vmatprep.subr.mxu0 %v8214_v21 }
 0xf2e   :  { %6078 = vmatpush3.msra.mxu0 %v2196_v63 }
 0xf2f   :  { %6079 = vmatprep.subr.mxu0 %v8214_v21 }
 0xf30   :  { %6080 = vmatpush3.msra.mxu0 %v2195_v0 }
 0xf31   :  { %6081 = vmatprep.subr.mxu0 %v8214_v21 }
 0xf32   :  { %6082 = vmatpush3.msra.mxu0 %v2194_v1  ;;  %v2711_v1 = vpop.permute.xlu1 %2710 }
 0xf33   :  { %6119 = vmatprep.subr.mxu0 %v8873_v10 }
 0xfd3   :  { %v2286_v4 = vpop.f32.mrf.mxu0 }
 0xfd4   :  { %v2287_v5 = vadd.f32 %v5532_v3, %v2286_v4 }
 0xfd5   :  { %v6050_v6 = vpop.f32.mrf.mxu0 }
 0xfd6   :  { %v2291_v7 = vmul.f32 0.70710677, %v2287_v5  ;;  %v2290_v9 = vmul.f32 0.5, %v2287_v5  ;;  %v2706_v6 = vpop.permute.xlu0 %2705 }
 0xfd8   :  { %6556 = verf.f32 %v2291_v7 }
 0xfe5   :  { %v6557_v8 = vpop.eup %6556 }
 0xfe6   :  { %v2293_v11 = vadd.f32 1.0, %v6557_v8 }
 0xfe8   :  { %v2294_v12 = vmul.f32 %v2293_v11, %v2290_v9 }
 0xfea   :  { %6084 = vmatmul.mubr.f32.vlgmr.msra.gmra.mxu0 %v2294_v12 }
 0xfeb   :  { %6120 = vmatpush3.msra.mxu0 %v8873_v10  ;;  %6121 = vmatprep.mubr.msk.f32.mxu0 %vm1211_vm1, %v2685_v13 }
 0xfec   :  { %6133 = vmatprep.subr.mxu0 %v8214_v21 }
 0xfee   :  { %6122 = vmatmul.mubr.msk.f32.vlgmr.msra.gmra.mxu0 %vm1211_vm1, %v2686_v14 }
 0xfef   :  { %6124 = vmatprep.mubr.msk.f32.mxu0 %vm1211_vm1, %v2687_v15 }
 0xff2   :  { %6125 = vmatmul.mubr.msk.f32.gmra.mxu0 %vm1211_vm1, %v2688_v16 }
 0xff3   :  { %6127 = vmatprep.mubr.msk.f32.mxu0 %vm1211_vm1, %v2689_v17 }
 0xff6   :  { %6128 = vmatmul.mubr.msk.f32.gmra.mxu0 %vm1211_vm1, %v2690_v18 }
 0xff7   :  { %6130 = vmatprep.mubr.msk.f32.mxu0 %vm1211_vm1, %v2691_v19 }
 0xffa   :  { %6131 = vmatmul.mubr.msk.f32.gmra.mxu0 %vm1211_vm1, %v2692_v20 }
 0xffb   :  { %6149 = vmatprep.mubr.msk.f32.mxu0 %vm8215_vm2, %v8214_v21 }
0x10aa   :  { %v2367_v32 = vpop.f32.mrf.mxu0 }
0x10ab   :  { %v2368_v33 = vadd.f32 %v5534_v31, %v2367_v32 }
0x10ac   :  { %v6085_v35 = vpop.f32.mrf.mxu0 }
0x10ad   :  { %v8953_v36 = vadd.f32 %v2368_v33, %v8901_v49 }
0x10ae   :  { %v6123_v38 = vpop.f32.mrf.mxu0 }
0x10af   :  { %6086 = vmatprep.subr.mxu1 %v8953_v36  ;;  %v2839_v3 = vadd.f32 %v6123_v38, %v2711_v1 }
0x10b0   :  { %6087 = vmatpush3.msra.mxu1 %v8953_v36  ;;  %v2833_v40 = vpop.f32.mrf.mxu0 }
0x10b1   :  { %6089 = vmatmul.mubr.msk.f32.vlgmr.msra.gmra.mxu1 %vm1211_vm1, %v2373_v39  ;;  %6100 = vmatprep.subr.mxu1 %v8214_v21  ;;  %v2834_v7 = vadd.f32 %v2833_v40, %v2706_v6  ;;  %v2881_v9 = vmul.f32 0.70710677, %v2839_v3 }
0x10b2   :  { %v6126_v42 = vpop.f32.mrf.mxu0  ;;  %6091 = vmatprep.mubr.msk.f32.mxu1 %vm1211_vm1, %v2374_v2 }
0x10b3   :  { %v2849_v58 = vadd.f32 %v6126_v42, %v2721_v51  ;;  %v2880_v11 = vmul.f32 0.70710677, %v2834_v7  ;;  %v2872_v51 = vmul.f32 0.5, %v2834_v7 }
0x10b4   :  { %v2843_v46 = vpop.f32.mrf.mxu0 }
0x10b5   :  { %6092 = vmatmul.mubr.msk.f32.gmra.mxu1 %vm1211_vm1, %v2375_v43  ;;  %v2844_v62 = vadd.f32 %v2843_v46, %v2716_v54  ;;  %v2883_v4 = vmul.f32 0.70710677, %v2849_v58  ;;  %v2875_v40 = vmul.f32 0.5, %v2849_v58  ;;  %v2998_v54 = vld [vmem:[#allocation56] sm:$0xf] }
0x10b6   :  { %v6129_v47 = vpop.f32.mrf.mxu0  ;;  %6094 = vmatprep.mubr.msk.f32.mxu1 %vm1211_vm1, %v2376_v44 }
0x10b7   :  { %v2859_v49 = vadd.f32 %v6129_v47, %v2731_v41  ;;  %v2882_v8 = vmul.f32 0.70710677, %v2844_v62  ;;  %v2874_v46 = vmul.f32 0.5, %v2844_v62  ;;  %v2873_v47 = vmul.f32 0.5, %v2839_v3 }
0x10b8   :  { %v2853_v52 = vpop.f32.mrf.mxu0 }
0x10b9   :  { %v2854_v53 = vadd.f32 %v2853_v52, %v2726_v45  ;;  %6095 = vmatmul.mubr.msk.f32.gmra.mxu1 %vm1211_vm1, %v2377_v48  ;;  %v2885_v55 = vmul.f32 0.70710677, %v2859_v49  ;;  %v2877_v32 = vmul.f32 0.5, %v2859_v49 }
0x10ba   :  { %v6132_v56 = vpop.f32.mrf.mxu0  ;;  %6097 = vmatprep.mubr.msk.f32.mxu1 %vm1211_vm1, %v2378_v50 }
0x10bb   :  { %v2869_v59 = vadd.f32 %v6132_v56, %v2741_v34  ;;  %v2884_v60 = vmul.f32 0.70710677, %v2854_v53  ;;  %6558 = verf.f32 %v2885_v55  ;;  %v2876_v39 = vmul.f32 0.5, %v2854_v53  ;;  %v2701_v53 = vld [vmem:[#allocation47] sm:$0xff] }
0x10bc   :  { %v2863_v61 = vpop.f32.mrf.mxu0 }
0x10bd   :  { %v2887_v63 = vmul.f32 0.70710677, %v2869_v59  ;;  %v2864_v0 = vadd.f32 %v2863_v61, %v2736_v37  ;;  %6098 = vmatmul.mubr.msk.f32.gmra.mxu1 %vm1211_vm1, %v2379_v57  ;;  %v2879_v15 = vmul.f32 0.5, %v2869_v59 }
0x10be   :  { %6116 = vmatprep.mubr.msk.f32.mxu1 %vm8215_vm2, %v8214_v21 }
0x10bf   :  { %6560 = verf.f32 %v2887_v63  ;;  %v2886_v5 = vmul.f32 0.70710677, %v2864_v0  ;;  %v2878_v20 = vmul.f32 0.5, %v2864_v0 }
0x10c0   :  { %6562 = verf.f32 %v2884_v60 }
0x10c1   :  { %6564 = verf.f32 %v2886_v5 }
0x10c2   :  { %6566 = verf.f32 %v2883_v4 }
0x10c3   :  { %6568 = verf.f32 %v2882_v8 }
0x10c4   :  { %6570 = verf.f32 %v2881_v9 }
0x10c5   :  { %6572 = verf.f32 %v2880_v11 }
0x10c8   :  { %v6559_v12 = vpop.eup %6558 }
0x10c9   :  { %v2901_v18 = vadd.f32 1.0, %v6559_v12 }
0x10cb   :  { %v2909_v38 = vmul.f32 %v2901_v18, %v2877_v32 }
0x10cc   :  { %v6561_v13 = vpop.eup %6560 }
0x10cd   :  { %v6563_v14 = vpop.eup %6562  ;;  %v2903_v16 = vadd.f32 1.0, %v6561_v13 }
0x10ce   :  { %v6565_v17 = vpop.eup %6564  ;;  %v2900_v33 = vadd.f32 1.0, %v6563_v14 }
0x10cf   :  { %v2911_v19 = vmul.f32 %v2903_v16, %v2879_v15  ;;  %v2902_v22 = vadd.f32 1.0, %v6565_v17  ;;  %v6567_v31 = vpop.eup %6566 }
0x10d0   :  { %v6569_v35 = vpop.eup %6568  ;;  %v2899_v37 = vadd.f32 1.0, %v6567_v31  ;;  %v2908_v42 = vmul.f32 %v2900_v33, %v2876_v39 }
0x10d1   :  { %v2910_v34 = vmul.f32 %v2902_v22, %v2878_v20  ;;  %6134 = vmatpush3.msra.mxu0 %v2911_v19  ;;  %v6571_v2 = vpop.eup %6570  ;;  %v2898_v41 = vadd.f32 1.0, %v6569_v35 }
0x10d2   :  { %6135 = vmatprep.subr.mxu0 %v8214_v21  ;;  %v6573_v43 = vpop.eup %6572  ;;  %v2897_v44 = vadd.f32 1.0, %v6571_v2  ;;  %v2907_v45 = vmul.f32 %v2899_v37, %v2875_v40 }
0x10d3   :  { %6136 = vmatpush3.msra.mxu0 %v2910_v34  ;;  %v2896_v48 = vadd.f32 1.0, %v6573_v43  ;;  %v2906_v49 = vmul.f32 %v2898_v41, %v2874_v46 }
0x10d4   :  { %6137 = vmatprep.subr.mxu0 %v8214_v21  ;;  %v2905_v50 = vmul.f32 %v2897_v44, %v2873_v47 }
0x10d5   :  { %6138 = vmatpush3.msra.mxu0 %v2909_v38  ;;  %v2904_v52 = vmul.f32 %v2896_v48, %v2872_v51 }
0x10d6   :  { %6139 = vmatprep.subr.mxu0 %v8214_v21 }
0x10d7   :  { %6140 = vmatpush3.msra.mxu0 %v2908_v42 }
0x10d8   :  { %6141 = vmatprep.subr.mxu0 %v8214_v21 }
0x10d9   :  { %6142 = vmatpush3.msra.mxu0 %v2907_v45 }
0x10da   :  { %6143 = vmatprep.subr.mxu0 %v8214_v21 }
0x10db   :  { %6144 = vmatpush3.msra.mxu0 %v2906_v49  ;;  %v2915_v49 = vpop.permute.xlu0 %2914 }
0x10dc   :  { %6145 = vmatprep.subr.mxu0 %v8214_v21 }
0x10dd   :  { %6146 = vmatpush3.msra.mxu0 %v2905_v50 }
0x10de   :  { %6147 = vmatprep.subr.mxu0 %v8214_v21 }
0x10df   :  { %6148 = vmatpush3.msra.mxu0 %v2904_v52  ;;  %v2388_v52 = vld [vmem:[#allocation41] sm:$0xff] }
0x10e0   :  { %6150 = vmatmul.mubr.msk.f32.vlgmr.msra.gmra.mxu0 %vm1386_vm3, %v2701_v53  ;;  %6168 = vmatprep.subr.mxu0 %v8214_v21 }
0x10e1   :  { %6170 = vmatprep.mubr.msk.f32.mxu0 %vm8215_vm2, %v8214_v21  ;;  %6169 = vmatpush3.msk.msra.mxu0 %vm1936_vm5, %v2998_v54  ;;  %v2991_v54 = vld [vmem:[#allocation50] sm:$0xf] }
0x1171   :  { %v6090_v55 = vpop.f32.mrf.mxu1 }
0x1172   :  { %v2526_v9 = vadd.f32 %v6090_v55, %v8948_v29 }
0x1173   :  { %v2520_v56 = vpop.f32.mrf.mxu1 }
0x1174   :  { %v2560_v44 = vmul.f32 0.5, %v2526_v9 }
0x1175   :  { %v6093_v57 = vpop.f32.mrf.mxu1 }
0x1176   :  { %v2536_v1 = vadd.f32 %v6093_v57, %v8944_v27  ;;  %v2568_v27 = vmul.f32 0.70710677, %v2526_v9  ;;  %v2996_v57 = vld [vmem:[#allocation53 + $0x18] sm:$0xff] }
0x1177   :  { %v2530_v58 = vpop.f32.mrf.mxu1  ;;  %v3263_v9 = vld [vmem:[#allocation61 + $0x30] sm:$0xff] }
0x1178   :  { %v2531_v6 = vadd.f32 %v2530_v58, %v8946_v28  ;;  %v2562_v38 = vmul.f32 0.5, %v2536_v1  ;;  %v2994_v58 = vld [vmem:[#allocation53 + $0x8] sm:$0xff] }
0x1179   :  { %v6096_v59 = vpop.f32.mrf.mxu1 }
0x117a   :  { %v2546_v60 = vadd.f32 %v6096_v59, %v8940_v25  ;;  %v2570_v25 = vmul.f32 0.70710677, %v2536_v1  ;;  %v2569_v12 = vmul.f32 0.70710677, %v2531_v6  ;;  %v2561_v43 = vmul.f32 0.5, %v2531_v6  ;;  %v2993_v59 = vld [vmem:[#allocation53] sm:$0xff] }
0x117b   :  { %v2540_v61 = vpop.f32.mrf.mxu1  ;;  %v5553_v1 = vld [vmem:[#allocation52] ss:$0 sm:$0xff] }
0x117c   :  { %v2541_v62 = vadd.f32 %v2540_v61, %v8942_v26  ;;  %v2572_v63 = vmul.f32 0.70710677, %v2546_v60  ;;  %v2521_v26 = vadd.f32 %v2520_v56, %v8950_v30  ;;  %v2564_v30 = vmul.f32 0.5, %v2546_v60  ;;  %v2602_v60 = vpop.permute.xlu1 %2601 }
0x117d   :  { %v6099_v0 = vpop.f32.mrf.mxu1 }
0x117e   :  { %v2556_v3 = vadd.f32 %v6099_v0, %v8936_v23  ;;  %v2571_v4 = vmul.f32 0.70710677, %v2541_v62  ;;  %6574 = verf.f32 %v2572_v63  ;;  %v2567_v23 = vmul.f32 0.70710677, %v2521_v26 }
0x117f   :  { %v2550_v5 = vpop.f32.mrf.mxu1  ;;  %v2563_v35 = vmul.f32 0.5, %v2541_v62  ;;  %v2559_v48 = vmul.f32 0.5, %v2521_v26  ;;  %v3259_v26 = vld [vmem:[#allocation61 + $0x10] sm:$0xff] }
0x1180   :  { %v2574_v7 = vmul.f32 0.70710677, %v2556_v3  ;;  %v2551_v8 = vadd.f32 %v2550_v5, %v8938_v24  ;;  %v2566_v14 = vmul.f32 0.5, %v2556_v3 }
0x1182   :  { %6576 = verf.f32 %v2574_v7  ;;  %v2573_v11 = vmul.f32 0.70710677, %v2551_v8  ;;  %v2565_v18 = vmul.f32 0.5, %v2551_v8 }
0x1183   :  { %6578 = verf.f32 %v2571_v4  ;;  %v3249_v4 = vld [vmem:[#allocation59] sm:$0xff] }
0x1184   :  { %6580 = verf.f32 %v2573_v11  ;;  %v3261_v11 = vld [vmem:[#allocation61 + $0x20] sm:$0xff] }
0x1185   :  { %6582 = verf.f32 %v2570_v25 }
0x1186   :  { %6584 = verf.f32 %v2569_v12  ;;  %v3257_v12 = vld [vmem:[#allocation61] sm:$0xff] }
0x1187   :  { %6586 = verf.f32 %v2568_v27  ;;  %v4538_v27 = vld [vmem:[#allocation94 + $0x38] sm:$0xff] }
0x1188   :  { %6588 = verf.f32 %v2567_v23 }
0x118b   :  { %v6575_v28 = vpop.eup %6574 }
0x118c   :  { %v2588_v16 = vadd.f32 1.0, %v6575_v28 }
0x118e   :  { %v2596_v34 = vmul.f32 %v2588_v16, %v2564_v30  ;;  %v4844_v16 = vld [vmem:[%s9392_s13 + $0x28] sm:$0xff]  ;;  %v6654_v30 = vld [vmem:[#allocation2] sm:$0xff] }
0x118f   :  { %v6577_v13 = vpop.eup %6576 }
0x1190   :  { %v6579_v24 = vpop.eup %6578  ;;  %v2590_v15 = vadd.f32 1.0, %v6577_v13 }
0x1191   :  { %v6581_v29 = vpop.eup %6580  ;;  %v2587_v22 = vadd.f32 1.0, %v6579_v24  ;;  %v4536_v24 = vld [vmem:[#allocation94 + $0x28] sm:$0xff] }
0x1192   :  { %v2598_v17 = vmul.f32 %v2590_v15, %v2566_v14  ;;  %v2589_v19 = vadd.f32 1.0, %v6581_v29  ;;  %v6583_v20 = vpop.eup %6582  ;;  %v4534_v14 = vld [vmem:[#allocation94 + $0x18] sm:$0xff]  ;;  %v4532_v15 = vld [vmem:[#allocation94 + $0x8] sm:$0xff] }
0x1193   :  { %v6585_v32 = vpop.eup %6584  ;;  %v2586_v33 = vadd.f32 1.0, %v6583_v20  ;;  %v2595_v2 = vmul.f32 %v2587_v22, %v2563_v35  ;;  %v4846_v29 = vld [vmem:[%s9392_s13 + $0x38] sm:$0xff]  ;;  %v3253_v35 = vld [vmem:[#allocation59 + $0x20] sm:$0xff] }
0x1194   :  { %v2597_v31 = vmul.f32 %v2589_v19, %v2565_v18  ;;  %6101 = vmatpush3.msra.mxu1 %v2598_v17  ;;  %v6587_v37 = vpop.eup %6586  ;;  %v2585_v39 = vadd.f32 1.0, %v6585_v32  ;;  %v4842_v17 = vld [vmem:[%s9392_s13 + $0x18] sm:$0xff]  ;;  %v4840_v18 = vld [vmem:[%s9392_s13 + $0x8] sm:$0xff]  ;;  %v4848_v19 = vld [vmem:[%s9394_s21] sm:$0xff] }
0x1195   :  { %6102 = vmatprep.subr.mxu1 %v8214_v21  ;;  %v6589_v40 = vpop.eup %6588  ;;  %v2584_v41 = vadd.f32 1.0, %v6587_v37  ;;  %v2594_v42 = vmul.f32 %v2586_v33, %v2562_v38  ;;  %v3250_v32 = vld [vmem:[#allocation59 + $0x8] sm:$0xff]  ;;  %v3251_v33 = vld [vmem:[#allocation59 + $0x10] sm:$0xff] }
0x1196   :  { %6103 = vmatpush3.msra.mxu1 %v2597_v31  ;;  %v2583_v45 = vadd.f32 1.0, %v6589_v40  ;;  %v2593_v46 = vmul.f32 %v2585_v39, %v2561_v43  ;;  %v3254_v37 = vld [vmem:[#allocation59 + $0x28] sm:$0xff]  ;;  %v3255_v38 = vld [vmem:[#allocation59 + $0x30] sm:$0xff]  ;;  %v3256_v39 = vld [vmem:[#allocation59 + $0x38] sm:$0xff] }
0x1197   :  { %6104 = vmatprep.subr.mxu1 %v8214_v21  ;;  %v2592_v47 = vmul.f32 %v2584_v41, %v2560_v44  ;;  %v5556_v40 = vld [vmem:[#allocation55] ss:$0 sm:$0xff] }
0x1198   :  { %6105 = vmatpush3.msra.mxu1 %v2596_v34  ;;  %v2591_v50 = vmul.f32 %v2583_v45, %v2559_v48  ;;  %v3252_v34 = vld [vmem:[#allocation59 + $0x18] sm:$0xff]  ;;  %v3558_v48 = vld [vmem:[#allocation65 + $0x18] sm:$0xff] }
0x1199   :  { %6106 = vmatprep.subr.mxu1 %v8214_v21 }
0x119a   :  { %6107 = vmatpush3.msra.mxu1 %v2595_v2  ;;  %v5558_v2 = vld [vmem:[#allocation58] ss:$0 sm:$0xff] }
0x119b   :  { %6108 = vmatprep.subr.mxu1 %v8214_v21 }
0x119c   :  { %6109 = vmatpush3.msra.mxu1 %v2594_v42 }
0x119d   :  { %6110 = vmatprep.subr.mxu1 %v8214_v21 }
0x119e   :  { %6111 = vmatpush3.msra.mxu1 %v2593_v46  ;;  %v3560_v46 = vld [vmem:[#allocation65 + $0x28] sm:$0x3] }
0x119f   :  { %6112 = vmatprep.subr.mxu1 %v8214_v21 }
0x11a0   :  { %6113 = vmatpush3.msra.mxu1 %v2592_v47  ;;  %v2986_v51 = vpop.f32.mrf.mxu0  ;;  %v3559_v47 = vld [vmem:[#allocation65 + $0x20] sm:$0x3] }
0x11a1   :  { %v2987_v53 = vadd.f32 %v2986_v51, %v2915_v49  ;;  %6114 = vmatprep.subr.mxu1 %v8214_v21  ;;  %v3557_v49 = vld [vmem:[#allocation65 + $0x10] sm:$0xff] }
0x11a2   :  { %6115 = vmatpush3.msra.mxu1 %v2591_v50  ;;  %v6151_v55 = vpop.f32.mrf.mxu0  ;;  %v3305_v50 = vpop.permute.xlu0 %3304 }
0x11a3   :  { %v2990_v56 = vadd.f32 %v2987_v53, %v8873_v10  ;;  %6117 = vmatmul.mubr.msk.f32.vlgmr.msra.gmra.mxu1 %vm1386_vm3, %v2388_v52  ;;  %6152 = vmatprep.subr.mxu1 %v8214_v21  ;;  %v2995_v10 = vld [vmem:[#allocation53 + $0x10] sm:$0xff] }
0x11a4   :  { %6153 = vmatpush3.msk.msra.mxu1 %vm1936_vm5, %v2991_v54  ;;  %6154 = vmatprep.mubr.msk.f32.mxu1 %vm8215_vm2, %v8214_v21 }
0x11a5   :  { %6171 = vmatmul.mubr.msk.f32.vlgmr.msra.gmra.mxu0 %vm1932_vm6, %v2990_v56  ;;  %6157 = vmatprep.subr.mxu1 %v8214_v21 }
0x11a6   :  { %6175 = vmatprep.mubr.msk.f32.mxu0 %vm1211_vm1, %v3249_v4  ;;  %v3295_v54 = vpop.permute.xlu0 %3294 }
0x11a7   :  { %6155 = vmatmul.mubr.msk.f32.vlgmr.msra.gmra.mxu1 %vm1932_vm6, %v2990_v56 }
0x11a8   :  { %6165 = vmatprep.mubr.msk.f32.mxu1 %vm8215_vm2, %v8214_v21  ;;  %6158 = vmatpush3.msra.mxu1 %v2996_v57 }
0x11a9   :  { %6159 = vmatprep.subr.mxu1 %v8214_v21 }
0x11aa   :  { %6160 = vmatpush3.msra.mxu1 %v2995_v10 }
0x11ab   :  { %6161 = vmatprep.subr.mxu1 %v8214_v21 }
0x11ac   :  { %6162 = vmatpush3.msra.mxu1 %v2994_v58 }
0x11ad   :  { %6163 = vmatprep.subr.mxu1 %v8214_v21 }
0x11ae   :  { %6164 = vmatpush3.msra.mxu1 %v2993_v59  ;;  %v3285_v59 = vpop.permute.xlu0 %3284 }
0x11af   :  { %6187 = vmatprep.subr.mxu1 %v8214_v21 }
0x1263   :  { %v2673_v61 = vpop.f32.mrf.mxu1 }
0x1264   :  { %v2674_v62 = vadd.f32 %v2673_v61, %v2602_v60 }
0x1265   :  { %v6118_v63 = vpop.f32.mrf.mxu1  ;;  %v9009_v0 = vpop.f32.mrf.mxu0 }
0x1266   :  { %v2677_v3 = vadd.f32 %v2674_v62, %v8953_v36  ;;  %v3243_v42 = vadd.f32 %v5558_v2, %v9009_v0 }
0x1267   :  { %v3078_v5 = vpop.f32.mrf.mxu1  ;;  %v6172_v6 = vpop.f32.mrf.mxu0 }
0x1268   :  { %v3079_v7 = vadd.f32 %v5553_v1, %v3078_v5  ;;  %2679 = vrot.lane.b32.xlu1 %v2677_v3, %s8216_s25 }
0x1269   :  { %v6156_v8 = vpop.f32.mrf.mxu1 }
0x126a   :  { %v3083_v25 = vmul.f32 0.70710677, %v3079_v7  ;;  %v3082_v23 = vmul.f32 0.5, %v3079_v7 }
0x126c   :  { %6590 = verf.f32 %v3083_v25  ;;  %3299 = vperm.xlu1 %6533, %v3263_v9   ;;  %v3275_v9 = vpop.permute.xlu0 %3274 }
0x1270   :  { %3289 = vperm.xlu1 %6533, %v3261_v11  }
0x1274   :  { %3279 = vperm.xlu1 %6533, %v3259_v26  }
0x1278   :  { %3269 = vperm.xlu1 %6533, %v3257_v12  }
0x1279   :  { %v6591_v36 = vpop.eup %6590 }
0x127a   :  { %v3085_v28 = vadd.f32 1.0, %v6591_v36 }
0x127c   :  { %v3086_v13 = vmul.f32 %v3085_v28, %v3082_v23  ;;  %4578 = vperm.xlu1 %6533, %v4538_v27  }
0x127e   :  { %6166 = vmatmul.mubr.msk.f32.vlgmr.msra.gmra.mxu1 %vm3093_vm7, %v3086_v13 }
0x127f   :  { %6203 = vmatprep.mubr.msk.f32.mxu1 %vm8215_vm2, %v8214_v21 }
0x1280   :  { %4568 = vperm.xlu1 %6533, %v4536_v24  }
0x1284   :  { %4558 = vperm.xlu1 %6533, %v4534_v14  }
0x1288   :  { %4548 = vperm.xlu1 %6533, %v4532_v15  }
0x128c   :  { %4886 = vperm.xlu1 %6533, %v4846_v29  }
0x1290   :  { %4876 = vperm.xlu1 %6533, %v4844_v16  }
0x1294   :  { %4866 = vperm.xlu1 %6533, %v4842_v17  }
0x1298   :  { %4856 = vperm.xlu1 %6533, %v4840_v18  }
0x129c   :  { %5060 = vperm.xlu1 %6533, %v4848_v19  }
0x12da   :  { %v2680_v20 = vpop.permute.xlu1 %2679 }
0x12db   :  { %v2682_v22 = vsub.f32 %v6654_v30, %v2680_v20 }
0x12dd   :  { %2684 = vst.msk [vmem:[#allocation2] sm:$0xff] %vm2683_vm8, %v2682_v22 }
0x12e4   :  { %v9023_v31 = vld [vmem:[#allocation2] sm:$0xff] }
0x12e5   :  { %6173 = vmatprep.subr.mxu0 %v9023_v31 }
0x12e6   :  { %6174 = vmatpush3.msra.mxu0 %v9023_v31 }
0x12e7   :  { %6176 = vmatmul.mubr.msk.f32.vlgmr.msra.gmra.mxu0 %vm1211_vm1, %v3250_v32  ;;  %5570 = vmatprep.subr.msk.mxu0 %vm3601_vm9, %v3560_v46  ;;  %v3300_v51 = vpop.permute.xlu1 %3299 }
0x12e8   :  { %6178 = vmatprep.mubr.msk.f32.mxu0 %vm1211_vm1, %v3251_v33  ;;  %5571 = vmatpush1.msk.msra.mxu0 %vm3601_vm9, %v3559_v47 }
0x12e9   :  { %3636 = vmatprep.subr.mxu0 %v3558_v48 }
0x12ea   :  { %3637 = vmatpush1.msra.mxu0 %v3557_v49 }
0x12eb   :  { %6179 = vmatmul.mubr.msk.f32.gmra.mxu0 %vm1211_vm1, %v3252_v34  ;;  %v3290_v56 = vpop.permute.xlu1 %3289 }
0x12ec   :  { %6181 = vmatprep.mubr.msk.f32.mxu0 %vm1211_vm1, %v3253_v35 }
0x12ef   :  { %6182 = vmatmul.mubr.msk.f32.gmra.mxu0 %vm1211_vm1, %v3254_v37  ;;  %v3280_v62 = vpop.permute.xlu1 %3279 }
0x12f0   :  { %6184 = vmatprep.mubr.msk.f32.mxu0 %vm1211_vm1, %v3255_v38 }
0x12f3   :  { %6185 = vmatmul.mubr.msk.f32.gmra.mxu0 %vm1211_vm1, %v3256_v39  ;;  %v3270_v12 = vpop.permute.xlu1 %3269 }
0x12f4   :  { %3672 = vmatprep.mubr.f32.mxu0 %v8214_v21 }
0x133e   :  { %v3163_v41 = vpop.f32.mrf.mxu1 }
0x133f   :  { %v3164_v43 = vadd.f32 %v5556_v40, %v3163_v41 }
0x1340   :  { %v6167_v44 = vpop.f32.mrf.mxu1 }
0x1341   :  { %v9036_v45 = vadd.f32 %v3243_v42, %v3164_v43 }
0x13a7   :  { %v6177_v52 = vpop.f32.mrf.mxu0 }
0x13a8   :  { %v3403_v25 = vadd.f32 %v6177_v52, %v3275_v9  ;;  %v3565_v9 = vld [vmem:[#allocation68 + $0x18] sm:$0xff] }
0x13a9   :  { %v3397_v53 = vpop.f32.mrf.mxu0 }
0x13aa   :  { %v3398_v36 = vadd.f32 %v3397_v53, %v3270_v12  ;;  %v3445_v23 = vmul.f32 0.70710677, %v3403_v25  ;;  %v3437_v47 = vmul.f32 0.5, %v3403_v25  ;;  %v3265_v53 = vld [vmem:[#allocation62] sm:$0xff]  ;;  %v3564_v25 = vld [vmem:[#allocation68 + $0x10] sm:$0xff] }
0x13ab   :  { %v6180_v55 = vpop.f32.mrf.mxu0  ;;  %v3584_v12 = vld [vmem:[#allocation68 + $0xb0] sm:$0xff] }
0x13ac   :  { %v3413_v1 = vadd.f32 %v6180_v55, %v3285_v59  ;;  %v3444_v28 = vmul.f32 0.70710677, %v3398_v36  ;;  %v3555_v55 = vld [vmem:[#allocation65] sm:$0xff]  ;;  %v3573_v59 = vld [vmem:[#allocation68 + $0x58] sm:$0xff] }
0x13ad   :  { %v3407_v57 = vpop.f32.mrf.mxu0 }
0x13ae   :  { %v3408_v6 = vadd.f32 %v3407_v57, %v3280_v62  ;;  %v3447_v11 = vmul.f32 0.70710677, %v3413_v1  ;;  %v3439_v2 = vmul.f32 0.5, %v3413_v1  ;;  %v3576_v57 = vld [vmem:[#allocation68 + $0x70] sm:$0xff]  ;;  %v3570_v62 = vld [vmem:[#allocation68 + $0x40] sm:$0xff]  ;;  %v3567_v1 = vld [vmem:[#allocation68 + $0x28] sm:$0xff] }
0x13af   :  { %v6183_v10 = vpop.f32.mrf.mxu0 }
0x13b0   :  { %v3423_v58 = vadd.f32 %v6183_v10, %v3295_v54  ;;  %v3446_v27 = vmul.f32 0.70710677, %v3408_v6  ;;  %v3438_v46 = vmul.f32 0.5, %v3408_v6  ;;  %v3556_v54 = vld [vmem:[#allocation65 + $0x8] sm:$0xff]  ;;  %v3575_v10 = vld [vmem:[#allocation68 + $0x68] sm:$0xff] }
0x13b1   :  { %v3417_v60 = vpop.f32.mrf.mxu0  ;;  %3638 = vmatprep.subr.mxu0 %v3556_v54  ;;  %v3782_v54 = vld [vmem:[#allocation74 + $0x48] sm:$0xff] }
0x13b2   :  { %v3418_v61 = vadd.f32 %v3417_v60, %v3290_v56  ;;  %v3449_v63 = vmul.f32 0.70710677, %v3423_v58  ;;  %v3441_v22 = vmul.f32 0.5, %v3423_v58  ;;  %3639 = vmatpush1.msra.mxu0 %v3555_v55  ;;  %v3577_v56 = vld [vmem:[#allocation68 + $0x78] sm:$0xff]  ;;  %v3574_v58 = vld [vmem:[#allocation68 + $0x60] sm:$0xff]  ;;  %v3572_v60 = vld [vmem:[#allocation68 + $0x50] sm:$0xff] }
0x13b3   :  { %v6186_v0 = vpop.f32.mrf.mxu0  ;;  %6206 = vmatprep.subr.mxu0 %v8214_v21  ;;  %v3781_v55 = vld [vmem:[#allocation74 + $0x40] sm:$0xff] }
0x13b4   :  { %v3433_v3 = vadd.f32 %v6186_v0, %v3305_v50  ;;  %v3448_v4 = vmul.f32 0.70710677, %v3418_v61  ;;  %6592 = verf.f32 %v3449_v63  ;;  %v3440_v38 = vmul.f32 0.5, %v3418_v61  ;;  %v3571_v61 = vld [vmem:[#allocation68 + $0x48] sm:$0xff]  ;;  %v3569_v63 = vld [vmem:[#allocation68 + $0x38] sm:$0xff]  ;;  %v3568_v0 = vld [vmem:[#allocation68 + $0x30] sm:$0xff] }
0x13b5   :  { %v3427_v5 = vpop.f32.mrf.mxu0 }
0x13b6   :  { %v3451_v7 = vmul.f32 0.70710677, %v3433_v3  ;;  %v3428_v8 = vadd.f32 %v3427_v5, %v3300_v51  ;;  %v3443_v15 = vmul.f32 0.5, %v3433_v3  ;;  %v3436_v51 = vmul.f32 0.5, %v3398_v36  ;;  %v3479_v3 = vpop.permute.xlu0 %3478  ;;  %v3583_v36 = vld [vmem:[#allocation68 + $0xa8] sm:$0xff] }
0x13b8   :  { %6594 = verf.f32 %v3451_v7  ;;  %v3450_v26 = vmul.f32 0.70710677, %v3428_v8  ;;  %v3442_v19 = vmul.f32 0.5, %v3428_v8  ;;  %v3566_v8 = vld [vmem:[#allocation68 + $0x20] sm:$0xff] }
0x13b9   :  { %6596 = verf.f32 %v3448_v4 }
0x13ba   :  { %6598 = verf.f32 %v3450_v26  ;;  %v3585_v26 = vld [vmem:[#allocation68 + $0xb8] sm:$0xff] }
0x13bb   :  { %6600 = verf.f32 %v3447_v11  ;;  %v3562_v11 = vld [vmem:[#allocation68] sm:$0xff] }
0x13bc   :  { %6602 = verf.f32 %v3446_v27  ;;  %v3582_v27 = vld [vmem:[#allocation68 + $0xa0] sm:$0xff] }
0x13bd   :  { %6604 = verf.f32 %v3445_v23  ;;  %v3581_v23 = vld [vmem:[#allocation68 + $0x98] sm:$0xff] }
0x13be   :  { %6606 = verf.f32 %v3444_v28  ;;  %v3580_v28 = vld [vmem:[#allocation68 + $0x90] sm:$0xff] }
0x13c1   :  { %v6593_v13 = vpop.eup %6592 }
0x13c2   :  { %v3465_v17 = vadd.f32 1.0, %v6593_v13  ;;  %v3579_v13 = vld [vmem:[#allocation68 + $0x88] sm:$0xff] }
0x13c4   :  { %v3473_v37 = vmul.f32 %v3465_v17, %v3441_v22 }
0x13c5   :  { %v6595_v24 = vpop.eup %6594 }
0x13c6   :  { %v6597_v14 = vpop.eup %6596  ;;  %v3467_v29 = vadd.f32 1.0, %v6595_v24  ;;  %v3578_v24 = vld [vmem:[#allocation68 + $0x80] sm:$0xff] }
0x13c7   :  { %v6599_v16 = vpop.eup %6598  ;;  %v3464_v32 = vadd.f32 1.0, %v6597_v14  ;;  %v3588_v14 = vlaneseq }
0x13c8   :  { %v3475_v18 = vmul.f32 %v3467_v29, %v3443_v15  ;;  %v3466_v20 = vadd.f32 1.0, %v6599_v16  ;;  %v6601_v30 = vpop.eup %6600  ;;  %v3561_v16 = vld [vmem:[#allocation67] sm:$0x3] }
0x13c9   :  { %v6603_v34 = vpop.eup %6602  ;;  %v3463_v35 = vadd.f32 1.0, %v6601_v30  ;;  %v3472_v41 = vmul.f32 %v3464_v32, %v3440_v38  ;;  %v9080_v15 = vshrl.u32 %v3588_v14, 7  ;;  %v4128_v14 = vld [vmem:[#allocation82 + $0x10] sm:$0x3] }
0x13ca   :  { %v3474_v33 = vmul.f32 %v3466_v20, %v3442_v19  ;;  %6188 = vmatpush3.msra.mxu1 %v3475_v18  ;;  %v6605_v39 = vpop.eup %6604  ;;  %v3462_v40 = vadd.f32 1.0, %v6603_v34 }
0x13cb   :  { %6189 = vmatprep.subr.mxu1 %v8214_v21  ;;  %v6607_v42 = vpop.eup %6606  ;;  %v3461_v43 = vadd.f32 1.0, %v6605_v39  ;;  %v3471_v44 = vmul.f32 %v3463_v35, %v3439_v2  ;;  %v3590_v29 = vsub.s32 0, %v9080_v15  ;;  %v3594_v17 = vsub.s32 1, %v9080_v15  ;;  %v4523_v15 = vld [vmem:[#allocation92] sm:$0xff] }
0x13cc   :  { %6190 = vmatpush3.msra.mxu1 %v3474_v33  ;;  %v3460_v48 = vadd.f32 1.0, %v6607_v42  ;;  %v3470_v49 = vmul.f32 %v3462_v40, %v3438_v46  ;;  %v3769_v46 = vld [vmem:[#allocation71] sm:$0xff] }
0x13cd   :  { %6191 = vmatprep.subr.mxu1 %v8214_v21  ;;  %v3469_v50 = vmul.f32 %v3461_v43, %v3437_v47  ;;  %v3591_v18 = vrot.slane %v3561_v16, %v3590_v29  ;;  %v3595_v19 = vrot.slane %v3561_v16, %v3594_v17  ;;  %v3771_v43 = vld [vmem:[#allocation71 + $0x10] sm:$0x3]  ;;  %v5573_v47 = vld [vmem:[#allocation70] ss:$0 sm:$0xff] }
0x13ce   :  { %6192 = vmatpush3.msra.mxu1 %v3473_v37  ;;  %v3468_v52 = vmul.f32 %v3460_v48, %v3436_v51 }
0x13cf   :  { %6193 = vmatprep.subr.mxu1 %v8214_v21 }
0x13d0   :  { %6194 = vmatpush3.msra.mxu1 %v3472_v41 }
0x13d1   :  { %6195 = vmatprep.subr.mxu1 %v8214_v21 }
0x13d2   :  { %6196 = vmatpush3.msra.mxu1 %v3471_v44  ;;  %v3770_v44 = vld [vmem:[#allocation71 + $0x8] sm:$0xff] }
0x13d3   :  { %6197 = vmatprep.subr.mxu1 %v8214_v21 }
0x13d4   :  { %6198 = vmatpush3.msra.mxu1 %v3470_v49 }
0x13d5   :  { %6199 = vmatprep.subr.mxu1 %v8214_v21 }
0x13d6   :  { %6200 = vmatpush3.msra.mxu1 %v3469_v50 }
0x13d7   :  { %6201 = vmatprep.subr.mxu1 %v8214_v21 }
0x13d8   :  { %6202 = vmatpush3.msra.mxu1 %v3468_v52  ;;  %v3784_v52 = vld [vmem:[#allocation74 + $0x58] sm:$0xff] }
0x13d9   :  { %6204 = vmatmul.mubr.msk.f32.vlgmr.msra.gmra.mxu1 %vm1386_vm3, %v3265_v53  ;;  %3698 = vmatprep.subr.mxu1 %v8214_v21  ;;  %v3783_v53 = vld [vmem:[#allocation74 + $0x50] sm:$0xff] }
0x13da   :  { %3699 = vmatpush1.msra.mxu1 %v3577_v56  ;;  %v3780_v56 = vld [vmem:[#allocation74 + $0x38] sm:$0xff] }
0x13db   :  { %3700 = vmatprep.subr.mxu1 %v8214_v21 }
0x13dc   :  { %3701 = vmatpush1.msra.mxu1 %v3576_v57  ;;  %v3779_v57 = vld [vmem:[#allocation74 + $0x30] sm:$0xff] }
0x13dd   :  { %3702 = vmatprep.subr.mxu1 %v8214_v21 }
0x13de   :  { %3703 = vmatpush1.msra.mxu1 %v3575_v10  ;;  %v3778_v10 = vld [vmem:[#allocation74 + $0x28] sm:$0xff] }
0x13df   :  { %3704 = vmatprep.subr.mxu1 %v8214_v21 }
0x13e0   :  { %3705 = vmatpush1.msra.mxu1 %v3574_v58  ;;  %v3777_v58 = vld [vmem:[#allocation74 + $0x20] sm:$0xff] }
0x13e1   :  { %3706 = vmatprep.subr.mxu1 %v8214_v21 }
0x13e2   :  { %3707 = vmatpush1.msra.mxu1 %v3573_v59  ;;  %v3776_v59 = vld [vmem:[#allocation74 + $0x18] sm:$0xff] }
0x13e3   :  { %3708 = vmatprep.subr.mxu1 %v8214_v21 }
0x13e4   :  { %3709 = vmatpush1.msra.mxu1 %v3572_v60  ;;  %v3775_v60 = vld [vmem:[#allocation74 + $0x10] sm:$0xff] }
0x13e5   :  { %3710 = vmatprep.subr.mxu1 %v8214_v21 }
0x13e6   :  { %3711 = vmatpush1.msra.mxu1 %v3571_v61  ;;  %v3774_v61 = vld [vmem:[#allocation74 + $0x8] sm:$0xff] }
0x13e7   :  { %3712 = vmatprep.subr.mxu1 %v8214_v21 }
0x13e8   :  { %3713 = vmatpush1.msra.mxu1 %v3570_v62  ;;  %v3773_v62 = vld [vmem:[#allocation74] sm:$0xff] }
0x13e9   :  { %3714 = vmatprep.subr.mxu1 %v8214_v21 }
0x13ea   :  { %3715 = vmatpush1.msra.mxu1 %v3569_v63  ;;  %v5575_v63 = vld [vmem:[#allocation73] ss:$0 sm:$0xff] }
0x13eb   :  { %3716 = vmatprep.subr.mxu1 %v8214_v21 }
0x13ec   :  { %3717 = vmatpush1.msra.mxu1 %v3568_v0 }
0x13ed   :  { %3718 = vmatprep.subr.mxu1 %v8214_v21 }
0x13ee   :  { %3719 = vmatpush1.msra.mxu1 %v3567_v1 }
0x13ef   :  { %3720 = vmatprep.subr.mxu1 %v8214_v21 }
0x13f0   :  { %3721 = vmatpush1.msra.mxu1 %v3566_v8 }
0x13f1   :  { %3722 = vmatprep.subr.mxu1 %v8214_v21 }
0x13f2   :  { %3723 = vmatpush1.msra.mxu1 %v3565_v9  ;;  %v3956_v9 = vld [vmem:[#allocation77 + $0x10] sm:$0x3] }
0x13f3   :  { %3724 = vmatprep.subr.mxu1 %v8214_v21 }
0x13f4   :  { %3725 = vmatpush1.msra.mxu1 %v3564_v25  ;;  %v3955_v25 = vld [vmem:[#allocation77 + $0x8] sm:$0xff] }
0x13f5   :  { %3726 = vmatprep.subr.mxu1 %v8214_v21 }
0x1499   :  { %v3550_v4 = vpop.f32.mrf.mxu1 }
0x149a   :  { %v3551_v5 = vadd.f32 %v3550_v4, %v3479_v3 }
0x149b   :  { %v6205_v6 = vpop.f32.mrf.mxu1 }
0x149c   :  { %v9062_v7 = vadd.f32 %v3551_v5, %v9023_v31  ;;  %v3563_v31 = vld [vmem:[#allocation68 + $0x8] sm:$0xff] }
0x149d   :  { %3727 = vmatpush1.msra.mxu1 %v3563_v31  ;;  %v3954_v31 = vld [vmem:[#allocation77] sm:$0xff] }
0x149e   :  { %5572 = vmatmul.mubr.msk.f32.vlgmr.msra.gmra.mxu0 %vm1146_vm0, %v9062_v7  ;;  %3728 = vmatprep.subr.mxu1 %v8214_v21 }
0x149f   :  { %6212 = vmatprep.mubr.msk.f32.mxu0 %vm8215_vm2, %v8214_v21  ;;  %3729 = vmatpush1.msra.mxu1 %v3562_v11  ;;  %v5578_v11 = vld [vmem:[#allocation76] ss:$0 sm:$0xff] }
0x14a0   :  { %3746 = vmatprep.subr.mxu1 %v8214_v21  ;;  %6207 = vmatpush3.msk.msra.mxu0 %vm3601_vm9, %v3771_v43  ;;  %v4131_v43 = vld [vmem:[%s9396_s20 + $0x8] sm:$0xff] }
0x14a1   :  { %3747 = vmatpush2.msra.mxu1 %v3585_v26  ;;  %6208 = vmatprep.subr.mxu0 %v8214_v21 }
0x14a2   :  { %3748 = vmatprep.subr.mxu1 %v8214_v21  ;;  %6209 = vmatpush3.msra.mxu0 %v3770_v44  ;;  %v4130_v44 = vld [vmem:[%s9396_s20] sm:$0xff] }
0x14a3   :  { %3749 = vmatpush2.msra.mxu1 %v3584_v12  ;;  %6210 = vmatprep.subr.mxu0 %v8214_v21 }
0x14a4   :  { %3750 = vmatprep.subr.mxu1 %v8214_v21  ;;  %6211 = vmatpush3.msra.mxu0 %v3769_v46  ;;  %v4315_v46 = vld [vmem:[#allocation86 + $0x28] sm:$0x3] }
0x14a5   :  { %3751 = vmatpush2.msra.mxu1 %v3583_v36  ;;  %6215 = vmatprep.subr.mxu0 %v8214_v21 }
0x14a6   :  { %3752 = vmatprep.subr.mxu1 %v8214_v21 }
0x14a7   :  { %3753 = vmatpush2.msra.mxu1 %v3582_v27 }
0x14a8   :  { %3754 = vmatprep.subr.mxu1 %v8214_v21 }
0x14a9   :  { %3755 = vmatpush2.msra.mxu1 %v3581_v23  ;;  %v4040_v23 = vld [vmem:[#allocation79] sm:$0x7] }
0x14aa   :  { %3756 = vmatprep.subr.mxu1 %v8214_v21 }
0x14ab   :  { %3757 = vmatpush2.msra.mxu1 %v3580_v28  ;;  %v5580_v28 = vld [vmem:[%s9395_s10] ss:$0 sm:$0xff] }
0x14ac   :  { %3758 = vmatprep.subr.mxu1 %v8214_v21 }
0x14ad   :  { %3759 = vmatpush2.msra.mxu1 %v3579_v13 }
0x14ae   :  { %3760 = vmatprep.subr.mxu1 %v8214_v21 }
0x14af   :  { %3761 = vmatpush2.msra.mxu1 %v3578_v24 }
0x14b0   :  { %5591 = vmatprep.subr.msk.mxu1 %vm3601_vm9, %v4315_v46 }
0x155e   :  { %v3674_v20 = vpop.f32.mrf.mxu0 }
0x155f   :  { %v3675_v30 = vadd.f32 %v3674_v20, %v3591_v18  ;;  %v4127_v18 = vld [vmem:[#allocation82 + $0x8] sm:$0xff]  ;;  %v5583_v20 = vld [vmem:[#allocation80] ss:$0 sm:$0xff] }
0x1560   :  { %v3676_v22 = vpop.f32.mrf.mxu0 }
0x1561   :  { %v3681_v32 = vmul.f32 0.70710677, %v3675_v30  ;;  %v3677_v33 = vadd.f32 %v3676_v22, %v3595_v19  ;;  %v3679_v40 = vmul.f32 0.5, %v3675_v30  ;;  %v4126_v19 = vld [vmem:[#allocation82] sm:$0xff] }
0x1563   :  { %6608 = verf.f32 %v3681_v32  ;;  %v3682_v34 = vmul.f32 0.70710677, %v3677_v33  ;;  %v3680_v39 = vmul.f32 0.5, %v3677_v33  ;;  %v4141_v33 = vld [vmem:[%s9396_s20 + $0x58] sm:$0xff] }
0x1565   :  { %6610 = verf.f32 %v3682_v34  ;;  %v4140_v34 = vld [vmem:[%s9396_s20 + $0x50] sm:$0xff] }
0x1570   :  { %v6609_v35 = vpop.eup %6608 }
0x1571   :  { %v3685_v38 = vadd.f32 1.0, %v6609_v35  ;;  %v4139_v35 = vld [vmem:[%s9396_s20 + $0x48] sm:$0xff] }
0x1572   :  { %v6611_v37 = vpop.eup %6610 }
0x1573   :  { %v3686_v2 = vadd.f32 1.0, %v6611_v37  ;;  %v3687_v42 = vmul.f32 %v3685_v38, %v3679_v40  ;;  %v4138_v37 = vld [vmem:[%s9396_s20 + $0x40] sm:$0xff]  ;;  %v4137_v38 = vld [vmem:[%s9396_s20 + $0x38] sm:$0xff] }
0x1574   :  { %v4134_v40 = vld [vmem:[%s9396_s20 + $0x20] sm:$0xff] }
0x1575   :  { %v3688_v41 = vmul.f32 %v3686_v2, %v3680_v39  ;;  %v4136_v39 = vld [vmem:[%s9396_s20 + $0x30] sm:$0xff]  ;;  %v4135_v2 = vld [vmem:[%s9396_s20 + $0x28] sm:$0xff] }
0x1577   :  { %5574 = vmatprep.mubr.msk.f32.mxu1 %vm1386_vm3, %v3688_v41  ;;  %v4133_v41 = vld [vmem:[%s9396_s20 + $0x18] sm:$0xff] }
0x1578   :  { %3763 = vmatmul.mubr.f32.vlgmr.msra.gmra.mxu1 %v3687_v42  ;;  %v4132_v42 = vld [vmem:[%s9396_s20 + $0x10] sm:$0xff] }
0x1579   :  { %4426 = vmatprep.mubr.f32.mxu1 %v8214_v21 }
0x1638   :  { %v3764_v48 = vpop.f32.mrf.mxu1 }
0x1639   :  { %v3765_v49 = vadd.f32 %v5573_v47, %v3764_v48  ;;  %v5586_v47 = vld [vmem:[#allocation83] ss:$0 sm:$0xff] }
0x163a   :  { %v3766_v50 = vpop.f32.mrf.mxu1 }
0x163b   :  { %v9095_v51 = vadd.f32 %v3765_v49, %v9062_v7 }
0x163d   :  { %6213 = vmatmul.mubr.msk.f32.vlgmr.msra.gmra.mxu0 %vm1146_vm0, %v9095_v51 }
0x163e   :  { %6239 = vmatprep.mubr.msk.f32.mxu0 %vm8215_vm2, %v8214_v21  ;;  %6216 = vmatpush3.msra.mxu0 %v3784_v52 }
0x163f   :  { %6217 = vmatprep.subr.mxu0 %v8214_v21 }
0x1640   :  { %6218 = vmatpush3.msra.mxu0 %v3783_v53 }
0x1641   :  { %6219 = vmatprep.subr.mxu0 %v8214_v21 }
0x1642   :  { %6220 = vmatpush3.msra.mxu0 %v3782_v54 }
0x1643   :  { %6221 = vmatprep.subr.mxu0 %v8214_v21 }
0x1644   :  { %6222 = vmatpush3.msra.mxu0 %v3781_v55 }
0x1645   :  { %6223 = vmatprep.subr.mxu0 %v8214_v21 }
0x1646   :  { %6224 = vmatpush3.msra.mxu0 %v3780_v56  ;;  %v4314_v56 = vld [vmem:[#allocation86 + $0x20] sm:$0x3] }
0x1647   :  { %6225 = vmatprep.subr.mxu0 %v8214_v21  ;;  %5592 = vmatpush1.msk.msra.mxu1 %vm3601_vm9, %v4314_v56  ;;  %v4528_v56 = vld [vmem:[#allocation92 + $0x28] sm:$0xff] }
0x1648   :  { %6226 = vmatpush3.msra.mxu0 %v3779_v57  ;;  %v4313_v57 = vld [vmem:[#allocation86 + $0x18] sm:$0xff] }
0x1649   :  { %6227 = vmatprep.subr.mxu0 %v8214_v21  ;;  %4390 = vmatprep.subr.mxu1 %v4313_v57  ;;  %v4529_v57 = vld [vmem:[#allocation92 + $0x30] sm:$0xff] }
0x164a   :  { %6228 = vmatpush3.msra.mxu0 %v3778_v10  ;;  %v4312_v10 = vld [vmem:[#allocation86 + $0x10] sm:$0xff] }
0x164b   :  { %6229 = vmatprep.subr.mxu0 %v8214_v21  ;;  %4391 = vmatpush1.msra.mxu1 %v4312_v10  ;;  %v4530_v10 = vld [vmem:[#allocation92 + $0x38] sm:$0xff] }
0x164c   :  { %6230 = vmatpush3.msra.mxu0 %v3777_v58  ;;  %v4311_v58 = vld [vmem:[#allocation86 + $0x8] sm:$0xff] }
0x164d   :  { %6231 = vmatprep.subr.mxu0 %v8214_v21  ;;  %4392 = vmatprep.subr.mxu1 %v4311_v58  ;;  %v4579_v58 = vpop.permute.xlu1 %4578 }
0x164e   :  { %6232 = vmatpush3.msra.mxu0 %v3776_v59  ;;  %v4310_v59 = vld [vmem:[#allocation86] sm:$0xff] }
0x164f   :  { %6233 = vmatprep.subr.mxu0 %v8214_v21  ;;  %4393 = vmatpush1.msra.mxu1 %v4310_v59  ;;  %v4574_v59 = vpop.permute.xlu0 %4573 }
0x1650   :  { %6234 = vmatpush3.msra.mxu0 %v3775_v60  ;;  %4452 = vmatprep.subr.mxu1 %v8214_v21  ;;  %v5589_v60 = vld [vmem:[#allocation85] ss:$0 sm:$0xff] }
0x1651   :  { %6235 = vmatprep.subr.mxu0 %v8214_v21 }
0x1652   :  { %6236 = vmatpush3.msra.mxu0 %v3774_v61 }
0x1653   :  { %6237 = vmatprep.subr.mxu0 %v8214_v21 }
0x1654   :  { %6238 = vmatpush3.msra.mxu0 %v3773_v62 }
0x1655   :  { %6242 = vmatprep.subr.mxu0 %v8214_v21 }
0x16fd   :  { %v3864_v0 = vpop.f32.mrf.mxu0 }
0x16fe   :  { %v3865_v1 = vadd.f32 %v5575_v63, %v3864_v0 }
0x16ff   :  { %v6214_v3 = vpop.f32.mrf.mxu0 }
0x1700   :  { %v3869_v4 = vmul.f32 0.70710677, %v3865_v1  ;;  %v3868_v6 = vmul.f32 0.5, %v3865_v1  ;;  %v4332_v1 = vld [vmem:[#allocation89 + $0x78] sm:$0xff]  ;;  %v4331_v3 = vld [vmem:[#allocation89 + $0x70] sm:$0xff] }
0x1702   :  { %6612 = verf.f32 %v3869_v4  ;;  %v4330_v4 = vld [vmem:[#allocation89 + $0x68] sm:$0xff] }
0x170f   :  { %v6613_v5 = vpop.eup %6612 }
0x1710   :  { %v3871_v7 = vadd.f32 1.0, %v6613_v5  ;;  %v4329_v5 = vld [vmem:[#allocation89 + $0x60] sm:$0xff] }
0x1712   :  { %v3872_v8 = vmul.f32 %v3871_v7, %v3868_v6  ;;  %v4328_v6 = vld [vmem:[#allocation89 + $0x58] sm:$0xff]  ;;  %v4327_v7 = vld [vmem:[#allocation89 + $0x50] sm:$0xff] }
0x1714   :  { %6240 = vmatmul.mubr.msk.f32.vlgmr.msra.gmra.mxu0 %vm3879_vm10, %v3872_v8  ;;  %v4326_v8 = vld [vmem:[#allocation89 + $0x48] sm:$0xff] }
0x1715   :  { %6248 = vmatprep.mubr.msk.f32.mxu0 %vm8215_vm2, %v8214_v21  ;;  %6243 = vmatpush3.msk.msra.mxu0 %vm3601_vm9, %v3956_v9  ;;  %v4325_v9 = vld [vmem:[#allocation89 + $0x40] sm:$0xff] }
0x1716   :  { %6244 = vmatprep.subr.mxu0 %v8214_v21 }
0x1717   :  { %6245 = vmatpush3.msra.mxu0 %v3955_v25  ;;  %v4324_v25 = vld [vmem:[#allocation89 + $0x38] sm:$0xff] }
0x1718   :  { %6246 = vmatprep.subr.mxu0 %v8214_v21 }
0x1719   :  { %6247 = vmatpush3.msra.mxu0 %v3954_v31  ;;  %v4323_v31 = vld [vmem:[#allocation89 + $0x30] sm:$0xff] }
0x171a   :  { %6251 = vmatprep.subr.mxu0 %v8214_v21 }
0x17d4   :  { %v3949_v26 = vpop.f32.mrf.mxu0 }
0x17d5   :  { %v3950_v12 = vadd.f32 %v5578_v11, %v3949_v26  ;;  %v4322_v11 = vld [vmem:[#allocation89 + $0x28] sm:$0xff]  ;;  %v4321_v26 = vld [vmem:[#allocation89 + $0x20] sm:$0xff] }
0x17d6   :  { %v6241_v36 = vpop.f32.mrf.mxu0 }
0x17d7   :  { %v3953_v27 = vadd.f32 %v3950_v12, %v9095_v51  ;;  %v4320_v12 = vld [vmem:[#allocation89 + $0x18] sm:$0xff]  ;;  %v4319_v36 = vld [vmem:[#allocation89 + $0x10] sm:$0xff] }
0x17d9   :  { %6249 = vmatmul.mubr.msk.f32.vlgmr.msra.gmra.mxu0 %vm1146_vm0, %v3953_v27  ;;  %v4318_v27 = vld [vmem:[#allocation89 + $0x8] sm:$0xff] }
0x17da   :  { %6253 = vmatprep.mubr.msk.f32.mxu0 %vm8215_vm2, %v8214_v21  ;;  %6252 = vmatpush3.msk.msra.mxu0 %vm4052_vm11, %v4040_v23  ;;  %v4317_v23 = vld [vmem:[#allocation89] sm:$0xff] }
0x17db   :  { %6256 = vmatprep.subr.mxu0 %v8214_v21 }
0x1899   :  { %v4036_v13 = vpop.f32.mrf.mxu0 }
0x189a   :  { %v9127_v24 = vadd.f32 %v5580_v28, %v4036_v13  ;;  %v4340_v28 = vld [vmem:[#allocation89 + $0xb8] sm:$0xff]  ;;  %v4339_v13 = vld [vmem:[#allocation89 + $0xb0] sm:$0xff] }
0x189b   :  { %v6250_v16 = vpop.f32.mrf.mxu0 }
0x189c   :  { %6254 = vmatmul.mubr.msk.f32.vlgmr.msra.gmra.mxu0 %vm4048_vm12, %v9127_v24  ;;  %v4337_v16 = vld [vmem:[#allocation89 + $0xa0] sm:$0xff] }
0x189d   :  { %6257 = vmatpush3.msk.msra.mxu0 %vm3601_vm9, %v4128_v14  ;;  %6262 = vmatprep.mubr.msk.f32.mxu0 %vm8215_vm2, %v8214_v21  ;;  %v4338_v14 = vld [vmem:[#allocation89 + $0xa8] sm:$0xff] }
0x189e   :  { %6258 = vmatprep.subr.mxu0 %v8214_v21 }
0x189f   :  { %6259 = vmatpush3.msra.mxu0 %v4127_v18  ;;  %v4336_v18 = vld [vmem:[#allocation89 + $0x98] sm:$0xff] }
0x18a0   :  { %6260 = vmatprep.subr.mxu0 %v8214_v21 }
0x18a1   :  { %6261 = vmatpush3.msra.mxu0 %v4126_v19  ;;  %v4335_v19 = vld [vmem:[#allocation89 + $0x90] sm:$0xff] }
0x18a2   :  { %6265 = vmatprep.subr.mxu0 %v8214_v21 }
0x195c   :  { %v4122_v30 = vpop.f32.mrf.mxu0 }
0x195d   :  { %v9137_v22 = vadd.f32 %v5583_v20, %v4122_v30  ;;  %v4334_v20 = vld [vmem:[#allocation89 + $0x88] sm:$0xff]  ;;  %v4333_v30 = vld [vmem:[#allocation89 + $0x80] sm:$0xff] }
0x195e   :  { %v6255_v32 = vpop.f32.mrf.mxu0 }
0x195f   :  { %6263 = vmatmul.mubr.msk.f32.vlgmr.msra.gmra.mxu0 %vm1146_vm0, %v9137_v22 }
0x1960   :  { %6289 = vmatprep.mubr.msk.f32.mxu0 %vm8215_vm2, %v8214_v21  ;;  %6266 = vmatpush3.msra.mxu0 %v4141_v33 }
0x1961   :  { %6267 = vmatprep.subr.mxu0 %v8214_v21 }
0x1962   :  { %6268 = vmatpush3.msra.mxu0 %v4140_v34 }
0x1963   :  { %6269 = vmatprep.subr.mxu0 %v8214_v21 }
0x1964   :  { %6270 = vmatpush3.msra.mxu0 %v4139_v35 }
0x1965   :  { %6271 = vmatprep.subr.mxu0 %v8214_v21 }
0x1966   :  { %6272 = vmatpush3.msra.mxu0 %v4138_v37 }
0x1967   :  { %6273 = vmatprep.subr.mxu0 %v8214_v21 }
0x1968   :  { %6274 = vmatpush3.msra.mxu0 %v4137_v38 }
0x1969   :  { %6275 = vmatprep.subr.mxu0 %v8214_v21 }
0x196a   :  { %6276 = vmatpush3.msra.mxu0 %v4136_v39 }
0x196b   :  { %6277 = vmatprep.subr.mxu0 %v8214_v21 }
0x196c   :  { %6278 = vmatpush3.msra.mxu0 %v4135_v2 }
0x196d   :  { %6279 = vmatprep.subr.mxu0 %v8214_v21 }
0x196e   :  { %6280 = vmatpush3.msra.mxu0 %v4134_v40 }
0x196f   :  { %6281 = vmatprep.subr.mxu0 %v8214_v21 }
0x1970   :  { %6282 = vmatpush3.msra.mxu0 %v4133_v41 }
0x1971   :  { %6283 = vmatprep.subr.mxu0 %v8214_v21 }
0x1972   :  { %6284 = vmatpush3.msra.mxu0 %v4132_v42 }
0x1973   :  { %6285 = vmatprep.subr.mxu0 %v8214_v21 }
0x1974   :  { %6286 = vmatpush3.msra.mxu0 %v4131_v43 }
0x1975   :  { %6287 = vmatprep.subr.mxu0 %v8214_v21 }
0x1976   :  { %6288 = vmatpush3.msra.mxu0 %v4130_v44 }
0x1a1f   :  { %v4221_v48 = vpop.f32.mrf.mxu0 }
0x1a20   :  { %v4222_v49 = vadd.f32 %v5586_v47, %v4221_v48 }
0x1a21   :  { %v6264_v50 = vpop.f32.mrf.mxu0 }
0x1a22   :  { %v4226_v51 = vmul.f32 0.70710677, %v4222_v49  ;;  %v4225_v53 = vmul.f32 0.5, %v4222_v49 }
0x1a24   :  { %6614 = verf.f32 %v4226_v51 }
0x1a31   :  { %v6615_v52 = vpop.eup %6614 }
0x1a32   :  { %v4228_v54 = vadd.f32 1.0, %v6615_v52  ;;  %v4524_v52 = vld [vmem:[#allocation92 + $0x8] sm:$0xff] }
0x1a34   :  { %v4229_v55 = vmul.f32 %v4228_v54, %v4225_v53  ;;  %v4525_v53 = vld [vmem:[#allocation92 + $0x10] sm:$0xff]  ;;  %v4526_v54 = vld [vmem:[#allocation92 + $0x18] sm:$0xff] }
0x1a36   :  { %6290 = vmatmul.mubr.msk.f32.vlgmr.msra.gmra.mxu0 %vm3879_vm10, %v4229_v55  ;;  %v4527_v55 = vld [vmem:[#allocation92 + $0x20] sm:$0xff] }
0x1a37   :  { %6294 = vmatprep.mubr.msk.f32.mxu0 %vm1211_vm1, %v4523_v15 }
0x1af6   :  { %v4305_v61 = vpop.f32.mrf.mxu0 }
0x1af7   :  { %v4306_v62 = vadd.f32 %v5589_v60, %v4305_v61 }
0x1af8   :  { %v6291_v63 = vpop.f32.mrf.mxu0 }
0x1af9   :  { %v9171_v0 = vadd.f32 %v4306_v62, %v9137_v22  ;;  %v4316_v22 = vld [vmem:[#allocation88] sm:$0x3]  ;;  %v4569_v62 = vpop.permute.xlu1 %4568 }
0x1afa   :  { %v4346_v32 = vrot.slane %v4316_v22, %v3590_v29  ;;  %v4350_v33 = vrot.slane %v4316_v22, %v3594_v17  ;;  %v5594_v29 = vld [vmem:[#allocation91] ss:$0 sm:$0xff] }
0x1afb   :  { %5593 = vmatmul.mubr.msk.f32.vlgmr.msra.gmra.mxu1 %vm1146_vm0, %v9171_v0 }
0x1afc   :  { %4453 = vmatpush1.msra.mxu1 %v4332_v1 }
0x1afd   :  { %4454 = vmatprep.subr.mxu1 %v8214_v21 }
0x1afe   :  { %4455 = vmatpush1.msra.mxu1 %v4331_v3 }
0x1aff   :  { %4456 = vmatprep.subr.mxu1 %v8214_v21 }
0x1b00   :  { %4457 = vmatpush1.msra.mxu1 %v4330_v4 }
0x1b01   :  { %4458 = vmatprep.subr.mxu1 %v8214_v21 }
0x1b02   :  { %4459 = vmatpush1.msra.mxu1 %v4329_v5  ;;  %v4559_v5 = vpop.permute.xlu1 %4558 }
0x1b03   :  { %4460 = vmatprep.subr.mxu1 %v8214_v21 }
0x1b04   :  { %4461 = vmatpush1.msra.mxu1 %v4328_v6 }
0x1b05   :  { %4462 = vmatprep.subr.mxu1 %v8214_v21 }
0x1b06   :  { %4463 = vmatpush1.msra.mxu1 %v4327_v7 }
0x1b07   :  { %4464 = vmatprep.subr.mxu1 %v8214_v21 }
0x1b08   :  { %4465 = vmatpush1.msra.mxu1 %v4326_v8 }
0x1b09   :  { %4466 = vmatprep.subr.mxu1 %v8214_v21 }
0x1b0a   :  { %4467 = vmatpush1.msra.mxu1 %v4325_v9 }
0x1b0b   :  { %4468 = vmatprep.subr.mxu1 %v8214_v21 }
0x1b0c   :  { %4469 = vmatpush1.msra.mxu1 %v4324_v25 }
0x1b0d   :  { %4470 = vmatprep.subr.mxu1 %v8214_v21 }
0x1b0e   :  { %4471 = vmatpush1.msra.mxu1 %v4323_v31 }
0x1b0f   :  { %4472 = vmatprep.subr.mxu1 %v8214_v21 }
0x1b10   :  { %4473 = vmatpush1.msra.mxu1 %v4322_v11 }
0x1b11   :  { %4474 = vmatprep.subr.mxu1 %v8214_v21 }
0x1b12   :  { %4475 = vmatpush1.msra.mxu1 %v4321_v26 }
0x1b13   :  { %4476 = vmatprep.subr.mxu1 %v8214_v21 }
0x1b14   :  { %4477 = vmatpush1.msra.mxu1 %v4320_v12 }
0x1b15   :  { %4478 = vmatprep.subr.mxu1 %v8214_v21 }
0x1b16   :  { %4479 = vmatpush1.msra.mxu1 %v4319_v36 }
0x1b17   :  { %4480 = vmatprep.subr.mxu1 %v8214_v21 }
0x1b18   :  { %4481 = vmatpush1.msra.mxu1 %v4318_v27 }
0x1b19   :  { %4482 = vmatprep.subr.mxu1 %v8214_v21 }
0x1b1a   :  { %4483 = vmatpush1.msra.mxu1 %v4317_v23 }
0x1b1b   :  { %4500 = vmatprep.subr.mxu1 %v8214_v21 }
0x1b1c   :  { %4501 = vmatpush2.msra.mxu1 %v4340_v28  ;;  %v4549_v28 = vpop.permute.xlu1 %4548 }
0x1b1d   :  { %4502 = vmatprep.subr.mxu1 %v8214_v21 }
0x1b1e   :  { %4503 = vmatpush2.msra.mxu1 %v4339_v13 }
0x1b1f   :  { %4504 = vmatprep.subr.mxu1 %v8214_v21 }
0x1b20   :  { %4505 = vmatpush2.msra.mxu1 %v4338_v14 }
0x1b21   :  { %4506 = vmatprep.subr.mxu1 %v8214_v21 }
0x1b22   :  { %4507 = vmatpush2.msra.mxu1 %v4337_v16 }
0x1b23   :  { %4508 = vmatprep.subr.mxu1 %v8214_v21 }
0x1b24   :  { %4509 = vmatpush2.msra.mxu1 %v4336_v18 }
0x1b25   :  { %4510 = vmatprep.subr.mxu1 %v8214_v21 }
0x1b26   :  { %4511 = vmatpush2.msra.mxu1 %v4335_v19 }
0x1b27   :  { %4512 = vmatprep.subr.mxu1 %v8214_v21 }
0x1b28   :  { %4513 = vmatpush2.msra.mxu1 %v4334_v20 }
0x1b29   :  { %4514 = vmatprep.subr.mxu1 %v8214_v21 }
0x1b2a   :  { %4515 = vmatpush2.msra.mxu1 %v4333_v30 }
0x1b2b   :  { %6358 = vmatprep.subr.mxu1 %v8214_v21 }
0x1bbb   :  { %v4428_v34 = vpop.f32.mrf.mxu1 }
0x1bbc   :  { %v4429_v35 = vadd.f32 %v4428_v34, %v4346_v32 }
0x1bbd   :  { %v4430_v37 = vpop.f32.mrf.mxu1 }
0x1bbe   :  { %v4435_v38 = vmul.f32 0.70710677, %v4429_v35  ;;  %v4431_v39 = vadd.f32 %v4430_v37, %v4350_v33  ;;  %v4433_v46 = vmul.f32 0.5, %v4429_v35 }
0x1bc0   :  { %6616 = verf.f32 %v4435_v38  ;;  %v4436_v2 = vmul.f32 0.70710677, %v4431_v39  ;;  %v4434_v43 = vmul.f32 0.5, %v4431_v39 }
0x1bc2   :  { %6618 = verf.f32 %v4436_v2 }
0x1bcd   :  { %v6617_v40 = vpop.eup %6616 }
0x1bce   :  { %v4439_v42 = vadd.f32 1.0, %v6617_v40 }
0x1bcf   :  { %v6619_v41 = vpop.eup %6618 }
0x1bd0   :  { %v4440_v44 = vadd.f32 1.0, %v6619_v41  ;;  %v4441_v48 = vmul.f32 %v4439_v42, %v4433_v46 }
0x1bd2   :  { %v4442_v47 = vmul.f32 %v4440_v44, %v4434_v43 }
0x1bd4   :  { %5595 = vmatprep.mubr.msk.f32.mxu1 %vm1386_vm3, %v4442_v47 }
0x1bd5   :  { %4517 = vmatmul.mubr.f32.vlgmr.msra.gmra.mxu1 %v4441_v48 }
0x1bd6   :  { %6360 = vmatprep.mubr.msk.f32.mxu1 %vm8215_vm2, %v8214_v21 }
0x1c95   :  { %v4518_v17 = vpop.f32.mrf.mxu1 }
0x1c96   :  { %v4519_v49 = vadd.f32 %v5594_v29, %v4518_v17 }
0x1c97   :  { %v4520_v50 = vpop.f32.mrf.mxu1 }
0x1c98   :  { %v9208_v51 = vadd.f32 %v4519_v49, %v9171_v0  ;;  %v4564_v0 = vpop.permute.xlu0 %4563 }
0x1c9a   :  { %6292 = vmatprep.subr.mxu0 %v9208_v51 }
0x1c9b   :  { %6293 = vmatpush3.msra.mxu0 %v9208_v51 }
0x1c9c   :  { %6295 = vmatmul.mubr.msk.f32.vlgmr.msra.gmra.mxu0 %vm1211_vm1, %v4524_v52  ;;  %6306 = vmatprep.subr.mxu0 %v8214_v21  ;;  %v4554_v8 = vpop.permute.xlu0 %4553 }
0x1c9d   :  { %6297 = vmatprep.mubr.msk.f32.mxu0 %vm1211_vm1, %v4525_v53 }
0x1ca0   :  { %6298 = vmatmul.mubr.msk.f32.gmra.mxu0 %vm1211_vm1, %v4526_v54  ;;  %v4544_v18 = vpop.permute.xlu0 %4543 }
0x1ca1   :  { %6300 = vmatprep.mubr.msk.f32.mxu0 %vm1211_vm1, %v4527_v55 }
0x1ca4   :  { %6301 = vmatmul.mubr.msk.f32.gmra.mxu0 %vm1211_vm1, %v4528_v56 }
0x1ca5   :  { %6303 = vmatprep.mubr.msk.f32.mxu0 %vm1211_vm1, %v4529_v57 }
0x1ca8   :  { %6304 = vmatmul.mubr.msk.f32.gmra.mxu0 %vm1211_vm1, %v4530_v10 }
0x1ca9   :  { %6322 = vmatprep.mubr.msk.f32.mxu0 %vm8215_vm2, %v8214_v21 }
0x1d5c   :  { %v6296_v60 = vpop.f32.mrf.mxu0 }
0x1d5d   :  { %v4677_v13 = vadd.f32 %v6296_v60, %v4549_v28 }
0x1d5e   :  { %v4671_v61 = vpop.f32.mrf.mxu0 }
0x1d5f   :  { %v4672_v19 = vadd.f32 %v4671_v61, %v4544_v18  ;;  %v4719_v30 = vmul.f32 0.70710677, %v4677_v13  ;;  %v4711_v57 = vmul.f32 0.5, %v4677_v13  ;;  %v6655_v13 = vld [vmem:[#allocation2] sm:$0xff] }
0x1d60   :  { %v6299_v63 = vpop.f32.mrf.mxu0 }
0x1d61   :  { %v4687_v31 = vadd.f32 %v6299_v63, %v4559_v5  ;;  %v4718_v22 = vmul.f32 0.70710677, %v4672_v19  ;;  %v4710_v60 = vmul.f32 0.5, %v4672_v19  ;;  %v4831_v63 = vld [vmem:[#allocation98] sm:$0xff]  ;;  %v4836_v5 = vld [vmem:[#allocation98 + $0x28] sm:$0xff] }
0x1d62   :  { %v4681_v1 = vpop.f32.mrf.mxu0 }
0x1d63   :  { %v4682_v36 = vadd.f32 %v4681_v1, %v4554_v8  ;;  %v4721_v14 = vmul.f32 0.70710677, %v4687_v31  ;;  %v4713_v49 = vmul.f32 0.5, %v4687_v31  ;;  %v4833_v1 = vld [vmem:[#allocation98 + $0x10] sm:$0xff]  ;;  %v4882_v8 = vpop.permute.xlu0 %4881 }
0x1d64   :  { %v6302_v3 = vpop.f32.mrf.mxu0 }
0x1d65   :  { %v4697_v4 = vadd.f32 %v6302_v3, %v4569_v62  ;;  %v4720_v20 = vmul.f32 0.70710677, %v4682_v36  ;;  %v4712_v56 = vmul.f32 0.5, %v4682_v36  ;;  %v4539_v62 = vld [vmem:[#allocation95] sm:$0xff]  ;;  %v4834_v3 = vld [vmem:[#allocation98 + $0x18] sm:$0xff]  ;;  %v4887_v36 = vpop.permute.xlu1 %4886 }
0x1d66   :  { %v4691_v6 = vpop.f32.mrf.mxu0 }
0x1d67   :  { %v4692_v7 = vadd.f32 %v4691_v6, %v4564_v0  ;;  %v4723_v9 = vmul.f32 0.70710677, %v4697_v4  ;;  %v4715_v43 = vmul.f32 0.5, %v4697_v4  ;;  %v4832_v0 = vld [vmem:[#allocation98 + $0x8] sm:$0xff]  ;;  %v4835_v4 = vld [vmem:[#allocation98 + $0x20] sm:$0xff]  ;;  %v4837_v6 = vld [vmem:[#allocation98 + $0x30] sm:$0xff] }
0x1d68   :  { %v6305_v25 = vpop.f32.mrf.mxu0 }
0x1d69   :  { %v4707_v11 = vadd.f32 %v6305_v25, %v4579_v58  ;;  %v4722_v26 = vmul.f32 0.70710677, %v4692_v7  ;;  %6620 = verf.f32 %v4723_v9  ;;  %v4714_v29 = vmul.f32 0.5, %v4692_v7  ;;  %v4838_v7 = vld [vmem:[#allocation98 + $0x38] sm:$0xff]  ;;  %v4872_v9 = vpop.permute.xlu0 %4871  ;;  %v4877_v18 = vpop.permute.xlu1 %4876 }
0x1d6a   :  { %v4701_v12 = vpop.f32.mrf.mxu0 }
0x1d6b   :  { %v4725_v27 = vmul.f32 0.70710677, %v4707_v11  ;;  %v4702_v23 = vadd.f32 %v4701_v12, %v4574_v59  ;;  %v4717_v35 = vmul.f32 0.5, %v4707_v11 }
0x1d6d   :  { %6622 = verf.f32 %v4725_v27  ;;  %v4724_v16 = vmul.f32 0.70710677, %v4702_v23  ;;  %v4716_v40 = vmul.f32 0.5, %v4702_v23  ;;  %v4862_v25 = vpop.permute.xlu0 %4861 }
0x1d6e   :  { %6624 = verf.f32 %v4722_v26 }
0x1d6f   :  { %6626 = verf.f32 %v4724_v16 }
0x1d70   :  { %6628 = verf.f32 %v4721_v14 }
0x1d71   :  { %6630 = verf.f32 %v4720_v20  ;;  %v4852_v31 = vpop.permute.xlu0 %4851 }
0x1d72   :  { %6632 = verf.f32 %v4719_v30 }
0x1d73   :  { %6634 = verf.f32 %v4718_v22 }
0x1d75   :  { %v4753_v11 = vpop.permute.xlu0 %4752 }
0x1d76   :  { %v6621_v32 = vpop.eup %6620 }
0x1d77   :  { %v4739_v39 = vadd.f32 1.0, %v6621_v32  ;;  %v4867_v32 = vpop.permute.xlu1 %4866 }
0x1d79   :  { %v4747_v15 = vmul.f32 %v4739_v39, %v4715_v43 }
0x1d7a   :  { %v6623_v33 = vpop.eup %6622 }
0x1d7b   :  { %v6625_v34 = vpop.eup %6624  ;;  %v4741_v37 = vadd.f32 1.0, %v6623_v33  ;;  %v4857_v43 = vpop.permute.xlu1 %4856 }
0x1d7c   :  { %v6627_v38 = vpop.eup %6626  ;;  %v4738_v44 = vadd.f32 1.0, %v6625_v34 }
0x1d7d   :  { %v4749_v2 = vmul.f32 %v4741_v37, %v4717_v35  ;;  %v4740_v41 = vadd.f32 1.0, %v6627_v38  ;;  %v6629_v42 = vpop.eup %6628 }
0x1d7e   :  { %v6631_v47 = vpop.eup %6630  ;;  %v4737_v48 = vadd.f32 1.0, %v6629_v42  ;;  %v4746_v52 = vmul.f32 %v4738_v44, %v4714_v29 }
0x1d7f   :  { %v4748_v46 = vmul.f32 %v4740_v41, %v4716_v40  ;;  %6307 = vmatpush3.msra.mxu0 %v4749_v2  ;;  %v6633_v17 = vpop.eup %6632  ;;  %v4736_v50 = vadd.f32 1.0, %v6631_v47 }
0x1d80   :  { %6308 = vmatprep.subr.mxu0 %v8214_v21  ;;  %v6635_v53 = vpop.eup %6634  ;;  %v4735_v54 = vadd.f32 1.0, %v6633_v17  ;;  %v4745_v55 = vmul.f32 %v4737_v48, %v4713_v49 }
0x1d81   :  { %6309 = vmatpush3.msra.mxu0 %v4748_v46  ;;  %v4734_v10 = vadd.f32 1.0, %v6635_v53  ;;  %v4744_v58 = vmul.f32 %v4736_v50, %v4712_v56 }
0x1d82   :  { %6310 = vmatprep.subr.mxu0 %v8214_v21  ;;  %v4743_v59 = vmul.f32 %v4735_v54, %v4711_v57 }
0x1d83   :  { %6311 = vmatpush3.msra.mxu0 %v4747_v15  ;;  %v4742_v61 = vmul.f32 %v4734_v10, %v4710_v60 }
0x1d84   :  { %6312 = vmatprep.subr.mxu0 %v8214_v21 }
0x1d85   :  { %6313 = vmatpush3.msra.mxu0 %v4746_v52 }
0x1d86   :  { %6314 = vmatprep.subr.mxu0 %v8214_v21 }
0x1d87   :  { %6315 = vmatpush3.msra.mxu0 %v4745_v55 }
0x1d88   :  { %6316 = vmatprep.subr.mxu0 %v8214_v21 }
0x1d89   :  { %6317 = vmatpush3.msra.mxu0 %v4744_v58 }
0x1d8a   :  { %6318 = vmatprep.subr.mxu0 %v8214_v21 }
0x1d8b   :  { %6319 = vmatpush3.msra.mxu0 %v4743_v59 }
0x1d8c   :  { %6320 = vmatprep.subr.mxu0 %v8214_v21 }
0x1d8d   :  { %6321 = vmatpush3.msra.mxu0 %v4742_v61 }
0x1d8e   :  { %6323 = vmatmul.mubr.msk.f32.vlgmr.msra.gmra.mxu0 %vm1386_vm3, %v4539_v62  ;;  %6325 = vmatprep.subr.mxu0 %v9127_v24 }
0x1d8f   :  { %6326 = vmatpush3.msra.mxu0 %v9127_v24  ;;  %6327 = vmatprep.mubr.msk.f32.mxu0 %vm1211_vm1, %v4831_v63 }
0x1d90   :  { %6339 = vmatprep.subr.mxu0 %v8214_v21 }
0x1d92   :  { %6328 = vmatmul.mubr.msk.f32.vlgmr.msra.gmra.mxu0 %vm1211_vm1, %v4832_v0 }
0x1d93   :  { %6330 = vmatprep.mubr.msk.f32.mxu0 %vm1211_vm1, %v4833_v1 }
0x1d96   :  { %6331 = vmatmul.mubr.msk.f32.gmra.mxu0 %vm1211_vm1, %v4834_v3 }
0x1d97   :  { %6333 = vmatprep.mubr.msk.f32.mxu0 %vm1211_vm1, %v4835_v4 }
0x1d9a   :  { %6334 = vmatmul.mubr.msk.f32.gmra.mxu0 %vm1211_vm1, %v4836_v5 }
0x1d9b   :  { %6336 = vmatprep.mubr.msk.f32.mxu0 %vm1211_vm1, %v4837_v6 }
0x1d9e   :  { %6337 = vmatmul.mubr.msk.f32.gmra.mxu0 %vm1211_vm1, %v4838_v7 }
0x1d9f   :  { %6355 = vmatprep.mubr.msk.f32.mxu0 %vm8215_vm2, %v8214_v21 }
0x1e4e   :  { %v4824_v26 = vpop.f32.mrf.mxu0 }
0x1e4f   :  { %v4825_v12 = vadd.f32 %v4824_v26, %v4753_v11 }
0x1e50   :  { %v6324_v27 = vpop.f32.mrf.mxu0 }
0x1e51   :  { %v4828_v23 = vadd.f32 %v4825_v12, %v9208_v51 }
0x1e52   :  { %v6329_v28 = vpop.f32.mrf.mxu0 }
0x1e53   :  { %v4829_v14 = vsub.f32 %v6655_v13, %v4828_v23  ;;  %v4985_v44 = vadd.f32 %v6329_v28, %v4857_v43  ;;  %v4847_v28 = vld [vmem:[%s9397_s4] sm:$0xff]  ;;  %v5137_v13 = vld [vmem:[#allocation100] sm:$0x7] }
0x1e54   :  { %v4979_v16 = vpop.f32.mrf.mxu0  ;;  %6359 = vmatpush3.msk.msra.mxu1 %vm4052_vm11, %v5137_v13 }
0x1e55   :  { %4830 = vst.msk [vmem:[#allocation2] sm:$0xff] %vm2683_vm8, %v4829_v14  ;;  %v4980_v48 = vadd.f32 %v4979_v16, %v4852_v31  ;;  %v5027_v29 = vmul.f32 0.70710677, %v4985_v44  ;;  %v5019_v11 = vmul.f32 0.5, %v4985_v44  ;;  %v5144_v14 = vld [vmem:[%s8600_s17] sm:$0x7]  ;;  %6363 = vmatprep.subr.mxu1 %v8214_v21  ;;  %v5061_v16 = vpop.permute.xlu1 %5060 }
0x1e56   :  { %v6332_v19 = vpop.f32.mrf.mxu0  ;;  %v5619_v44 = vld [vmem:[%s8605_s27] ss:$0 sm:$0xff] }
0x1e57   :  { %v4995_v38 = vadd.f32 %v6332_v19, %v4867_v32  ;;  %v5026_v17 = vmul.f32 0.70710677, %v4980_v48  ;;  %v5018_v27 = vmul.f32 0.5, %v4980_v48  ;;  %v5141_v32 = vld [vmem:[#allocation103 + $0x10] sm:$0xff] }
0x1e58   :  { %v4989_v20 = vpop.f32.mrf.mxu0 }
0x1e59   :  { %v4990_v40 = vadd.f32 %v4989_v20, %v4862_v25  ;;  %v5029_v46 = vmul.f32 0.70710677, %v4995_v38  ;;  %v5021_v5 = vmul.f32 0.5, %v4995_v38 }
0x1e5a   :  { %v6335_v30 = vpop.f32.mrf.mxu0 }
0x1e5b   :  { %v5005_v22 = vadd.f32 %v6335_v30, %v4877_v18  ;;  %v5028_v15 = vmul.f32 0.70710677, %v4990_v40  ;;  %v5020_v31 = vmul.f32 0.5, %v4990_v40 }
0x1e5c   :  { %v4999_v33 = vpop.f32.mrf.mxu0 }
0x1e5d   :  { %v5000_v34 = vadd.f32 %v4999_v33, %v4872_v9  ;;  %v5031_v35 = vmul.f32 0.70710677, %v5005_v22  ;;  %v5023_v60 = vmul.f32 0.5, %v5005_v22  ;;  %v5142_v22 = vld [vmem:[#allocation103 + $0x18] sm:$0xff]  ;;  %v5140_v33 = vld [vmem:[#allocation103 + $0x8] sm:$0xff] }
0x1e5e   :  { %v6338_v37 = vpop.f32.mrf.mxu0 }
0x1e5f   :  { %v5015_v39 = vadd.f32 %v6338_v37, %v4887_v36  ;;  %v5030_v2 = vmul.f32 0.70710677, %v5000_v34  ;;  %6636 = verf.f32 %v5031_v35  ;;  %v5022_v3 = vmul.f32 0.5, %v5000_v34  ;;  %v5139_v34 = vld [vmem:[#allocation103] sm:$0xff] }
0x1e60   :  { %v5009_v51 = vpop.f32.mrf.mxu0 }
0x1e61   :  { %v5033_v41 = vmul.f32 0.70710677, %v5015_v39  ;;  %v5010_v42 = vadd.f32 %v5009_v51, %v4882_v8  ;;  %v5025_v53 = vmul.f32 0.5, %v5015_v39 }
0x1e63   :  { %6638 = verf.f32 %v5033_v41  ;;  %v5032_v47 = vmul.f32 0.70710677, %v5010_v42  ;;  %v5024_v10 = vmul.f32 0.5, %v5010_v42 }
0x1e64   :  { %6640 = verf.f32 %v5030_v2 }
0x1e65   :  { %6642 = verf.f32 %v5032_v47 }
0x1e66   :  { %6644 = verf.f32 %v5029_v46  ;;  %v5617_v46 = vld [vmem:[%s8595_s12] ss:$0 sm:$0xff] }
0x1e67   :  { %6646 = verf.f32 %v5028_v15 }
0x1e68   :  { %6648 = verf.f32 %v5027_v29 }
0x1e69   :  { %6650 = verf.f32 %v5026_v17 }
0x1e6c   :  { %v6637_v49 = vpop.eup %6636 }
0x1e6d   :  { %v5047_v56 = vadd.f32 1.0, %v6637_v49 }
0x1e6f   :  { %v5055_v1 = vmul.f32 %v5047_v56, %v5023_v60 }
0x1e70   :  { %v6639_v50 = vpop.eup %6638 }
0x1e71   :  { %v6641_v52 = vpop.eup %6640  ;;  %v5049_v54 = vadd.f32 1.0, %v6639_v50 }
0x1e72   :  { %v6643_v55 = vpop.eup %6642  ;;  %v5046_v61 = vadd.f32 1.0, %v6641_v52 }
0x1e73   :  { %v5057_v57 = vmul.f32 %v5049_v54, %v5025_v53  ;;  %v5048_v58 = vadd.f32 1.0, %v6643_v55  ;;  %v6645_v59 = vpop.eup %6644 }
0x1e74   :  { %v6647_v63 = vpop.eup %6646  ;;  %v5045_v0 = vadd.f32 1.0, %v6645_v59  ;;  %v5054_v7 = vmul.f32 %v5046_v61, %v5022_v3 }
0x1e75   :  { %v5056_v62 = vmul.f32 %v5048_v58, %v5024_v10  ;;  %6340 = vmatpush3.msra.mxu0 %v5057_v57  ;;  %v6649_v4 = vpop.eup %6648  ;;  %v5044_v6 = vadd.f32 1.0, %v6647_v63 }
0x1e76   :  { %6341 = vmatprep.subr.mxu0 %v8214_v21  ;;  %v6651_v8 = vpop.eup %6650  ;;  %v5043_v9 = vadd.f32 1.0, %v6649_v4  ;;  %v5053_v25 = vmul.f32 %v5045_v0, %v5021_v5 }
0x1e77   :  { %6342 = vmatpush3.msra.mxu0 %v5056_v62  ;;  %v5042_v26 = vadd.f32 1.0, %v6651_v8  ;;  %v5052_v12 = vmul.f32 %v5044_v6, %v5020_v31 }
0x1e78   :  { %6343 = vmatprep.subr.mxu0 %v8214_v21  ;;  %v5051_v36 = vmul.f32 %v5043_v9, %v5019_v11 }
0x1e79   :  { %6344 = vmatpush3.msra.mxu0 %v5055_v1  ;;  %v5050_v23 = vmul.f32 %v5042_v26, %v5018_v27 }
0x1e7a   :  { %6345 = vmatprep.subr.mxu0 %v8214_v21 }
0x1e7b   :  { %6346 = vmatpush3.msra.mxu0 %v5054_v7 }
0x1e7c   :  { %6347 = vmatprep.subr.mxu0 %v8214_v21 }
0x1e7d   :  { %6348 = vmatpush3.msra.mxu0 %v5053_v25 }
0x1e7e   :  { %6349 = vmatprep.subr.mxu0 %v8214_v21 }
0x1e7f   :  { %6350 = vmatpush3.msra.mxu0 %v5052_v12 }
0x1e80   :  { %6351 = vmatprep.subr.mxu0 %v8214_v21 }
0x1e81   :  { %6352 = vmatpush3.msra.mxu0 %v5051_v36 }
0x1e82   :  { %6353 = vmatprep.subr.mxu0 %v8214_v21 }
0x1e83   :  { %6354 = vmatpush3.msra.mxu0 %v5050_v23 }
0x1e84   :  { %6356 = vmatmul.mubr.msk.f32.vlgmr.msra.gmra.mxu0 %vm1386_vm3, %v4847_v28  ;;  %6374 = vmatprep.subr.mxu0 %v8214_v21 }
0x1e85   :  { %6376 = vmatprep.mubr.msk.f32.mxu0 %vm8215_vm2, %v8214_v21  ;;  %6375 = vmatpush3.msk.msra.mxu0 %vm4052_vm11, %v5144_v14 }
0x1f44   :  { %v5132_v18 = vpop.f32.mrf.mxu0 }
0x1f45   :  { %v5133_v19 = vadd.f32 %v5132_v18, %v5061_v16 }
0x1f46   :  { %v6357_v20 = vpop.f32.mrf.mxu0 }
0x1f47   :  { %v5136_v30 = vadd.f32 %v5133_v19, %v9127_v24  ;;  %v5614_v24 = vld [vmem:[#allocation101] ss:$0 sm:$0xff] }
0x1f49   :  { %6361 = vmatmul.mubr.msk.f32.vlgmr.msra.gmra.mxu1 %vm4048_vm12, %v5136_v30  ;;  %6377 = vmatmul.mubr.msk.f32.vlgmr.msra.gmra.mxu0 %vm4048_vm12, %v5136_v30 }
0x1f4a   :  { %6371 = vmatprep.mubr.msk.f32.mxu1 %vm8215_vm2, %v8214_v21  ;;  %6364 = vmatpush3.msra.mxu1 %v5142_v22 }
0x1f4b   :  { %6365 = vmatprep.subr.mxu1 %v8214_v21 }
0x1f4c   :  { %6366 = vmatpush3.msra.mxu1 %v5141_v32 }
0x1f4d   :  { %6367 = vmatprep.subr.mxu1 %v8214_v21 }
0x1f4e   :  { %6368 = vmatpush3.msra.mxu1 %v5140_v33 }
0x1f4f   :  { %6369 = vmatprep.subr.mxu1 %v8214_v21 }
0x1f50   :  { %6370 = vmatpush3.msra.mxu1 %v5139_v34 }
0x2009   :  { %v5224_v35 = vpop.f32.mrf.mxu1  ;;  %v5387_v37 = vpop.f32.mrf.mxu0 }
0x200a   :  { %v5225_v38 = vadd.f32 %v5614_v24, %v5224_v35  ;;  %v5388_v47 = vadd.f32 %v5619_v44, %v5387_v37 }
0x200b   :  { %v6362_v39 = vpop.f32.mrf.mxu1  ;;  %v6378_v2 = vpop.f32.mrf.mxu0 }
0x200c   :  { %v5229_v51 = vmul.f32 0.70710677, %v5225_v38  ;;  %v5228_v41 = vmul.f32 0.5, %v5225_v38 }
0x200e   :  { %6652 = verf.f32 %v5229_v51 }
0x201b   :  { %v6653_v40 = vpop.eup %6652 }
0x201c   :  { %v5231_v42 = vadd.f32 1.0, %v6653_v40 }
0x201e   :  { %v5232_v43 = vmul.f32 %v5231_v42, %v5228_v41 }
0x2020   :  { %6372 = vmatmul.mubr.msk.f32.vlgmr.msra.gmra.mxu1 %vm3093_vm7, %v5232_v43 }
0x20e0   :  { %v5308_v21 = vpop.f32.mrf.mxu1 }
0x20e1   :  { %v5309_v48 = vadd.f32 %v5617_v46, %v5308_v21 }
0x20e2   :  { %v6373_v15 = vpop.f32.mrf.mxu1 }
0x20e3   :  { %v5391_v29 = vadd.f32 %v5388_v47, %v5309_v48 }
0x20e5   :  { %v5392_v17 = vadd.f32 %v5391_v29, %v9036_v45 }
0x20e7   :  { %5393 = vst.msk [vmem:[%s8610_s9] sm:$0xff] %vm1211_vm1, %v5392_v17 }
0x20e8   :  { %5398 = vsyncpa [#allocation4], 1 }
0x20e9   :  { %5399 = vsyncpa [#allocation6], 1 }
0x20ea   :  { %5400 = vsyncpa [#allocation9], 1 }
0x20eb   :  { %5401 = vsyncpa [#allocation12], 1 }
0x20ec   :  { %5402 = vsyncpa [#allocation15], 1 }
0x20ed   :  { %5403 = vsyncpa [#allocation18], 1 }
0x20ee   :  { %5404 = vsyncpa [#allocation21], 1 }
0x20ef   :  { %5405 = vsyncpa [#allocation24], 1 }
0x20f0   :  { %5406 = vsyncpa [#allocation27], 1 }
0x20f1   :  { %5407 = vsyncpa [#allocation30], 1 }
0x20f2   :  { %5408 = vsyncpa [#allocation33], 1 }
0x20f3   :  { %5409 = vsyncpa [#allocation36], 1 }
0x20f4   :  { %5410 = vsyncpa [#allocation39], 1 }
0x20f5   :  { %5411 = vsyncpa [#allocation42], 1 }
0x20f6   :  { %5412 = vsyncpa [#allocation45], 1 }
0x20f7   :  { %5413 = vsyncpa [#allocation48], 1 }
0x20f8   :  { %5414 = vsyncpa [#allocation51], 1 }
0x20f9   :  { %5415 = vsyncpa [#allocation54], 1 }
0x20fa   :  { %5416 = vsyncpa [#allocation57], 1 }
0x20fb   :  { %5417 = vsyncpa [#allocation60], 1 }
0x20fc   :  { %5418 = vsyncpa [#allocation63], 1 }
0x20fd   :  { %5419 = vsyncpa [#allocation66], 1 }
0x20fe   :  { %5420 = vsyncpa [#allocation69], 1 }
0x20ff   :  { %5421 = vsyncpa [#allocation72], 1 }
0x2100   :  { %5422 = vsyncpa [#allocation75], 1 }
0x2101   :  { %5423 = vsyncpa [#allocation78], 1 }
0x2102   :  { %5424 = vsyncpa [#allocation81], 1 }
0x2103   :  { %5425 = vsyncpa [#allocation84], 1 }
0x2104   :  { %5426 = vsyncpa [#allocation87], 1 }
0x2105   :  { %5427 = vsyncpa [#allocation90], 1 }
0x2106   :  { %5428 = vsyncpa [#allocation93], 1 }
0x2107   :  { %5429 = vsyncpa [#allocation96], 1 }
0x2108   :  { %5430 = vsyncpa [#allocation99], 1 }
0x2109   :  { %5431 = vsyncpa [#allocation102], 1 }

</bundles_post_ra>
